<compile_context>
chip_gen: v5e
topology: v5e:2x2
jax: 0.10.0
libtpu: 0.0.40
codegen_flags: <defaults>
</compile_context>

<pallas_src>
import functools

import jax
import jax.numpy as jnp
from jax.experimental import pallas as pl
from jax.experimental.pallas import tpu as pltpu

_BN_EPS = 1e-5          # nn.BatchNorm3d default
_LRELU_SLOPE = 0.01     # nn.LeakyReLU default negative_slope
_VMEM_LIMIT = 32 * 1024 * 1024


# ------------------------------ Pallas kernels ------------------------------

def _conv_bn_kernel(*refs, KD, pd, D, apply_act, dpad):
    """[optional prev-layer BN affine + LeakyReLU] + Conv3d (whole depth per
    batch) + per-batch BN partial statistics.

    refs (in order):
      x_ref : (1, D, HWCi)   bf16/f32  prev layer's pre-BN output (or raw input)
      a_ref : (1, HWCi) f32  [apply_act]  prev-layer BN scale row
      c_ref : (1, HWCi) f32  [apply_act]  prev-layer BN shift row
      w_ref : (KD, HWCi, HWCo) bf16  Toeplitz-expanded, padding-absorbed weight
      y_ref : (1, D, HWCo)  bf16     this layer's pre-BN conv output
      ps_ref: (1, 2, HWCo)  f32      [sum, sum-of-squares] partials (f32 acc)
      zpad  : (D + 2*pd, HWCi) f32   [dpad] depth-zero-padded activated input
    """
    i = 0
    x_ref = refs[i]; i += 1
    if apply_act:
        a_ref, c_ref = refs[i], refs[i + 1]; i += 2
    w_ref, y_ref, ps_ref = refs[i], refs[i + 1], refs[i + 2]; i += 3
    zpad_ref = refs[i] if dpad else None

    x = x_ref[0].astype(jnp.float32)                        # (D, HWCi)
    if apply_act:
        z = x * a_ref[...] + c_ref[...]
        z = jnp.where(z >= 0.0, z, _LRELU_SLOPE * z)
    else:
        z = x

    if dpad:
        # Depth zero-padding applied to the *activated* input (matches torch).
        zpad_ref[...] = jnp.zeros_like(zpad_ref)
        zpad_ref[pd:pd + D, :] = z
        taps = [zpad_ref[kd:kd + D, :].astype(jnp.bfloat16) for kd in range(KD)]
    else:
        taps = [z.astype(jnp.bfloat16)]

    acc = None
    for kd in range(KD):
        p = jnp.dot(taps[kd], w_ref[kd], preferred_element_type=jnp.float32)
        acc = p if acc is None else acc + p                 # (D, HWCo) f32

    y_ref[0] = acc.astype(y_ref.dtype)
    # Lane-dense (>=256 wide) stat rows from the f32 accumulator.
    ps_ref[0, 0:1, :] = jnp.sum(acc, axis=0, keepdims=True)
    ps_ref[0, 1:2, :] = jnp.sum(acc * acc, axis=0, keepdims=True)


def _bn_lrelu_kernel(y_ref, a_ref, c_ref, o_ref):
    """Final per-channel affine (from batch stats) + LeakyReLU, f32 output."""
    z = y_ref[0].astype(jnp.float32) * a_ref[...] + c_ref[...]
    o_ref[0] = jnp.where(z >= 0.0, z, _LRELU_SLOPE * z)


def _maxpool_kernel(x_ref, o_ref, *, D, H, WC, C):
    """3x3x3 / stride 1 / pad 1 max pool; whole depth per batch, running max."""
    m = None
    for kd in range(3):
        for kh in range(3):
            for kw in range(3):
                t = x_ref[0, kd:kd + D, kh:kh + H, kw * C:kw * C + WC]
                m = t if m is None else jnp.maximum(m, t)
    o_ref[0] = m


# ------------------------------ wrappers -------------------------------------

def _toeplitz_weight(w, ksize, padding, H, W):
    """wt[kd, (h,w,ci), (ho,wo,co)] = w[kd, h-ho+ph, w-wo+pw, ci, co] (else 0).

    Absorbs both the in-plane taps AND the H/W zero padding, so the conv LHS is
    the unpadded flattened plane and each depth tap is one dense matmul.
    """
    KD, KH, KW = ksize
    _, ph, pw = padding
    Cin, Cout = w.shape[3], w.shape[4]
    oh = (jnp.arange(H)[:, None, None] - jnp.arange(H)[None, :, None] + ph
          == jnp.arange(KH)[None, None, :]).astype(jnp.float32)     # (H, Ho, KH)
    ow = (jnp.arange(W)[:, None, None] - jnp.arange(W)[None, :, None] + pw
          == jnp.arange(KW)[None, None, :]).astype(jnp.float32)     # (W, Wo, KW)
    wt = jnp.einsum("dabic,hqa,wrb->dhwiqrc", w.astype(jnp.float32), oh, ow)
    return wt.reshape(KD, H * W * Cin, H * W * Cout).astype(jnp.bfloat16)


def conv_bn_stats(x_flat, in_affine, params, ksize, padding, N, D, H, W, Cin):
    """One Conv3d + BatchNorm3d(train stats) stage.

    x_flat   : (N, D, H*W*Cin) - previous stage's pre-BN output (bf16) or input.
    in_affine: None, or (a_row, c_row) of the previous stage's BN; this kernel
               applies it (plus LeakyReLU) to x_flat before the conv (fusion).
    Returns (y_flat bf16 (N, D, H*W*Cout), (a_row, c_row), Cout).
    """
    w, _b, gamma, beta = params   # conv bias dropped: train-mode BN cancels it exactly
    KD, _KH, _KW = ksize
    pd, _ph, _pw = padding
    Cout = w.shape[-1]
    HWCi, HWCo = H * W * Cin, H * W * Cout
    wt = _toeplitz_weight(w, ksize, padding, H, W)

    apply_act = in_affine is not None
    dpad = (KD > 1) or (pd > 0)
    Dp = D + 2 * pd

    in_specs = [pl.BlockSpec((1, D, HWCi), lambda n: (n, 0, 0))]
    operands = [x_flat]
    if apply_act:
        a_in, c_in = in_affine
        in_specs += [pl.BlockSpec((1, HWCi), lambda n: (0, 0)),
                     pl.BlockSpec((1, HWCi), lambda n: (0, 0))]
        operands += [a_in, c_in]
    in_specs.append(pl.BlockSpec((KD, HWCi, HWCo), lambda n: (0, 0, 0)))
    operands.append(wt)

    scratch = [pltpu.VMEM((Dp, HWCi), jnp.float32)] if dpad else []

    kern = functools.partial(_conv_bn_kernel, KD=KD, pd=pd, D=D,
                             apply_act=apply_act, dpad=dpad)
    y, ps = pl.pallas_call(
        kern,
        grid=(N,),
        in_specs=in_specs,
        out_specs=(pl.BlockSpec((1, D, HWCo), lambda n: (n, 0, 0)),
                   pl.BlockSpec((1, 2, HWCo), lambda n: (n, 0, 0))),
        out_shape=(jax.ShapeDtypeStruct((N, D, HWCo), jnp.bfloat16),
                   jax.ShapeDtypeStruct((N, 2, HWCo), jnp.float32)),
        scratch_shapes=scratch,
        compiler_params=pltpu.CompilerParams(
            dimension_semantics=("parallel",),
            vmem_limit_bytes=_VMEM_LIMIT),
    )(*operands)

    # Global batch statistics (biased variance, torch BN train mode) -> affine.
    # TODO(synk): E[x^2]-E[x]^2 can cancel if activation means grow; switch to a
    # shifted reduction if scales increase.
    s = ps.reshape(N, 2, H * W, Cout).sum(axis=(0, 2))            # (2, Cout)
    cnt = float(N * D * H * W)
    mean = s[0] / cnt
    var = jnp.maximum(s[1] / cnt - mean * mean, 0.0)
    scale = gamma.astype(jnp.float32) * jax.lax.rsqrt(var + _BN_EPS)
    shift = beta.astype(jnp.float32) - mean * scale
    a_row = jnp.tile(scale, H * W).reshape(1, HWCo)
    c_row = jnp.tile(shift, H * W).reshape(1, HWCo)
    return y, (a_row, c_row), Cout


def bn_lrelu_finalize(y_flat, affine, N, D, H, W, C):
    """Apply the last stage's BN affine + LeakyReLU, producing the branch output."""
    a_row, c_row = affine
    HWC = H * W * C
    out = pl.pallas_call(
        _bn_lrelu_kernel,
        grid=(N,),
        in_specs=[pl.BlockSpec((1, D, HWC), lambda n: (n, 0, 0)),
                  pl.BlockSpec((1, HWC), lambda n: (0, 0)),
                  pl.BlockSpec((1, HWC), lambda n: (0, 0))],
        out_specs=pl.BlockSpec((1, D, HWC), lambda n: (n, 0, 0)),
        out_shape=jax.ShapeDtypeStruct((N, D, HWC), jnp.float32),
        compiler_params=pltpu.CompilerParams(
            dimension_semantics=("parallel",),
            vmem_limit_bytes=_VMEM_LIMIT),
    )(y_flat, a_row, c_row)
    return out.reshape(N, D, H, W, C)


def maxpool3d_3x3x3_s1_p1(x_ndhwc):
    """nn.MaxPool3d(kernel_size=3, stride=1, padding=1), channels-last NDHWC."""
    N, D, H, W, C = x_ndhwc.shape
    xp = jnp.pad(x_ndhwc, ((0, 0), (1, 1), (1, 1), (1, 1), (0, 0)),
                 constant_values=-jnp.inf)
    Dp, Hp, Wp = D + 2, H + 2, W + 2
    xp = xp.reshape(N, Dp, Hp, Wp * C)
    out = pl.pallas_call(
        functools.partial(_maxpool_kernel, D=D, H=H, WC=W * C, C=C),
        grid=(N,),
        in_specs=[pl.BlockSpec((1, Dp, Hp, Wp * C), lambda n: (n, 0, 0, 0))],
        out_specs=pl.BlockSpec((1, D, H, W * C), lambda n: (n, 0, 0, 0)),
        out_shape=jax.ShapeDtypeStruct((N, D, H, W * C), jnp.float32),
        compiler_params=pltpu.CompilerParams(
            dimension_semantics=("parallel",),
            vmem_limit_bytes=_VMEM_LIMIT),
    )(xp)
    return out.reshape(N, D, H, W, C)


# ------------------------------ parameters ----------------------------------

def _init_conv_params(key, ksize, cin, cout):
    kw_, kb, kg, kbeta = jax.random.split(key, 4)
    KD, KH, KW = ksize
    w = 0.1 * jax.random.normal(kw_, (KD, KH, KW, cin, cout), jnp.float32)
    b = 0.05 * jax.random.normal(kb, (cout,), jnp.float32)   # kept for parity; unused (BN cancels it)
    gamma = 1.0 + 0.1 * jax.random.normal(kg, (cout,), jnp.float32)
    beta = 0.05 * jax.random.normal(kbeta, (cout,), jnp.float32)
    return (w, b, gamma, beta)


def init_insert_b_params(key, in_channel, out_channel_list, middle_channel_list):
    # branch2_3_1 is declared with in_channel=middle[2] but fed branch2_3's output
    # (middle[3] channels), so the config must have middle[2] == middle[3] to run.
    assert middle_channel_list[2] == middle_channel_list[3]
    specs = {
        "branch1_1":   ((1, 1, 1), in_channel,             middle_channel_list[0]),
        "branch1_2":   ((3, 3, 3), middle_channel_list[0], out_channel_list[0]),
        "branch2_1":   ((1, 1, 1), in_channel,             middle_channel_list[1]),
        "branch2_2":   ((1, 3, 3), middle_channel_list[1], middle_channel_list[2]),
        "branch2_3":   ((3, 1, 3), middle_channel_list[2], middle_channel_list[3]),
        "branch2_3_1": ((3, 3, 1), middle_channel_list[2], middle_channel_list[3]),
        "branch2_4":   ((3, 3, 3), middle_channel_list[3], out_channel_list[1]),
    }
    keys = jax.random.split(key, len(specs))
    return {name: _init_conv_params(k, ks, ci, co)
            for k, (name, (ks, ci, co)) in zip(keys, specs.items())}


# ------------------------------ InsertB forward (n=1) -----------------------

def insert_b_forward(x_ncdhw, params):
    # TODO(synk): PyTorch forward()'s debug print of branch shapes is omitted.
    N, Cin, D, H, W = x_ncdhw.shape
    x = jnp.transpose(x_ncdhw, (0, 2, 3, 4, 1)).astype(jnp.float32)   # NCDHW -> NDHWC
    x_flat = x.reshape(N, D, H * W * Cin).astype(jnp.bfloat16)

    # branch1: 1x1x1 conv -> 3x3x3 conv
    y, aff, c = conv_bn_stats(x_flat, None, params["branch1_1"], (1, 1, 1), (0, 0, 0), N, D, H, W, Cin)
    y, aff, c = conv_bn_stats(y, aff, params["branch1_2"], (3, 3, 3), (1, 1, 1), N, D, H, W, c)
    o1 = bn_lrelu_finalize(y, aff, N, D, H, W, c)

    # branch2: 1x1x1 -> (1,3,3) -> (3,1,3) -> (3,3,1) -> 3x3x3
    y, aff, c = conv_bn_stats(x_flat, None, params["branch2_1"], (1, 1, 1), (0, 0, 0), N, D, H, W, Cin)
    y, aff, c = conv_bn_stats(y, aff, params["branch2_2"], (1, 3, 3), (0, 1, 1), N, D, H, W, c)
    y, aff, c = conv_bn_stats(y, aff, params["branch2_3"], (3, 1, 3), (1, 0, 1), N, D, H, W, c)
    y, aff, c = conv_bn_stats(y, aff, params["branch2_3_1"], (3, 3, 1), (1, 1, 0), N, D, H, W, c)
    y, aff, c = conv_bn_stats(y, aff, params["branch2_4"], (3, 3, 3), (1, 1, 1), N, D, H, W, c)
    o2 = bn_lrelu_finalize(y, aff, N, D, H, W, c)

    # branch3: max pool (exact f32 path)
    o3 = maxpool3d_3x3x3_s1_p1(x)

    # TODO(synk): final channel-concat + NCDHW transpose stay in XLA (one pass
    # over the small output) instead of kernels writing into channel slices.
    out = jnp.concatenate([o1, o2, o3], axis=-1)        # torch.cat(dim=1) == channel axis
    return jnp.transpose(out, (0, 4, 1, 2, 3))          # NDHWC -> NCDHW


# ------------------------------ main -----------------------------------------

if __name__ == "__main__":
    key = jax.random.PRNGKey(0)
    kx, kp = jax.random.split(key)

    N, Cin, D, H, W = 2, 4, 8, 8, 8
    out_channel_list = [8, 8]
    middle_channel_list = [4, 4, 4, 4]

    x = jax.random.normal(kx, (N, Cin, D, H, W), jnp.float32)
    params = init_insert_b_params(kp, Cin, out_channel_list, middle_channel_list)

    y = jax.jit(insert_b_forward)(x, params)
    y = jax.block_until_ready(y)

    expected_c = out_channel_list[0] + out_channel_list[1] + Cin
    assert y.shape == (N, expected_c, D, H, W), y.shape
    assert bool(jnp.all(jnp.isfinite(y)))

    # Exact sanity check of the max-pool branch (channels [16:20] of the output).
    ref_pool = jax.lax.reduce_window(
        x, -jnp.inf, jax.lax.max,
        window_dimensions=(1, 1, 3, 3, 3), window_strides=(1, 1, 1, 1, 1),
        padding=((0, 0), (0, 0), (1, 1), (1, 1), (1, 1)))
    assert bool(jnp.allclose(y[:, out_channel_list[0] + out_channel_list[1]:], ref_pool))

    print("KERNEL_OK")
</pallas_src>

<mosaic_0001>
module attributes {stable_mosaic.version = 11 : i64} {
  func.func @_maxpool_kernel(%arg0: i32, %arg1: memref<1x10x10x40xf32, #tpu.memory_space<vmem>>, %arg2: memref<1x8x8x32xf32, #tpu.memory_space<vmem>>) attributes {dimension_semantics = [#tpu.dimension_semantics<parallel>], iteration_bounds = array<i64: 2>, scalar_prefetch = 0 : i64, scratch_operands = 0 : i64, tpu.core_type = #tpu.core_type<tc>, window_params = [{transform_indices = @transform_0, window_bounds = array<i64: 1, 10, 10, 40>}, {transform_indices = @transform_1, window_bounds = array<i64: 1, 8, 8, 32>}]} {
    %c0 = arith.constant 0 : index
    %c0_0 = arith.constant 0 : index
    %c0_1 = arith.constant 0 : index
    %c0_2 = arith.constant 0 : index
    %0 = vector.load %arg1[%c0, %c0_0, %c0_1, %c0_2] : memref<1x10x10x40xf32, #tpu.memory_space<vmem>>, vector<1x8x8x32xf32>
    %1 = vector.shape_cast %0 : vector<1x8x8x32xf32> to vector<8x8x32xf32>
    %c0_3 = arith.constant 0 : index
    %c0_4 = arith.constant 0 : index
    %c0_5 = arith.constant 0 : index
    %c4 = arith.constant 4 : index
    %2 = vector.load %arg1[%c0_3, %c0_4, %c0_5, %c4] : memref<1x10x10x40xf32, #tpu.memory_space<vmem>>, vector<1x8x8x32xf32>
    %3 = vector.shape_cast %2 : vector<1x8x8x32xf32> to vector<8x8x32xf32>
    %4 = arith.maximumf %1, %3 : vector<8x8x32xf32>
    %c0_6 = arith.constant 0 : index
    %c0_7 = arith.constant 0 : index
    %c0_8 = arith.constant 0 : index
    %c8 = arith.constant 8 : index
    %5 = vector.load %arg1[%c0_6, %c0_7, %c0_8, %c8] : memref<1x10x10x40xf32, #tpu.memory_space<vmem>>, vector<1x8x8x32xf32>
    %6 = vector.shape_cast %5 : vector<1x8x8x32xf32> to vector<8x8x32xf32>
    %7 = arith.maximumf %4, %6 : vector<8x8x32xf32>
    %c0_9 = arith.constant 0 : index
    %c0_10 = arith.constant 0 : index
    %c1 = arith.constant 1 : index
    %c0_11 = arith.constant 0 : index
    %8 = vector.load %arg1[%c0_9, %c0_10, %c1, %c0_11] : memref<1x10x10x40xf32, #tpu.memory_space<vmem>>, vector<1x8x8x32xf32>
    %9 = vector.shape_cast %8 : vector<1x8x8x32xf32> to vector<8x8x32xf32>
    %10 = arith.maximumf %7, %9 : vector<8x8x32xf32>
    %c0_12 = arith.constant 0 : index
    %c0_13 = arith.constant 0 : index
    %c1_14 = arith.constant 1 : index
    %c4_15 = arith.constant 4 : index
    %11 = vector.load %arg1[%c0_12, %c0_13, %c1_14, %c4_15] : memref<1x10x10x40xf32, #tpu.memory_space<vmem>>, vector<1x8x8x32xf32>
    %12 = vector.shape_cast %11 : vector<1x8x8x32xf32> to vector<8x8x32xf32>
    %13 = arith.maximumf %10, %12 : vector<8x8x32xf32>
    %c0_16 = arith.constant 0 : index
    %c0_17 = arith.constant 0 : index
    %c1_18 = arith.constant 1 : index
    %c8_19 = arith.constant 8 : index
    %14 = vector.load %arg1[%c0_16, %c0_17, %c1_18, %c8_19] : memref<1x10x10x40xf32, #tpu.memory_space<vmem>>, vector<1x8x8x32xf32>
    %15 = vector.shape_cast %14 : vector<1x8x8x32xf32> to vector<8x8x32xf32>
    %16 = arith.maximumf %13, %15 : vector<8x8x32xf32>
    %c0_20 = arith.constant 0 : index
    %c0_21 = arith.constant 0 : index
    %c2 = arith.constant 2 : index
    %c0_22 = arith.constant 0 : index
    %17 = vector.load %arg1[%c0_20, %c0_21, %c2, %c0_22] : memref<1x10x10x40xf32, #tpu.memory_space<vmem>>, vector<1x8x8x32xf32>
    %18 = vector.shape_cast %17 : vector<1x8x8x32xf32> to vector<8x8x32xf32>
    %19 = arith.maximumf %16, %18 : vector<8x8x32xf32>
    %c0_23 = arith.constant 0 : index
    %c0_24 = arith.constant 0 : index
    %c2_25 = arith.constant 2 : index
    %c4_26 = arith.constant 4 : index
    %20 = vector.load %arg1[%c0_23, %c0_24, %c2_25, %c4_26] : memref<1x10x10x40xf32, #tpu.memory_space<vmem>>, vector<1x8x8x32xf32>
    %21 = vector.shape_cast %20 : vector<1x8x8x32xf32> to vector<8x8x32xf32>
    %22 = arith.maximumf %19, %21 : vector<8x8x32xf32>
    %c0_27 = arith.constant 0 : index
    %c0_28 = arith.constant 0 : index
    %c2_29 = arith.constant 2 : index
    %c8_30 = arith.constant 8 : index
    %23 = vector.load %arg1[%c0_27, %c0_28, %c2_29, %c8_30] : memref<1x10x10x40xf32, #tpu.memory_space<vmem>>, vector<1x8x8x32xf32>
    %24 = vector.shape_cast %23 : vector<1x8x8x32xf32> to vector<8x8x32xf32>
    %25 = arith.maximumf %22, %24 : vector<8x8x32xf32>
    %c0_31 = arith.constant 0 : index
    %c1_32 = arith.constant 1 : index
    %c0_33 = arith.constant 0 : index
    %c0_34 = arith.constant 0 : index
    %26 = vector.load %arg1[%c0_31, %c1_32, %c0_33, %c0_34] : memref<1x10x10x40xf32, #tpu.memory_space<vmem>>, vector<1x8x8x32xf32>
    %27 = vector.shape_cast %26 : vector<1x8x8x32xf32> to vector<8x8x32xf32>
    %28 = arith.maximumf %25, %27 : vector<8x8x32xf32>
    %c0_35 = arith.constant 0 : index
    %c1_36 = arith.constant 1 : index
    %c0_37 = arith.constant 0 : index
    %c4_38 = arith.constant 4 : index
    %29 = vector.load %arg1[%c0_35, %c1_36, %c0_37, %c4_38] : memref<1x10x10x40xf32, #tpu.memory_space<vmem>>, vector<1x8x8x32xf32>
    %30 = vector.shape_cast %29 : vector<1x8x8x32xf32> to vector<8x8x32xf32>
    %31 = arith.maximumf %28, %30 : vector<8x8x32xf32>
    %c0_39 = arith.constant 0 : index
    %c1_40 = arith.constant 1 : index
    %c0_41 = arith.constant 0 : index
    %c8_42 = arith.constant 8 : index
    %32 = vector.load %arg1[%c0_39, %c1_40, %c0_41, %c8_42] : memref<1x10x10x40xf32, #tpu.memory_space<vmem>>, vector<1x8x8x32xf32>
    %33 = vector.shape_cast %32 : vector<1x8x8x32xf32> to vector<8x8x32xf32>
    %34 = arith.maximumf %31, %33 : vector<8x8x32xf32>
    %c0_43 = arith.constant 0 : index
    %c1_44 = arith.constant 1 : index
    %c1_45 = arith.constant 1 : index
    %c0_46 = arith.constant 0 : index
    %35 = vector.load %arg1[%c0_43, %c1_44, %c1_45, %c0_46] : memref<1x10x10x40xf32, #tpu.memory_space<vmem>>, vector<1x8x8x32xf32>
    %36 = vector.shape_cast %35 : vector<1x8x8x32xf32> to vector<8x8x32xf32>
    %37 = arith.maximumf %34, %36 : vector<8x8x32xf32>
    %c0_47 = arith.constant 0 : index
    %c1_48 = arith.constant 1 : index
    %c1_49 = arith.constant 1 : index
    %c4_50 = arith.constant 4 : index
    %38 = vector.load %arg1[%c0_47, %c1_48, %c1_49, %c4_50] : memref<1x10x10x40xf32, #tpu.memory_space<vmem>>, vector<1x8x8x32xf32>
    %39 = vector.shape_cast %38 : vector<1x8x8x32xf32> to vector<8x8x32xf32>
    %40 = arith.maximumf %37, %39 : vector<8x8x32xf32>
    %c0_51 = arith.constant 0 : index
    %c1_52 = arith.constant 1 : index
    %c1_53 = arith.constant 1 : index
    %c8_54 = arith.constant 8 : index
    %41 = vector.load %arg1[%c0_51, %c1_52, %c1_53, %c8_54] : memref<1x10x10x40xf32, #tpu.memory_space<vmem>>, vector<1x8x8x32xf32>
    %42 = vector.shape_cast %41 : vector<1x8x8x32xf32> to vector<8x8x32xf32>
    %43 = arith.maximumf %40, %42 : vector<8x8x32xf32>
    %c0_55 = arith.constant 0 : index
    %c1_56 = arith.constant 1 : index
    %c2_57 = arith.constant 2 : index
    %c0_58 = arith.constant 0 : index
    %44 = vector.load %arg1[%c0_55, %c1_56, %c2_57, %c0_58] : memref<1x10x10x40xf32, #tpu.memory_space<vmem>>, vector<1x8x8x32xf32>
    %45 = vector.shape_cast %44 : vector<1x8x8x32xf32> to vector<8x8x32xf32>
    %46 = arith.maximumf %43, %45 : vector<8x8x32xf32>
    %c0_59 = arith.constant 0 : index
    %c1_60 = arith.constant 1 : index
    %c2_61 = arith.constant 2 : index
    %c4_62 = arith.constant 4 : index
    %47 = vector.load %arg1[%c0_59, %c1_60, %c2_61, %c4_62] : memref<1x10x10x40xf32, #tpu.memory_space<vmem>>, vector<1x8x8x32xf32>
    %48 = vector.shape_cast %47 : vector<1x8x8x32xf32> to vector<8x8x32xf32>
    %49 = arith.maximumf %46, %48 : vector<8x8x32xf32>
    %c0_63 = arith.constant 0 : index
    %c1_64 = arith.constant 1 : index
    %c2_65 = arith.constant 2 : index
    %c8_66 = arith.constant 8 : index
    %50 = vector.load %arg1[%c0_63, %c1_64, %c2_65, %c8_66] : memref<1x10x10x40xf32, #tpu.memory_space<vmem>>, vector<1x8x8x32xf32>
    %51 = vector.shape_cast %50 : vector<1x8x8x32xf32> to vector<8x8x32xf32>
    %52 = arith.maximumf %49, %51 : vector<8x8x32xf32>
    %c0_67 = arith.constant 0 : index
    %c2_68 = arith.constant 2 : index
    %c0_69 = arith.constant 0 : index
    %c0_70 = arith.constant 0 : index
    %53 = vector.load %arg1[%c0_67, %c2_68, %c0_69, %c0_70] : memref<1x10x10x40xf32, #tpu.memory_space<vmem>>, vector<1x8x8x32xf32>
    %54 = vector.shape_cast %53 : vector<1x8x8x32xf32> to vector<8x8x32xf32>
    %55 = arith.maximumf %52, %54 : vector<8x8x32xf32>
    %c0_71 = arith.constant 0 : index
    %c2_72 = arith.constant 2 : index
    %c0_73 = arith.constant 0 : index
    %c4_74 = arith.constant 4 : index
    %56 = vector.load %arg1[%c0_71, %c2_72, %c0_73, %c4_74] : memref<1x10x10x40xf32, #tpu.memory_space<vmem>>, vector<1x8x8x32xf32>
    %57 = vector.shape_cast %56 : vector<1x8x8x32xf32> to vector<8x8x32xf32>
    %58 = arith.maximumf %55, %57 : vector<8x8x32xf32>
    %c0_75 = arith.constant 0 : index
    %c2_76 = arith.constant 2 : index
    %c0_77 = arith.constant 0 : index
    %c8_78 = arith.constant 8 : index
    %59 = vector.load %arg1[%c0_75, %c2_76, %c0_77, %c8_78] : memref<1x10x10x40xf32, #tpu.memory_space<vmem>>, vector<1x8x8x32xf32>
    %60 = vector.shape_cast %59 : vector<1x8x8x32xf32> to vector<8x8x32xf32>
    %61 = arith.maximumf %58, %60 : vector<8x8x32xf32>
    %c0_79 = arith.constant 0 : index
    %c2_80 = arith.constant 2 : index
    %c1_81 = arith.constant 1 : index
    %c0_82 = arith.constant 0 : index
    %62 = vector.load %arg1[%c0_79, %c2_80, %c1_81, %c0_82] : memref<1x10x10x40xf32, #tpu.memory_space<vmem>>, vector<1x8x8x32xf32>
    %63 = vector.shape_cast %62 : vector<1x8x8x32xf32> to vector<8x8x32xf32>
    %64 = arith.maximumf %61, %63 : vector<8x8x32xf32>
    %c0_83 = arith.constant 0 : index
    %c2_84 = arith.constant 2 : index
    %c1_85 = arith.constant 1 : index
    %c4_86 = arith.constant 4 : index
    %65 = vector.load %arg1[%c0_83, %c2_84, %c1_85, %c4_86] : memref<1x10x10x40xf32, #tpu.memory_space<vmem>>, vector<1x8x8x32xf32>
    %66 = vector.shape_cast %65 : vector<1x8x8x32xf32> to vector<8x8x32xf32>
    %67 = arith.maximumf %64, %66 : vector<8x8x32xf32>
    %c0_87 = arith.constant 0 : index
    %c2_88 = arith.constant 2 : index
    %c1_89 = arith.constant 1 : index
    %c8_90 = arith.constant 8 : index
    %68 = vector.load %arg1[%c0_87, %c2_88, %c1_89, %c8_90] : memref<1x10x10x40xf32, #tpu.memory_space<vmem>>, vector<1x8x8x32xf32>
    %69 = vector.shape_cast %68 : vector<1x8x8x32xf32> to vector<8x8x32xf32>
    %70 = arith.maximumf %67, %69 : vector<8x8x32xf32>
    %c0_91 = arith.constant 0 : index
    %c2_92 = arith.constant 2 : index
    %c2_93 = arith.constant 2 : index
    %c0_94 = arith.constant 0 : index
    %71 = vector.load %arg1[%c0_91, %c2_92, %c2_93, %c0_94] : memref<1x10x10x40xf32, #tpu.memory_space<vmem>>, vector<1x8x8x32xf32>
    %72 = vector.shape_cast %71 : vector<1x8x8x32xf32> to vector<8x8x32xf32>
    %73 = arith.maximumf %70, %72 : vector<8x8x32xf32>
    %c0_95 = arith.constant 0 : index
    %c2_96 = arith.constant 2 : index
    %c2_97 = arith.constant 2 : index
    %c4_98 = arith.constant 4 : index
    %74 = vector.load %arg1[%c0_95, %c2_96, %c2_97, %c4_98] : memref<1x10x10x40xf32, #tpu.memory_space<vmem>>, vector<1x8x8x32xf32>
    %75 = vector.shape_cast %74 : vector<1x8x8x32xf32> to vector<8x8x32xf32>
    %76 = arith.maximumf %73, %75 : vector<8x8x32xf32>
    %c0_99 = arith.constant 0 : index
    %c2_100 = arith.constant 2 : index
    %c2_101 = arith.constant 2 : index
    %c8_102 = arith.constant 8 : index
    %77 = vector.load %arg1[%c0_99, %c2_100, %c2_101, %c8_102] : memref<1x10x10x40xf32, #tpu.memory_space<vmem>>, vector<1x8x8x32xf32>
    %78 = vector.shape_cast %77 : vector<1x8x8x32xf32> to vector<8x8x32xf32>
    %79 = arith.maximumf %76, %78 : vector<8x8x32xf32>
    %c0_103 = arith.constant 0 : index
    %c0_104 = arith.constant 0 : index
    %c0_105 = arith.constant 0 : index
    %c0_106 = arith.constant 0 : index
    %80 = vector.load %arg2[%c0_103, %c0_104, %c0_105, %c0_106] : memref<1x8x8x32xf32, #tpu.memory_space<vmem>>, vector<1x8x8x32xf32>
    %81 = vector.shape_cast %80 : vector<1x8x8x32xf32> to vector<8x8x32xf32>
    %82 = vector.shape_cast %79 : vector<8x8x32xf32> to vector<1x8x8x32xf32>
    tpu.vector_store %arg2[%c0_103, %c0_104, %c0_105, %c0_106], %82 {strides = array<i32>} : memref<1x8x8x32xf32, #tpu.memory_space<vmem>>, vector<1x8x8x32xf32>,
    return
  }
  func.func @transform_0(%arg0: i32) -> (i32, i32, i32, i32) {
    %c0_i32 = arith.constant 0 : i32
    %c0_i32_0 = arith.constant 0 : i32
    %c0_i32_1 = arith.constant 0 : i32
    %c0_i32_2 = arith.constant 0 : i32
    return %arg0, %c0_i32, %c0_i32_0, %c0_i32_1 : i32, i32, i32, i32
  }
  func.func @transform_1(%arg0: i32) -> (i32, i32, i32, i32) {
    %c0_i32 = arith.constant 0 : i32
    %c0_i32_0 = arith.constant 0 : i32
    %c0_i32_1 = arith.constant 0 : i32
    %c0_i32_2 = arith.constant 0 : i32
    return %arg0, %c0_i32, %c0_i32_0, %c0_i32_1 : i32, i32, i32, i32
  }
}

module attributes {stable_mosaic.version = 11 : i64} {
  func.func @_conv_bn_kernel(%arg0: i32, %arg1: memref<1x8x256xbf16, #tpu.memory_space<vmem>>, %arg2: memref<1x256x256xbf16, #tpu.memory_space<vmem>>, %arg3: memref<1x8x256xbf16, #tpu.memory_space<vmem>>, %arg4: memref<1x2x256xf32, #tpu.memory_space<vmem>>) attributes {dimension_semantics = [#tpu.dimension_semantics<parallel>], iteration_bounds = array<i64: 2>, scalar_prefetch = 0 : i64, scratch_operands = 0 : i64, tpu.core_type = #tpu.core_type<tc>, window_params = [{transform_indices = @transform_0, window_bounds = array<i64: 1, 8, 256>}, {pipeline_mode = #tpu.pipeline_mode<synchronous>, transform_indices = @transform_1, window_bounds = array<i64: 1, 256, 256>}, {transform_indices = @transform_2, window_bounds = array<i64: 1, 8, 256>}, {transform_indices = @transform_3, window_bounds = array<i64: 1, 2, 256>}]} {
    %c0 = arith.constant 0 : index
    %c0_0 = arith.constant 0 : index
    %c0_1 = arith.constant 0 : index
    %0 = vector.load %arg1[%c0, %c0_0, %c0_1] : memref<1x8x256xbf16, #tpu.memory_space<vmem>>, vector<1x8x256xbf16>
    %1 = vector.shape_cast %0 : vector<1x8x256xbf16> to vector<8x256xbf16>
    %2 = arith.extf %1 : vector<8x256xbf16> to vector<8x256xf32>
    %3 = arith.truncf %2 : vector<8x256xf32> to vector<8x256xbf16>
    %c0_2 = arith.constant 0 : index
    %c0_3 = arith.constant 0 : index
    %c0_4 = arith.constant 0 : index
    %4 = vector.load %arg2[%c0_2, %c0_3, %c0_4] : memref<1x256x256xbf16, #tpu.memory_space<vmem>>, vector<1x256x256xbf16>
    %5 = vector.shape_cast %4 : vector<1x256x256xbf16> to vector<256x256xbf16>
    %cst = arith.constant dense<0.000000e+00> : vector<8x256xf32>
    %6 = tpu.matmul %3, %5, %cst {dimension_numbers = #tpu.dot_dimension_numbers<[1], [0], [0], [1], [0, 0, 1, 1], [], []>} : vector<8x256xbf16>, vector<256x256xbf16>, vector<8x256xf32> -> vector<8x256xf32>
    %7 = arith.truncf %6 : vector<8x256xf32> to vector<8x256xbf16>
    %c0_5 = arith.constant 0 : index
    %c0_6 = arith.constant 0 : index
    %c0_7 = arith.constant 0 : index
    %8 = vector.load %arg3[%c0_5, %c0_6, %c0_7] : memref<1x8x256xbf16, #tpu.memory_space<vmem>>, vector<1x8x256xbf16>
    %9 = vector.shape_cast %8 : vector<1x8x256xbf16> to vector<8x256xbf16>
    %10 = vector.shape_cast %7 : vector<8x256xbf16> to vector<1x8x256xbf16>
    tpu.vector_store %arg3[%c0_5, %c0_6, %c0_7], %10 {strides = array<i32>} : memref<1x8x256xbf16, #tpu.memory_space<vmem>>, vector<1x8x256xbf16>,
    %cst_8 = arith.constant dense<0.000000e+00> : vector<256xf32>
    %11 = vector.multi_reduction <add>, %6, %cst_8 [0] : vector<8x256xf32> to vector<256xf32>
    %12 = vector.shape_cast %11 : vector<256xf32> to vector<1x256xf32>
    %c0_9 = arith.constant 0 : index
    %c0_10 = arith.constant 0 : index
    %c0_11 = arith.constant 0 : index
    %13 = vector.load %arg4[%c0_9, %c0_10, %c0_11] : memref<1x2x256xf32, #tpu.memory_space<vmem>>, vector<1x1x256xf32>
    %14 = vector.shape_cast %13 : vector<1x1x256xf32> to vector<1x256xf32>
    %15 = vector.shape_cast %12 : vector<1x256xf32> to vector<1x1x256xf32>
    tpu.vector_store %arg4[%c0_9, %c0_10, %c0_11], %15 {strides = array<i32>} : memref<1x2x256xf32, #tpu.memory_space<vmem>>, vector<1x1x256xf32>,
    %16 = arith.mulf %6, %6 : vector<8x256xf32>
    %cst_12 = arith.constant dense<0.000000e+00> : vector<256xf32>
    %17 = vector.multi_reduction <add>, %16, %cst_12 [0] : vector<8x256xf32> to vector<256xf32>
    %18 = vector.shape_cast %17 : vector<256xf32> to vector<1x256xf32>
    %c0_13 = arith.constant 0 : index
    %c1 = arith.constant 1 : index
    %c0_14 = arith.constant 0 : index
    %19 = vector.load %arg4[%c0_13, %c1, %c0_14] : memref<1x2x256xf32, #tpu.memory_space<vmem>>, vector<1x1x256xf32>
    %20 = vector.shape_cast %19 : vector<1x1x256xf32> to vector<1x256xf32>
    %21 = vector.shape_cast %18 : vector<1x256xf32> to vector<1x1x256xf32>
    tpu.vector_store %arg4[%c0_13, %c1, %c0_14], %21 {strides = array<i32>} : memref<1x2x256xf32, #tpu.memory_space<vmem>>, vector<1x1x256xf32>,
    return
  }
  func.func @transform_0(%arg0: i32) -> (i32, i32, i32) {
    %c0_i32 = arith.constant 0 : i32
    %c0_i32_0 = arith.constant 0 : i32
    %c0_i32_1 = arith.constant 0 : i32
    return %arg0, %c0_i32, %c0_i32_0 : i32, i32, i32
  }
  func.func @transform_1(%arg0: i32) -> (i32, i32, i32) {
    %c0_i32 = arith.constant 0 : i32
    %c0_i32_0 = arith.constant 0 : i32
    %c0_i32_1 = arith.constant 0 : i32
    %c0_i32_2 = arith.constant 0 : i32
    return %c0_i32, %c0_i32_0, %c0_i32_1 : i32, i32, i32
  }
  func.func @transform_2(%arg0: i32) -> (i32, i32, i32) {
    %c0_i32 = arith.constant 0 : i32
    %c0_i32_0 = arith.constant 0 : i32
    %c0_i32_1 = arith.constant 0 : i32
    return %arg0, %c0_i32, %c0_i32_0 : i32, i32, i32
  }
  func.func @transform_3(%arg0: i32) -> (i32, i32, i32) {
    %c0_i32 = arith.constant 0 : i32
    %c0_i32_0 = arith.constant 0 : i32
    %c0_i32_1 = arith.constant 0 : i32
    return %arg0, %c0_i32, %c0_i32_0 : i32, i32, i32
  }
}

module attributes {stable_mosaic.version = 11 : i64} {
  func.func @_conv_bn_kernel(%arg0: i32, %arg1: memref<1x8x256xbf16, #tpu.memory_space<vmem>>, %arg2: memref<1x256xf32, #tpu.memory_space<vmem>>, %arg3: memref<1x256xf32, #tpu.memory_space<vmem>>, %arg4: memref<1x256x256xbf16, #tpu.memory_space<vmem>>, %arg5: memref<1x8x256xbf16, #tpu.memory_space<vmem>>, %arg6: memref<1x2x256xf32, #tpu.memory_space<vmem>>) attributes {dimension_semantics = [#tpu.dimension_semantics<parallel>], iteration_bounds = array<i64: 2>, scalar_prefetch = 0 : i64, scratch_operands = 0 : i64, tpu.core_type = #tpu.core_type<tc>, window_params = [{transform_indices = @transform_0, window_bounds = array<i64: 1, 8, 256>}, {pipeline_mode = #tpu.pipeline_mode<synchronous>, transform_indices = @transform_1, window_bounds = array<i64: 1, 256>}, {pipeline_mode = #tpu.pipeline_mode<synchronous>, transform_indices = @transform_2, window_bounds = array<i64: 1, 256>}, {pipeline_mode = #tpu.pipeline_mode<synchronous>, transform_indices = @transform_3, window_bounds = array<i64: 1, 256, 256>}, {transform_indices = @transform_4, window_bounds = array<i64: 1, 8, 256>}, {transform_indices = @transform_5, window_bounds = array<i64: 1, 2, 256>}]} {
    %c0 = arith.constant 0 : index
    %c0_0 = arith.constant 0 : index
    %c0_1 = arith.constant 0 : index
    %0 = vector.load %arg1[%c0, %c0_0, %c0_1] : memref<1x8x256xbf16, #tpu.memory_space<vmem>>, vector<1x8x256xbf16>
    %1 = vector.shape_cast %0 : vector<1x8x256xbf16> to vector<8x256xbf16>
    %2 = arith.extf %1 : vector<8x256xbf16> to vector<8x256xf32>
    %c0_2 = arith.constant 0 : index
    %c0_3 = arith.constant 0 : index
    %3 = vector.load %arg2[%c0_2, %c0_3] : memref<1x256xf32, #tpu.memory_space<vmem>>, vector<1x256xf32>
    %4 = vector.broadcast %3 : vector<1x256xf32> to vector<8x256xf32>
    %5 = arith.mulf %2, %4 : vector<8x256xf32>
    %c0_4 = arith.constant 0 : index
    %c0_5 = arith.constant 0 : index
    %6 = vector.load %arg3[%c0_4, %c0_5] : memref<1x256xf32, #tpu.memory_space<vmem>>, vector<1x256xf32>
    %7 = vector.broadcast %6 : vector<1x256xf32> to vector<8x256xf32>
    %8 = arith.addf %5, %7 : vector<8x256xf32>
    %cst = arith.constant 0.000000e+00 : f32
    %9 = vector.broadcast %cst : f32 to vector<8x256xf32>
    %10 = arith.cmpf oge, %8, %9 : vector<8x256xf32>
    %cst_6 = arith.constant 0.00999999977 : f32
    %11 = vector.broadcast %cst_6 : f32 to vector<8x256xf32>
    %12 = arith.mulf %11, %8 : vector<8x256xf32>
    %13 = arith.select %10, %8, %12 : vector<8x256xi1>, vector<8x256xf32>
    %14 = arith.truncf %13 : vector<8x256xf32> to vector<8x256xbf16>
    %c0_7 = arith.constant 0 : index
    %c0_8 = arith.constant 0 : index
    %c0_9 = arith.constant 0 : index
    %15 = vector.load %arg4[%c0_7, %c0_8, %c0_9] : memref<1x256x256xbf16, #tpu.memory_space<vmem>>, vector<1x256x256xbf16>
    %16 = vector.shape_cast %15 : vector<1x256x256xbf16> to vector<256x256xbf16>
    %cst_10 = arith.constant dense<0.000000e+00> : vector<8x256xf32>
    %17 = tpu.matmul %14, %16, %cst_10 {dimension_numbers = #tpu.dot_dimension_numbers<[1], [0], [0], [1], [0, 0, 1, 1], [], []>} : vector<8x256xbf16>, vector<256x256xbf16>, vector<8x256xf32> -> vector<8x256xf32>
    %18 = arith.truncf %17 : vector<8x256xf32> to vector<8x256xbf16>
    %c0_11 = arith.constant 0 : index
    %c0_12 = arith.constant 0 : index
    %c0_13 = arith.constant 0 : index
    %19 = vector.load %arg5[%c0_11, %c0_12, %c0_13] : memref<1x8x256xbf16, #tpu.memory_space<vmem>>, vector<1x8x256xbf16>
    %20 = vector.shape_cast %19 : vector<1x8x256xbf16> to vector<8x256xbf16>
    %21 = vector.shape_cast %18 : vector<8x256xbf16> to vector<1x8x256xbf16>
    tpu.vector_store %arg5[%c0_11, %c0_12, %c0_13], %21 {strides = array<i32>} : memref<1x8x256xbf16, #tpu.memory_space<vmem>>, vector<1x8x256xbf16>,
    %cst_14 = arith.constant dense<0.000000e+00> : vector<256xf32>
    %22 = vector.multi_reduction <add>, %17, %cst_14 [0] : vector<8x256xf32> to vector<256xf32>
    %23 = vector.shape_cast %22 : vector<256xf32> to vector<1x256xf32>
    %c0_15 = arith.constant 0 : index
    %c0_16 = arith.constant 0 : index
    %c0_17 = arith.constant 0 : index
    %24 = vector.load %arg6[%c0_15, %c0_16, %c0_17] : memref<1x2x256xf32, #tpu.memory_space<vmem>>, vector<1x1x256xf32>
    %25 = vector.shape_cast %24 : vector<1x1x256xf32> to vector<1x256xf32>
    %26 = vector.shape_cast %23 : vector<1x256xf32> to vector<1x1x256xf32>
    tpu.vector_store %arg6[%c0_15, %c0_16, %c0_17], %26 {strides = array<i32>} : memref<1x2x256xf32, #tpu.memory_space<vmem>>, vector<1x1x256xf32>,
    %27 = arith.mulf %17, %17 : vector<8x256xf32>
    %cst_18 = arith.constant dense<0.000000e+00> : vector<256xf32>
    %28 = vector.multi_reduction <add>, %27, %cst_18 [0] : vector<8x256xf32> to vector<256xf32>
    %29 = vector.shape_cast %28 : vector<256xf32> to vector<1x256xf32>
    %c0_19 = arith.constant 0 : index
    %c1 = arith.constant 1 : index
    %c0_20 = arith.constant 0 : index
    %30 = vector.load %arg6[%c0_19, %c1, %c0_20] : memref<1x2x256xf32, #tpu.memory_space<vmem>>, vector<1x1x256xf32>
    %31 = vector.shape_cast %30 : vector<1x1x256xf32> to vector<1x256xf32>
    %32 = vector.shape_cast %29 : vector<1x256xf32> to vector<1x1x256xf32>
    tpu.vector_store %arg6[%c0_19, %c1, %c0_20], %32 {strides = array<i32>} : memref<1x2x256xf32, #tpu.memory_space<vmem>>, vector<1x1x256xf32>,
    return
  }
  func.func @transform_0(%arg0: i32) -> (i32, i32, i32) {
    %c0_i32 = arith.constant 0 : i32
    %c0_i32_0 = arith.constant 0 : i32
    %c0_i32_1 = arith.constant 0 : i32
    return %arg0, %c0_i32, %c0_i32_0 : i32, i32, i32
  }
  func.func @transform_1(%arg0: i32) -> (i32, i32) {
    %c0_i32 = arith.constant 0 : i32
    %c0_i32_0 = arith.constant 0 : i32
    %c0_i32_1 = arith.constant 0 : i32
    return %c0_i32, %c0_i32_0 : i32, i32
  }
  func.func @transform_2(%arg0: i32) -> (i32, i32) {
    %c0_i32 = arith.constant 0 : i32
    %c0_i32_0 = arith.constant 0 : i32
    %c0_i32_1 = arith.constant 0 : i32
    return %c0_i32, %c0_i32_0 : i32, i32
  }
  func.func @transform_3(%arg0: i32) -> (i32, i32, i32) {
    %c0_i32 = arith.constant 0 : i32
    %c0_i32_0 = arith.constant 0 : i32
    %c0_i32_1 = arith.constant 0 : i32
    %c0_i32_2 = arith.constant 0 : i32
    return %c0_i32, %c0_i32_0, %c0_i32_1 : i32, i32, i32
  }
  func.func @transform_4(%arg0: i32) -> (i32, i32, i32) {
    %c0_i32 = arith.constant 0 : i32
    %c0_i32_0 = arith.constant 0 : i32
    %c0_i32_1 = arith.constant 0 : i32
    return %arg0, %c0_i32, %c0_i32_0 : i32, i32, i32
  }
  func.func @transform_5(%arg0: i32) -> (i32, i32, i32) {
    %c0_i32 = arith.constant 0 : i32
    %c0_i32_0 = arith.constant 0 : i32
    %c0_i32_1 = arith.constant 0 : i32
    return %arg0, %c0_i32, %c0_i32_0 : i32, i32, i32
  }
}

module attributes {stable_mosaic.version = 11 : i64} {
  func.func @_conv_bn_kernel(%arg0: i32, %arg1: memref<1x8x256xbf16, #tpu.memory_space<vmem>>, %arg2: memref<1x256xf32, #tpu.memory_space<vmem>>, %arg3: memref<1x256xf32, #tpu.memory_space<vmem>>, %arg4: memref<3x256x512xbf16, #tpu.memory_space<vmem>>, %arg5: memref<1x8x512xbf16, #tpu.memory_space<vmem>>, %arg6: memref<1x2x512xf32, #tpu.memory_space<vmem>>, %arg7: memref<10x256xf32, #tpu.memory_space<vmem>>) attributes {dimension_semantics = [#tpu.dimension_semantics<parallel>], iteration_bounds = array<i64: 2>, scalar_prefetch = 0 : i64, scratch_operands = 1 : i64, tpu.core_type = #tpu.core_type<tc>, window_params = [{transform_indices = @transform_0, window_bounds = array<i64: 1, 8, 256>}, {pipeline_mode = #tpu.pipeline_mode<synchronous>, transform_indices = @transform_1, window_bounds = array<i64: 1, 256>}, {pipeline_mode = #tpu.pipeline_mode<synchronous>, transform_indices = @transform_2, window_bounds = array<i64: 1, 256>}, {pipeline_mode = #tpu.pipeline_mode<synchronous>, transform_indices = @transform_3, window_bounds = array<i64: 3, 256, 512>}, {transform_indices = @transform_4, window_bounds = array<i64: 1, 8, 512>}, {transform_indices = @transform_5, window_bounds = array<i64: 1, 2, 512>}]} {
    %c0 = arith.constant 0 : index
    %c0_0 = arith.constant 0 : index
    %c0_1 = arith.constant 0 : index
    %0 = vector.load %arg1[%c0, %c0_0, %c0_1] : memref<1x8x256xbf16, #tpu.memory_space<vmem>>, vector<1x8x256xbf16>
    %1 = vector.shape_cast %0 : vector<1x8x256xbf16> to vector<8x256xbf16>
    %2 = arith.extf %1 : vector<8x256xbf16> to vector<8x256xf32>
    %c0_2 = arith.constant 0 : index
    %c0_3 = arith.constant 0 : index
    %3 = vector.load %arg2[%c0_2, %c0_3] : memref<1x256xf32, #tpu.memory_space<vmem>>, vector<1x256xf32>
    %4 = vector.broadcast %3 : vector<1x256xf32> to vector<8x256xf32>
    %5 = arith.mulf %2, %4 : vector<8x256xf32>
    %c0_4 = arith.constant 0 : index
    %c0_5 = arith.constant 0 : index
    %6 = vector.load %arg3[%c0_4, %c0_5] : memref<1x256xf32, #tpu.memory_space<vmem>>, vector<1x256xf32>
    %7 = vector.broadcast %6 : vector<1x256xf32> to vector<8x256xf32>
    %8 = arith.addf %5, %7 : vector<8x256xf32>
    %cst = arith.constant 0.000000e+00 : f32
    %9 = vector.broadcast %cst : f32 to vector<8x256xf32>
    %10 = arith.cmpf oge, %8, %9 : vector<8x256xf32>
    %cst_6 = arith.constant 0.00999999977 : f32
    %11 = vector.broadcast %cst_6 : f32 to vector<8x256xf32>
    %12 = arith.mulf %11, %8 : vector<8x256xf32>
    %13 = arith.select %10, %8, %12 : vector<8x256xi1>, vector<8x256xf32>
    %cst_7 = arith.constant 0.000000e+00 : f32
    %14 = vector.broadcast %cst_7 : f32 to vector<10x256xf32>
    %c0_8 = arith.constant 0 : index
    %c0_9 = arith.constant 0 : index
    %15 = vector.load %arg7[%c0_8, %c0_9] : memref<10x256xf32, #tpu.memory_space<vmem>>, vector<10x256xf32>
    tpu.vector_store %arg7[%c0_8, %c0_9], %14 {strides = array<i32>} : memref<10x256xf32, #tpu.memory_space<vmem>>, vector<10x256xf32>,
    %c1 = arith.constant 1 : index
    %c0_10 = arith.constant 0 : index
    %16 = vector.load %arg7[%c1, %c0_10] : memref<10x256xf32, #tpu.memory_space<vmem>>, vector<8x256xf32>
    tpu.vector_store %arg7[%c1, %c0_10], %13 {strides = array<i32>} : memref<10x256xf32, #tpu.memory_space<vmem>>, vector<8x256xf32>,
    %c0_11 = arith.constant 0 : index
    %c0_12 = arith.constant 0 : index
    %17 = vector.load %arg7[%c0_11, %c0_12] : memref<10x256xf32, #tpu.memory_space<vmem>>, vector<8x256xf32>
    %18 = arith.truncf %17 : vector<8x256xf32> to vector<8x256xbf16>
    %c1_13 = arith.constant 1 : index
    %c0_14 = arith.constant 0 : index
    %19 = vector.load %arg7[%c1_13, %c0_14] : memref<10x256xf32, #tpu.memory_space<vmem>>, vector<8x256xf32>
    %20 = arith.truncf %19 : vector<8x256xf32> to vector<8x256xbf16>
    %c2 = arith.constant 2 : index
    %c0_15 = arith.constant 0 : index
    %21 = vector.load %arg7[%c2, %c0_15] : memref<10x256xf32, #tpu.memory_space<vmem>>, vector<8x256xf32>
    %22 = arith.truncf %21 : vector<8x256xf32> to vector<8x256xbf16>
    %c0_16 = arith.constant 0 : index
    %c0_17 = arith.constant 0 : index
    %c0_18 = arith.constant 0 : index
    %23 = vector.load %arg4[%c0_16, %c0_17, %c0_18] : memref<3x256x512xbf16, #tpu.memory_space<vmem>>, vector<1x256x512xbf16>
    %24 = vector.shape_cast %23 : vector<1x256x512xbf16> to vector<256x512xbf16>
    %cst_19 = arith.constant dense<0.000000e+00> : vector<8x512xf32>
    %25 = tpu.matmul %18, %24, %cst_19 {dimension_numbers = #tpu.dot_dimension_numbers<[1], [0], [0], [1], [0, 0, 1, 1], [], []>} : vector<8x256xbf16>, vector<256x512xbf16>, vector<8x512xf32> -> vector<8x512xf32>
    %c1_20 = arith.constant 1 : index
    %c0_21 = arith.constant 0 : index
    %c0_22 = arith.constant 0 : index
    %26 = vector.load %arg4[%c1_20, %c0_21, %c0_22] : memref<3x256x512xbf16, #tpu.memory_space<vmem>>, vector<1x256x512xbf16>
    %27 = vector.shape_cast %26 : vector<1x256x512xbf16> to vector<256x512xbf16>
    %cst_23 = arith.constant dense<0.000000e+00> : vector<8x512xf32>
    %28 = tpu.matmul %20, %27, %cst_23 {dimension_numbers = #tpu.dot_dimension_numbers<[1], [0], [0], [1], [0, 0, 1, 1], [], []>} : vector<8x256xbf16>, vector<256x512xbf16>, vector<8x512xf32> -> vector<8x512xf32>
    %29 = arith.addf %25, %28 : vector<8x512xf32>
    %c2_24 = arith.constant 2 : index
    %c0_25 = arith.constant 0 : index
    %c0_26 = arith.constant 0 : index
    %30 = vector.load %arg4[%c2_24, %c0_25, %c0_26] : memref<3x256x512xbf16, #tpu.memory_space<vmem>>, vector<1x256x512xbf16>
    %31 = vector.shape_cast %30 : vector<1x256x512xbf16> to vector<256x512xbf16>
    %cst_27 = arith.constant dense<0.000000e+00> : vector<8x512xf32>
    %32 = tpu.matmul %22, %31, %cst_27 {dimension_numbers = #tpu.dot_dimension_numbers<[1], [0], [0], [1], [0, 0, 1, 1], [], []>} : vector<8x256xbf16>, vector<256x512xbf16>, vector<8x512xf32> -> vector<8x512xf32>
    %33 = arith.addf %29, %32 : vector<8x512xf32>
    %34 = arith.truncf %33 : vector<8x512xf32> to vector<8x512xbf16>
    %c0_28 = arith.constant 0 : index
    %c0_29 = arith.constant 0 : index
    %c0_30 = arith.constant 0 : index
    %35 = vector.load %arg5[%c0_28, %c0_29, %c0_30] : memref<1x8x512xbf16, #tpu.memory_space<vmem>>, vector<1x8x512xbf16>
    %36 = vector.shape_cast %35 : vector<1x8x512xbf16> to vector<8x512xbf16>
    %37 = vector.shape_cast %34 : vector<8x512xbf16> to vector<1x8x512xbf16>
    tpu.vector_store %arg5[%c0_28, %c0_29, %c0_30], %37 {strides = array<i32>} : memref<1x8x512xbf16, #tpu.memory_space<vmem>>, vector<1x8x512xbf16>,
    %cst_31 = arith.constant dense<0.000000e+00> : vector<512xf32>
    %38 = vector.multi_reduction <add>, %33, %cst_31 [0] : vector<8x512xf32> to vector<512xf32>
    %39 = vector.shape_cast %38 : vector<512xf32> to vector<1x512xf32>
    %c0_32 = arith.constant 0 : index
    %c0_33 = arith.constant 0 : index
    %c0_34 = arith.constant 0 : index
    %40 = vector.load %arg6[%c0_32, %c0_33, %c0_34] : memref<1x2x512xf32, #tpu.memory_space<vmem>>, vector<1x1x512xf32>
    %41 = vector.shape_cast %40 : vector<1x1x512xf32> to vector<1x512xf32>
    %42 = vector.shape_cast %39 : vector<1x512xf32> to vector<1x1x512xf32>
    tpu.vector_store %arg6[%c0_32, %c0_33, %c0_34], %42 {strides = array<i32>} : memref<1x2x512xf32, #tpu.memory_space<vmem>>, vector<1x1x512xf32>,
    %43 = arith.mulf %33, %33 : vector<8x512xf32>
    %cst_35 = arith.constant dense<0.000000e+00> : vector<512xf32>
    %44 = vector.multi_reduction <add>, %43, %cst_35 [0] : vector<8x512xf32> to vector<512xf32>
    %45 = vector.shape_cast %44 : vector<512xf32> to vector<1x512xf32>
    %c0_36 = arith.constant 0 : index
    %c1_37 = arith.constant 1 : index
    %c0_38 = arith.constant 0 : index
    %46 = vector.load %arg6[%c0_36, %c1_37, %c0_38] : memref<1x2x512xf32, #tpu.memory_space<vmem>>, vector<1x1x512xf32>
    %47 = vector.shape_cast %46 : vector<1x1x512xf32> to vector<1x512xf32>
    %48 = vector.shape_cast %45 : vector<1x512xf32> to vector<1x1x512xf32>
    tpu.vector_store %arg6[%c0_36, %c1_37, %c0_38], %48 {strides = array<i32>} : memref<1x2x512xf32, #tpu.memory_space<vmem>>, vector<1x1x512xf32>,
    return
  }
  func.func @transform_0(%arg0: i32) -> (i32, i32, i32) {
    %c0_i32 = arith.constant 0 : i32
    %c0_i32_0 = arith.constant 0 : i32
    %c0_i32_1 = arith.constant 0 : i32
    return %arg0, %c0_i32, %c0_i32_0 : i32, i32, i32
  }
  func.func @transform_1(%arg0: i32) -> (i32, i32) {
    %c0_i32 = arith.constant 0 : i32
    %c0_i32_0 = arith.constant 0 : i32
    %c0_i32_1 = arith.constant 0 : i32
    return %c0_i32, %c0_i32_0 : i32, i32
  }
  func.func @transform_2(%arg0: i32) -> (i32, i32) {
    %c0_i32 = arith.constant 0 : i32
    %c0_i32_0 = arith.constant 0 : i32
    %c0_i32_1 = arith.constant 0 : i32
    return %c0_i32, %c0_i32_0 : i32, i32
  }
  func.func @transform_3(%arg0: i32) -> (i32, i32, i32) {
    %c0_i32 = arith.constant 0 : i32
    %c0_i32_0 = arith.constant 0 : i32
    %c0_i32_1 = arith.constant 0 : i32
    %c0_i32_2 = arith.constant 0 : i32
    return %c0_i32, %c0_i32_0, %c0_i32_1 : i32, i32, i32
  }
  func.func @transform_4(%arg0: i32) -> (i32, i32, i32) {
    %c0_i32 = arith.constant 0 : i32
    %c0_i32_0 = arith.constant 0 : i32
    %c0_i32_1 = arith.constant 0 : i32
    return %arg0, %c0_i32, %c0_i32_0 : i32, i32, i32
  }
  func.func @transform_5(%arg0: i32) -> (i32, i32, i32) {
    %c0_i32 = arith.constant 0 : i32
    %c0_i32_0 = arith.constant 0 : i32
    %c0_i32_1 = arith.constant 0 : i32
    return %arg0, %c0_i32, %c0_i32_0 : i32, i32, i32
  }
}

module attributes {stable_mosaic.version = 11 : i64} {
  func.func @_bn_lrelu_kernel(%arg0: i32, %arg1: memref<1x8x512xbf16, #tpu.memory_space<vmem>>, %arg2: memref<1x512xf32, #tpu.memory_space<vmem>>, %arg3: memref<1x512xf32, #tpu.memory_space<vmem>>, %arg4: memref<1x8x512xf32, #tpu.memory_space<vmem>>) attributes {dimension_semantics = [#tpu.dimension_semantics<parallel>], iteration_bounds = array<i64: 2>, scalar_prefetch = 0 : i64, scratch_operands = 0 : i64, tpu.core_type = #tpu.core_type<tc>, window_params = [{transform_indices = @transform_0, window_bounds = array<i64: 1, 8, 512>}, {pipeline_mode = #tpu.pipeline_mode<synchronous>, transform_indices = @transform_1, window_bounds = array<i64: 1, 512>}, {pipeline_mode = #tpu.pipeline_mode<synchronous>, transform_indices = @transform_2, window_bounds = array<i64: 1, 512>}, {transform_indices = @transform_3, window_bounds = array<i64: 1, 8, 512>}]} {
    %c0 = arith.constant 0 : index
    %c0_0 = arith.constant 0 : index
    %c0_1 = arith.constant 0 : index
    %0 = vector.load %arg1[%c0, %c0_0, %c0_1] : memref<1x8x512xbf16, #tpu.memory_space<vmem>>, vector<1x8x512xbf16>
    %1 = vector.shape_cast %0 : vector<1x8x512xbf16> to vector<8x512xbf16>
    %2 = arith.extf %1 : vector<8x512xbf16> to vector<8x512xf32>
    %c0_2 = arith.constant 0 : index
    %c0_3 = arith.constant 0 : index
    %3 = vector.load %arg2[%c0_2, %c0_3] : memref<1x512xf32, #tpu.memory_space<vmem>>, vector<1x512xf32>
    %4 = vector.broadcast %3 : vector<1x512xf32> to vector<8x512xf32>
    %5 = arith.mulf %2, %4 : vector<8x512xf32>
    %c0_4 = arith.constant 0 : index
    %c0_5 = arith.constant 0 : index
    %6 = vector.load %arg3[%c0_4, %c0_5] : memref<1x512xf32, #tpu.memory_space<vmem>>, vector<1x512xf32>
    %7 = vector.broadcast %6 : vector<1x512xf32> to vector<8x512xf32>
    %8 = arith.addf %5, %7 : vector<8x512xf32>
    %cst = arith.constant 0.000000e+00 : f32
    %9 = vector.broadcast %cst : f32 to vector<8x512xf32>
    %10 = arith.cmpf oge, %8, %9 : vector<8x512xf32>
    %cst_6 = arith.constant 0.00999999977 : f32
    %11 = vector.broadcast %cst_6 : f32 to vector<8x512xf32>
    %12 = arith.mulf %11, %8 : vector<8x512xf32>
    %13 = arith.select %10, %8, %12 : vector<8x512xi1>, vector<8x512xf32>
    %c0_7 = arith.constant 0 : index
    %c0_8 = arith.constant 0 : index
    %c0_9 = arith.constant 0 : index
    %14 = vector.load %arg4[%c0_7, %c0_8, %c0_9] : memref<1x8x512xf32, #tpu.memory_space<vmem>>, vector<1x8x512xf32>
    %15 = vector.shape_cast %14 : vector<1x8x512xf32> to vector<8x512xf32>
    %16 = vector.shape_cast %13 : vector<8x512xf32> to vector<1x8x512xf32>
    tpu.vector_store %arg4[%c0_7, %c0_8, %c0_9], %16 {strides = array<i32>} : memref<1x8x512xf32, #tpu.memory_space<vmem>>, vector<1x8x512xf32>,
    return
  }
  func.func @transform_0(%arg0: i32) -> (i32, i32, i32) {
    %c0_i32 = arith.constant 0 : i32
    %c0_i32_0 = arith.constant 0 : i32
    %c0_i32_1 = arith.constant 0 : i32
    return %arg0, %c0_i32, %c0_i32_0 : i32, i32, i32
  }
  func.func @transform_1(%arg0: i32) -> (i32, i32) {
    %c0_i32 = arith.constant 0 : i32
    %c0_i32_0 = arith.constant 0 : i32
    %c0_i32_1 = arith.constant 0 : i32
    return %c0_i32, %c0_i32_0 : i32, i32
  }
  func.func @transform_2(%arg0: i32) -> (i32, i32) {
    %c0_i32 = arith.constant 0 : i32
    %c0_i32_0 = arith.constant 0 : i32
    %c0_i32_1 = arith.constant 0 : i32
    return %c0_i32, %c0_i32_0 : i32, i32
  }
  func.func @transform_3(%arg0: i32) -> (i32, i32, i32) {
    %c0_i32 = arith.constant 0 : i32
    %c0_i32_0 = arith.constant 0 : i32
    %c0_i32_1 = arith.constant 0 : i32
    return %arg0, %c0_i32, %c0_i32_0 : i32, i32, i32
  }
}

module attributes {stable_mosaic.version = 11 : i64} {
  func.func @_conv_bn_kernel(%arg0: i32, %arg1: memref<1x8x256xbf16, #tpu.memory_space<vmem>>, %arg2: memref<1x256xf32, #tpu.memory_space<vmem>>, %arg3: memref<1x256xf32, #tpu.memory_space<vmem>>, %arg4: memref<3x256x256xbf16, #tpu.memory_space<vmem>>, %arg5: memref<1x8x256xbf16, #tpu.memory_space<vmem>>, %arg6: memref<1x2x256xf32, #tpu.memory_space<vmem>>, %arg7: memref<10x256xf32, #tpu.memory_space<vmem>>) attributes {dimension_semantics = [#tpu.dimension_semantics<parallel>], iteration_bounds = array<i64: 2>, scalar_prefetch = 0 : i64, scratch_operands = 1 : i64, tpu.core_type = #tpu.core_type<tc>, window_params = [{transform_indices = @transform_0, window_bounds = array<i64: 1, 8, 256>}, {pipeline_mode = #tpu.pipeline_mode<synchronous>, transform_indices = @transform_1, window_bounds = array<i64: 1, 256>}, {pipeline_mode = #tpu.pipeline_mode<synchronous>, transform_indices = @transform_2, window_bounds = array<i64: 1, 256>}, {pipeline_mode = #tpu.pipeline_mode<synchronous>, transform_indices = @transform_3, window_bounds = array<i64: 3, 256, 256>}, {transform_indices = @transform_4, window_bounds = array<i64: 1, 8, 256>}, {transform_indices = @transform_5, window_bounds = array<i64: 1, 2, 256>}]} {
    %c0 = arith.constant 0 : index
    %c0_0 = arith.constant 0 : index
    %c0_1 = arith.constant 0 : index
    %0 = vector.load %arg1[%c0, %c0_0, %c0_1] : memref<1x8x256xbf16, #tpu.memory_space<vmem>>, vector<1x8x256xbf16>
    %1 = vector.shape_cast %0 : vector<1x8x256xbf16> to vector<8x256xbf16>
    %2 = arith.extf %1 : vector<8x256xbf16> to vector<8x256xf32>
    %c0_2 = arith.constant 0 : index
    %c0_3 = arith.constant 0 : index
    %3 = vector.load %arg2[%c0_2, %c0_3] : memref<1x256xf32, #tpu.memory_space<vmem>>, vector<1x256xf32>
    %4 = vector.broadcast %3 : vector<1x256xf32> to vector<8x256xf32>
    %5 = arith.mulf %2, %4 : vector<8x256xf32>
    %c0_4 = arith.constant 0 : index
    %c0_5 = arith.constant 0 : index
    %6 = vector.load %arg3[%c0_4, %c0_5] : memref<1x256xf32, #tpu.memory_space<vmem>>, vector<1x256xf32>
    %7 = vector.broadcast %6 : vector<1x256xf32> to vector<8x256xf32>
    %8 = arith.addf %5, %7 : vector<8x256xf32>
    %cst = arith.constant 0.000000e+00 : f32
    %9 = vector.broadcast %cst : f32 to vector<8x256xf32>
    %10 = arith.cmpf oge, %8, %9 : vector<8x256xf32>
    %cst_6 = arith.constant 0.00999999977 : f32
    %11 = vector.broadcast %cst_6 : f32 to vector<8x256xf32>
    %12 = arith.mulf %11, %8 : vector<8x256xf32>
    %13 = arith.select %10, %8, %12 : vector<8x256xi1>, vector<8x256xf32>
    %cst_7 = arith.constant 0.000000e+00 : f32
    %14 = vector.broadcast %cst_7 : f32 to vector<10x256xf32>
    %c0_8 = arith.constant 0 : index
    %c0_9 = arith.constant 0 : index
    %15 = vector.load %arg7[%c0_8, %c0_9] : memref<10x256xf32, #tpu.memory_space<vmem>>, vector<10x256xf32>
    tpu.vector_store %arg7[%c0_8, %c0_9], %14 {strides = array<i32>} : memref<10x256xf32, #tpu.memory_space<vmem>>, vector<10x256xf32>,
    %c1 = arith.constant 1 : index
    %c0_10 = arith.constant 0 : index
    %16 = vector.load %arg7[%c1, %c0_10] : memref<10x256xf32, #tpu.memory_space<vmem>>, vector<8x256xf32>
    tpu.vector_store %arg7[%c1, %c0_10], %13 {strides = array<i32>} : memref<10x256xf32, #tpu.memory_space<vmem>>, vector<8x256xf32>,
    %c0_11 = arith.constant 0 : index
    %c0_12 = arith.constant 0 : index
    %17 = vector.load %arg7[%c0_11, %c0_12] : memref<10x256xf32, #tpu.memory_space<vmem>>, vector<8x256xf32>
    %18 = arith.truncf %17 : vector<8x256xf32> to vector<8x256xbf16>
    %c1_13 = arith.constant 1 : index
    %c0_14 = arith.constant 0 : index
    %19 = vector.load %arg7[%c1_13, %c0_14] : memref<10x256xf32, #tpu.memory_space<vmem>>, vector<8x256xf32>
    %20 = arith.truncf %19 : vector<8x256xf32> to vector<8x256xbf16>
    %c2 = arith.constant 2 : index
    %c0_15 = arith.constant 0 : index
    %21 = vector.load %arg7[%c2, %c0_15] : memref<10x256xf32, #tpu.memory_space<vmem>>, vector<8x256xf32>
    %22 = arith.truncf %21 : vector<8x256xf32> to vector<8x256xbf16>
    %c0_16 = arith.constant 0 : index
    %c0_17 = arith.constant 0 : index
    %c0_18 = arith.constant 0 : index
    %23 = vector.load %arg4[%c0_16, %c0_17, %c0_18] : memref<3x256x256xbf16, #tpu.memory_space<vmem>>, vector<1x256x256xbf16>
    %24 = vector.shape_cast %23 : vector<1x256x256xbf16> to vector<256x256xbf16>
    %cst_19 = arith.constant dense<0.000000e+00> : vector<8x256xf32>
    %25 = tpu.matmul %18, %24, %cst_19 {dimension_numbers = #tpu.dot_dimension_numbers<[1], [0], [0], [1], [0, 0, 1, 1], [], []>} : vector<8x256xbf16>, vector<256x256xbf16>, vector<8x256xf32> -> vector<8x256xf32>
    %c1_20 = arith.constant 1 : index
    %c0_21 = arith.constant 0 : index
    %c0_22 = arith.constant 0 : index
    %26 = vector.load %arg4[%c1_20, %c0_21, %c0_22] : memref<3x256x256xbf16, #tpu.memory_space<vmem>>, vector<1x256x256xbf16>
    %27 = vector.shape_cast %26 : vector<1x256x256xbf16> to vector<256x256xbf16>
    %cst_23 = arith.constant dense<0.000000e+00> : vector<8x256xf32>
    %28 = tpu.matmul %20, %27, %cst_23 {dimension_numbers = #tpu.dot_dimension_numbers<[1], [0], [0], [1], [0, 0, 1, 1], [], []>} : vector<8x256xbf16>, vector<256x256xbf16>, vector<8x256xf32> -> vector<8x256xf32>
    %29 = arith.addf %25, %28 : vector<8x256xf32>
    %c2_24 = arith.constant 2 : index
    %c0_25 = arith.constant 0 : index
    %c0_26 = arith.constant 0 : index
    %30 = vector.load %arg4[%c2_24, %c0_25, %c0_26] : memref<3x256x256xbf16, #tpu.memory_space<vmem>>, vector<1x256x256xbf16>
    %31 = vector.shape_cast %30 : vector<1x256x256xbf16> to vector<256x256xbf16>
    %cst_27 = arith.constant dense<0.000000e+00> : vector<8x256xf32>
    %32 = tpu.matmul %22, %31, %cst_27 {dimension_numbers = #tpu.dot_dimension_numbers<[1], [0], [0], [1], [0, 0, 1, 1], [], []>} : vector<8x256xbf16>, vector<256x256xbf16>, vector<8x256xf32> -> vector<8x256xf32>
    %33 = arith.addf %29, %32 : vector<8x256xf32>
    %34 = arith.truncf %33 : vector<8x256xf32> to vector<8x256xbf16>
    %c0_28 = arith.constant 0 : index
    %c0_29 = arith.constant 0 : index
    %c0_30 = arith.constant 0 : index
    %35 = vector.load %arg5[%c0_28, %c0_29, %c0_30] : memref<1x8x256xbf16, #tpu.memory_space<vmem>>, vector<1x8x256xbf16>
    %36 = vector.shape_cast %35 : vector<1x8x256xbf16> to vector<8x256xbf16>
    %37 = vector.shape_cast %34 : vector<8x256xbf16> to vector<1x8x256xbf16>
    tpu.vector_store %arg5[%c0_28, %c0_29, %c0_30], %37 {strides = array<i32>} : memref<1x8x256xbf16, #tpu.memory_space<vmem>>, vector<1x8x256xbf16>,
    %cst_31 = arith.constant dense<0.000000e+00> : vector<256xf32>
    %38 = vector.multi_reduction <add>, %33, %cst_31 [0] : vector<8x256xf32> to vector<256xf32>
    %39 = vector.shape_cast %38 : vector<256xf32> to vector<1x256xf32>
    %c0_32 = arith.constant 0 : index
    %c0_33 = arith.constant 0 : index
    %c0_34 = arith.constant 0 : index
    %40 = vector.load %arg6[%c0_32, %c0_33, %c0_34] : memref<1x2x256xf32, #tpu.memory_space<vmem>>, vector<1x1x256xf32>
    %41 = vector.shape_cast %40 : vector<1x1x256xf32> to vector<1x256xf32>
    %42 = vector.shape_cast %39 : vector<1x256xf32> to vector<1x1x256xf32>
    tpu.vector_store %arg6[%c0_32, %c0_33, %c0_34], %42 {strides = array<i32>} : memref<1x2x256xf32, #tpu.memory_space<vmem>>, vector<1x1x256xf32>,
    %43 = arith.mulf %33, %33 : vector<8x256xf32>
    %cst_35 = arith.constant dense<0.000000e+00> : vector<256xf32>
    %44 = vector.multi_reduction <add>, %43, %cst_35 [0] : vector<8x256xf32> to vector<256xf32>
    %45 = vector.shape_cast %44 : vector<256xf32> to vector<1x256xf32>
    %c0_36 = arith.constant 0 : index
    %c1_37 = arith.constant 1 : index
    %c0_38 = arith.constant 0 : index
    %46 = vector.load %arg6[%c0_36, %c1_37, %c0_38] : memref<1x2x256xf32, #tpu.memory_space<vmem>>, vector<1x1x256xf32>
    %47 = vector.shape_cast %46 : vector<1x1x256xf32> to vector<1x256xf32>
    %48 = vector.shape_cast %45 : vector<1x256xf32> to vector<1x1x256xf32>
    tpu.vector_store %arg6[%c0_36, %c1_37, %c0_38], %48 {strides = array<i32>} : memref<1x2x256xf32, #tpu.memory_space<vmem>>, vector<1x1x256xf32>,
    return
  }
  func.func @transform_0(%arg0: i32) -> (i32, i32, i32) {
    %c0_i32 = arith.constant 0 : i32
    %c0_i32_0 = arith.constant 0 : i32
    %c0_i32_1 = arith.constant 0 : i32
    return %arg0, %c0_i32, %c0_i32_0 : i32, i32, i32
  }
  func.func @transform_1(%arg0: i32) -> (i32, i32) {
    %c0_i32 = arith.constant 0 : i32
    %c0_i32_0 = arith.constant 0 : i32
    %c0_i32_1 = arith.constant 0 : i32
    return %c0_i32, %c0_i32_0 : i32, i32
  }
  func.func @transform_2(%arg0: i32) -> (i32, i32) {
    %c0_i32 = arith.constant 0 : i32
    %c0_i32_0 = arith.constant 0 : i32
    %c0_i32_1 = arith.constant 0 : i32
    return %c0_i32, %c0_i32_0 : i32, i32
  }
  func.func @transform_3(%arg0: i32) -> (i32, i32, i32) {
    %c0_i32 = arith.constant 0 : i32
    %c0_i32_0 = arith.constant 0 : i32
    %c0_i32_1 = arith.constant 0 : i32
    %c0_i32_2 = arith.constant 0 : i32
    return %c0_i32, %c0_i32_0, %c0_i32_1 : i32, i32, i32
  }
  func.func @transform_4(%arg0: i32) -> (i32, i32, i32) {
    %c0_i32 = arith.constant 0 : i32
    %c0_i32_0 = arith.constant 0 : i32
    %c0_i32_1 = arith.constant 0 : i32
    return %arg0, %c0_i32, %c0_i32_0 : i32, i32, i32
  }
  func.func @transform_5(%arg0: i32) -> (i32, i32, i32) {
    %c0_i32 = arith.constant 0 : i32
    %c0_i32_0 = arith.constant 0 : i32
    %c0_i32_1 = arith.constant 0 : i32
    return %arg0, %c0_i32, %c0_i32_0 : i32, i32, i32
  }
}

</mosaic_0001>

<bundles_post_ra>
// kernel: insert_b_forward.19
= control target key start
LH: loop header
LB: loop body
LE: loop exit
PB: predicated region body
PF: predicated region fallthrough
CT: control target
= control target key end

     0   :  { %s1057_s6 = smov 0   ;;  %s1605_s0 = inlined_call_operand.vmem [shape: f32[2,10,10,40], index: 0, kind: input, shape index: {}]   ;;  %s1606_s1 = inlined_call_operand.vmem [shape: f32[2,8,8,32], index: 1, kind: output, shape index: {}]  }
   0x1 LB: > { %s967_s7 = sadd.s32 4294967295, %s1043_s6   ;;  %p971_p0 = scmp.ge.s32.totalorder %s1043_s6, 1  ;;  %s1043_s6 = sphi %s1057_s6, %s11_s6  }
   0x2   : > { %p87_p1 = scmp.lt.s32.totalorder %s1043_s6, 3 }
   0x4   : > { %p88_p2 = pnand %p971_p0, %p87_p1 }
   0x5   : > { %p107_p3 = scmp.lt.s32.totalorder (!%p88_p2), %s967_s7, 1  ;;  %s1045_s12 = smov (!%p88_p2), 124  }
   0x6   : > { %91 = sbr.rel (%p88_p2) target bundleno = 511 (0x1ff), region = 24  ;;  %s1046_s13 = smov (!%p88_p2), 120  }
   0xb   : > { %s1608_s7 = smov (!%p107_p3, %s967_s7), 1  ;;  %vm903_vm0 = vcmask 261120  }
   0xc   : > { %s1026_s8 = smul.u32 160, %s1608_s7  ;;  %s1025_s14 = sshll.u32 %s1608_s7, 6 }
   0xd   : > { %s1573_s17 = scalar_lea.vmem %s1606_s1, %s1025_s14 }
   0xe   : > { %s1071_s11 = scalar_lea.vmem %s1605_s0, %s1026_s8 }
   0xf   : > { %v1074_v0 = vld [vmem:[%s1071_s11 + $0x20] sm:$0xff]  ;;  %v1085_v4 = vld [vmem:[%s1071_s11 + $0x10] sm:$0xff] }
  0x10   : > { %v117_v1 = vld [vmem:[%s1071_s11] sm:$0xff]  ;;  %137 = vrot.lane.b32.xlu1 %v1074_v0, %s1045_s12  ;;  %v1092_v8 = vld [vmem:[%s1071_s11 + $0x30] sm:$0xff] }
  0x11   : > { %v157_v2 = vmax.f32 %v117_v1, %v1074_v0  ;;  %133 = vrot.lane.b32.xlu0 %v117_v1, %s1045_s12  ;;  %v1082_v3 = vld [vmem:[%s1071_s11 + $0x40] sm:$0xff]  ;;  %v1095_v9 = vld [vmem:[%s1071_s11 + $0x50] sm:$0xff]  ;;  %v158_v34 = vmax.f32 %v1092_v8, %v1074_v0 }
  0x12   : > { %141 = vrot.lane.b32.xlu2 %v1082_v3, %s1045_s12  ;;  %v197_v6 = vld [vmem:[%s1071_s11 + $0x1] sm:$0xff]  ;;  %v1104_v10 = vld [vmem:[%s1071_s11 + $0x70] sm:$0xff]  ;;  %v207_v59 = vmax.f32 %v1082_v3, %v1092_v8 }
  0x13   : > { %v189_v5 = vmax.f32 %v157_v2, %v1085_v4  ;;  %v1107_v11 = vld [vmem:[%s1071_s11 + $0x60] sm:$0xff]  ;;  %v1127_v12 = vld [vmem:[%s1071_s11 + $0x11] sm:$0xff]  ;;  %v190_v36 = vmax.f32 %v158_v34, %v1085_v4 }
  0x14   : > { %v1135_v13 = vld [vmem:[%s1071_s11 + $0x21] sm:$0xff]  ;;  %v1139_v15 = vld [vmem:[%s1071_s11 + $0x31] sm:$0xff]  ;;  %v209_v44 = vmax.f32 %v1095_v9, %v1107_v11 }
  0x15   : > { %v205_v7 = vmax.f32 %v189_v5, %v197_v6  ;;  %v1142_v16 = vld [vmem:[%s1071_s11 + $0x41] sm:$0xff]  ;;  %v1159_v21 = vld [vmem:[%s1071_s11 + $0x51] sm:$0xff]  ;;  %v206_v37 = vmax.f32 %v190_v36, %v1139_v15  ;;  %v247_v63 = vmax.f32 %v207_v59, %v1139_v15 }
  0x16   : > { %v1152_v18 = vld [vmem:[%s1071_s11 + $0x22] sm:$0xff]  ;;  %v1162_v22 = vld [vmem:[%s1071_s11 + $0x71] sm:$0xff] }
  0x17   : > { %v245_v14 = vmax.f32 %v205_v7, %v1135_v13  ;;  %v1156_v20 = vld [vmem:[%s1071_s11 + $0x61] sm:$0xff]  ;;  %v1165_v23 = vld [vmem:[%s1071_s11 + $0x12] sm:$0xff]  ;;  %v246_v42 = vmax.f32 %v206_v37, %v1135_v13 }
  0x18   : > { %139 = vrot.lane.b32.xlu1 %v1092_v8, %s1045_s12  ;;  %v285_v25 = vld [vmem:[%s1071_s11 + $0x2] sm:$0xff]  ;;  %v1192_v27 = vld [vmem:[%s1071_s11 + $0x32] sm:$0xff]  ;;  %v249_v50 = vmax.f32 %v209_v44, %v1156_v20 }
  0x19   : > { %135 = vrot.lane.b32.xlu0 %v1085_v4, %s1045_s12  ;;  %v277_v17 = vmax.f32 %v245_v14, %v1127_v12  ;;  %v1203_v29 = vld [vmem:[%s1071_s11 + $0x52] sm:$0xff]  ;;  %v1206_v30 = vld [vmem:[%s1071_s11 + $0x42] sm:$0xff]  ;;  %v278_v45 = vmax.f32 %v246_v42, %v1127_v12 }
  0x1a   : > { %143 = vrot.lane.b32.xlu2 %v1095_v9, %s1045_s12  ;;  %v1209_v31 = vld [vmem:[%s1071_s11 + $0x62] sm:$0xff]  ;;  %v1220_v33 = vld [vmem:[%s1071_s11 + $0x72] sm:$0xff]  ;;  %v281_v53 = vmax.f32 %v249_v50, %v1159_v21 }
  0x1b   : > { %v293_v19 = vmax.f32 %v277_v17, %v1152_v18  ;;  %v294_v51 = vmax.f32 %v278_v45, %v1152_v18 }
  0x1c   : > { %v297_v60 = vmax.f32 %v281_v53, %v1142_v16 }
  0x1d   : > { %v333_v24 = vmax.f32 %v293_v19, %v1165_v23  ;;  %v334_v54 = vmax.f32 %v294_v51, %v1165_v23 }
  0x1f   : > { %v365_v26 = vmax.f32 %v333_v24, %v285_v25  ;;  %v366_v61 = vmax.f32 %v334_v54, %v1192_v27  ;;  %v210_v24 = vmax.f32 %v1107_v11, %v1104_v10 }
  0x20   : > { %147 = vrot.lane.b32.xlu1 %v1104_v10, %s1045_s12 }
  0x21   : > { %145 = vrot.lane.b32.xlu0 %v1107_v11, %s1045_s12  ;;  %v250_v36 = vmax.f32 %v210_v24, %v1156_v20 }
  0x22   : > { %165 = vrot.lane.b32.xlu2 %v117_v1, %s1046_s13  ;;  %v337_v1 = vmax.f32 %v297_v60, %v1203_v29 }
  0x28   : > { %169 = vrot.lane.b32.xlu1 %v1074_v0, %s1046_s13 }
  0x29   : > { %167 = vrot.lane.b32.xlu0 %v1085_v4, %s1046_s13 }
  0x2a   : > { %171 = vrot.lane.b32.xlu2 %v1092_v8, %s1046_s13 }
  0x30   : > { %175 = vrot.lane.b32.xlu1 %v1095_v9, %s1046_s13 }
  0x31   : > { %173 = vrot.lane.b32.xlu0 %v1082_v3, %s1046_s13 }
  0x32   : > { %177 = vrot.lane.b32.xlu2 %v1107_v11, %s1046_s13 }
  0x38   : > { %221 = vrot.lane.b32.xlu1 %v197_v6, %s1045_s12 }
  0x39   : > { %179 = vrot.lane.b32.xlu0 %v1104_v10, %s1046_s13 }
  0x3a   : > { %223 = vrot.lane.b32.xlu2 %v1127_v12, %s1045_s12 }
  0x40   : > { %227 = vrot.lane.b32.xlu1 %v1139_v15, %s1045_s12 }
  0x41   : > { %225 = vrot.lane.b32.xlu0 %v1135_v13, %s1045_s12 }
  0x42   : > { %229 = vrot.lane.b32.xlu2 %v1142_v16, %s1045_s12 }
  0x48   : > { %233 = vrot.lane.b32.xlu1 %v1156_v20, %s1045_s12 }
  0x49   : > { %231 = vrot.lane.b32.xlu0 %v1159_v21, %s1045_s12 }
  0x4a   : > { %235 = vrot.lane.b32.xlu2 %v1162_v22, %s1045_s12 }
  0x50   : > { %255 = vrot.lane.b32.xlu1 %v1127_v12, %s1046_s13 }
  0x51   : > { %253 = vrot.lane.b32.xlu0 %v197_v6, %s1046_s13 }
  0x52   : > { %257 = vrot.lane.b32.xlu2 %v1135_v13, %s1046_s13 }
  0x58   : > { %261 = vrot.lane.b32.xlu1 %v1142_v16, %s1046_s13 }
  0x59   : > { %259 = vrot.lane.b32.xlu0 %v1139_v15, %s1046_s13 }
  0x5a   : > { %263 = vrot.lane.b32.xlu2 %v1159_v21, %s1046_s13 }
  0x60   : > { %267 = vrot.lane.b32.xlu1 %v1162_v22, %s1046_s13 }
  0x61   : > { %265 = vrot.lane.b32.xlu0 %v1156_v20, %s1046_s13 }
  0x62   : > { %309 = vrot.lane.b32.xlu2 %v285_v25, %s1045_s12 }
  0x68   : > { %313 = vrot.lane.b32.xlu1 %v1152_v18, %s1045_s12 }
  0x69   : > { %311 = vrot.lane.b32.xlu0 %v1165_v23, %s1045_s12 }
  0x6a   : > { %315 = vrot.lane.b32.xlu2 %v1192_v27, %s1045_s12 }
  0x6c   : > { %v1200_v28 = vpop.permute.xlu2 %141 }
  0x70   : > { %319 = vrot.lane.b32.xlu1 %v1203_v29, %s1045_s12 }
  0x71   : > { %317 = vrot.lane.b32.xlu0 %v1206_v30, %s1045_s12 }
  0x72   : > { %321 = vrot.lane.b32.xlu2 %v1209_v31, %s1045_s12 }
  0x74   : > { %v1217_v32 = vpop.permute.xlu2 %143 }
  0x78   : > { %341 = vrot.lane.b32.xlu1 %v285_v25, %s1046_s13  ;;  %v279_v25 = vmax.f32 %v247_v63, %v1135_v13 }
  0x79   : > { %323 = vrot.lane.b32.xlu0 %v1220_v33, %s1045_s12 }
  0x7a   : > { %343 = vrot.lane.b32.xlu2 %v1165_v23, %s1046_s13  ;;  %v295_v37 = vmax.f32 %v279_v25, %v1142_v16 }
  0x7c   : > { %v166_v35 = vpop.permute.xlu2 %165 }
  0x80   : > { %347 = vrot.lane.b32.xlu1 %v1192_v27, %s1046_s13 }
  0x81   : > { %345 = vrot.lane.b32.xlu0 %v1152_v18, %s1046_s13 }
  0x82   : > { %349 = vrot.lane.b32.xlu2 %v1206_v30, %s1046_s13  ;;  %v138_v38 = vpop.permute.xlu1 %137 }
  0x83   : > { %v134_v39 = vpop.permute.xlu0 %133  ;;  %v159_v2 = vmax.f32 %v1074_v0, %v138_v38  ;;  %v161_v38 = vmax.f32 %v1082_v3, %v1200_v28  ;;  %v212_v28 = vmax.f32 %v1220_v33, %v1162_v22 }
  0x84   : > { %v382_v40 = vmax.f32 %v365_v26, %v134_v39  ;;  %v172_v41 = vpop.permute.xlu2 %171  ;;  %v369_v26 = vmax.f32 %v337_v1, %v1206_v30 }
  0x86   : > { %v1238_v43 = vmax.f32 %v382_v40, %v166_v35  ;;  %v1291_v35 = vld [vmem:[%s1071_s11 + $0x80] sm:$0xff]  ;;  %v386_v39 = vmax.f32 %v369_v26, %v1209_v31  ;;  %v162_v40 = vmax.f32 %v1095_v9, %v1217_v32 }
  0x87   : > { %v252_v53 = vmax.f32 %v212_v28, %v1291_v35  ;;  %v1358_v28 = vld [vmem:[%s1071_s11 + $0x81] sm:$0xff] }
  0x88   : > { %353 = vrot.lane.b32.xlu1 %v1209_v31, %s1046_s13 }
  0x89   : > { %351 = vrot.lane.b32.xlu0 %v1203_v29, %s1046_s13 }
  0x8a   : > { %355 = vrot.lane.b32.xlu2 %v1220_v33, %s1046_s13  ;;  %v140_v46 = vpop.permute.xlu1 %139 }
  0x8b   : > { %v136_v47 = vpop.permute.xlu0 %135  ;;  %v160_v48 = vmax.f32 %v1092_v8, %v140_v46 }
  0x8c   : > { %v178_v49 = vpop.permute.xlu2 %177  ;;  %v383_v5 = vmax.f32 %v366_v61, %v136_v47  ;;  %v282_v47 = vmax.f32 %v250_v36, %v1159_v21 }
  0x8d   : > { %v1252_v52 = vmax.f32 %v160_v48, %v172_v41  ;;  %v335_v48 = vmax.f32 %v295_v37, %v1152_v18 }
  0x8f   : > { %v367_v32 = vmax.f32 %v335_v48, %v1206_v30 }
  0x90   : > { %400 = vrot.lane.b32.xlu1 %v1074_v0, %s1045_s12 }
  0x91   : > { %398 = vrot.lane.b32.xlu0 %v1085_v4, %s1045_s12  ;;  %v384_v63 = vmax.f32 %v367_v32, %v1192_v27 }
  0x92   : > { %402 = vrot.lane.b32.xlu2 %v1092_v8, %s1045_s12  ;;  %v148_v55 = vpop.permute.xlu1 %147 }
  0x93   : > { %v146_v56 = vpop.permute.xlu0 %145  ;;  %v164_v51 = vmax.f32 %v1104_v10, %v148_v55 }
  0x94   : > { %v163_v57 = vmax.f32 %v1107_v11, %v146_v56  ;;  %v1263_v58 = vpop.permute.xlu2 %223 }
  0x96   : > { %v1269_v62 = vmax.f32 %v163_v57, %v178_v49 }
  0x98   : > { %406 = vrot.lane.b32.xlu1 %v1095_v9, %s1045_s12 }
  0x99   : > { %404 = vrot.lane.b32.xlu0 %v1082_v3, %s1045_s12 }
  0x9a   : > { %408 = vrot.lane.b32.xlu2 %v1107_v11, %s1045_s12  ;;  %v170_v6 = vpop.permute.xlu1 %169 }
  0x9b   : > { %v168_v7 = vpop.permute.xlu0 %167  ;;  %v191_v14 = vmax.f32 %v159_v2, %v170_v6 }
  0x9c   : > { %v1280_v17 = vmax.f32 %v383_v5, %v168_v7  ;;  %v1282_v19 = vpop.permute.xlu2 %229 }
  0x9d   : > { %v424_v5 = vmax.f32 %v384_v63, %v191_v14 }
  0x9e   : > { %v455_v34 = vmax.f32 %v1280_v17, %v1263_v58 }
  0xa0   : > { %412 = vrot.lane.b32.xlu1 %v1291_v35, %s1045_s12 }
  0xa1   : > { %410 = vrot.lane.b32.xlu0 %v1104_v10, %s1045_s12 }
  0xa2   : > { %430 = vrot.lane.b32.xlu2 %v1085_v4, %s1046_s13  ;;  %v176_v41 = vpop.permute.xlu1 %175  ;;  %v298_v4 = vmax.f32 %v282_v47, %v1162_v22 }
  0xa3   : > { %v174_v42 = vpop.permute.xlu0 %173  ;;  %v194_v44 = vmax.f32 %v162_v40, %v176_v41 }
  0xa4   : > { %v193_v45 = vmax.f32 %v161_v38, %v174_v42  ;;  %v236_v46 = vpop.permute.xlu2 %235  ;;  %v338_v61 = vmax.f32 %v298_v4, %v1203_v29 }
  0xa6   : > { %v426_v49 = vmax.f32 %v386_v39, %v193_v45  ;;  %v370_v55 = vmax.f32 %v338_v61, %v1220_v33 }
  0xa8   : > { %v458_v50 = vmax.f32 %v426_v49, %v1282_v19  ;;  %434 = vrot.lane.b32.xlu1 %v1092_v8, %s1046_s13  ;;  %v387_v26 = vmax.f32 %v370_v55, %v1209_v31 }
  0xa9   : > { %432 = vrot.lane.b32.xlu0 %v1074_v0, %s1046_s13 }
  0xaa   : > { %436 = vrot.lane.b32.xlu2 %v1082_v3, %s1046_s13  ;;  %v222_v54 = vpop.permute.xlu1 %221  ;;  %v427_v14 = vmax.f32 %v387_v26, %v194_v44 }
  0xab   : > { %v180_v56 = vpop.permute.xlu0 %179  ;;  %v454_v57 = vmax.f32 %v1238_v43, %v222_v54  ;;  %v208_v43 = vmax.f32 %v1252_v52, %v1139_v15  ;;  %v211_v52 = vmax.f32 %v1269_v62, %v1156_v20 }
  0xac   : > { %v196_v59 = vmax.f32 %v164_v51, %v180_v56  ;;  %v258_v60 = vpop.permute.xlu2 %257 }
  0xae   : > { %v284_v1 = vmax.f32 %v252_v53, %v196_v59 }
  0xb0   : > { %v1324_v2 = vmax.f32 %v284_v1, %v236_v46  ;;  %440 = vrot.lane.b32.xlu1 %v1107_v11, %s1046_s13 }
  0xb1   : > { %438 = vrot.lane.b32.xlu0 %v1095_v9, %s1046_s13 }
  0xb2   : > { %442 = vrot.lane.b32.xlu2 %v1104_v10, %s1046_s13  ;;  %v228_v6 = vpop.permute.xlu1 %227 }
  0xb3   : > { %v226_v7 = vpop.permute.xlu0 %225  ;;  %v248_v19 = vmax.f32 %v208_v43, %v228_v6 }
  0xb4   : > { %v456_v24 = vmax.f32 %v424_v5, %v226_v7  ;;  %v264_v25 = vpop.permute.xlu2 %263 }
  0xb6   : > { %v1336_v36 = vmax.f32 %v456_v24, %v258_v60 }
  0xb8   : > { %486 = vrot.lane.b32.xlu1 %v1127_v12, %s1045_s12 }
  0xb9   : > { %444 = vrot.lane.b32.xlu0 %v1291_v35, %s1046_s13 }
  0xba   : > { %488 = vrot.lane.b32.xlu2 %v1135_v13, %s1045_s12  ;;  %v234_v37 = vpop.permute.xlu1 %233 }
  0xbb   : > { %v232_v38 = vpop.permute.xlu0 %231  ;;  %v251_v39 = vmax.f32 %v211_v52, %v234_v37 }
  0xbc   : > { %v459_v40 = vmax.f32 %v427_v14, %v232_v38  ;;  %v310_v41 = vpop.permute.xlu2 %309 }
  0xbe   : > { %v1346_v42 = vmax.f32 %v459_v40, %v264_v25 }
  0xc0   : > { %492 = vrot.lane.b32.xlu1 %v1142_v16, %s1045_s12 }
  0xc1   : > { %490 = vrot.lane.b32.xlu0 %v1139_v15, %s1045_s12 }
  0xc2   : > { %494 = vrot.lane.b32.xlu2 %v1159_v21, %s1045_s12  ;;  %v256_v62 = vpop.permute.xlu1 %255 }
  0xc3   : > { %v254_v44 = vpop.permute.xlu0 %253  ;;  %v471_v45 = vmax.f32 %v455_v34, %v256_v62 }
  0xc4   : > { %v470_v46 = vmax.f32 %v454_v57, %v254_v44  ;;  %v316_v47 = vpop.permute.xlu2 %315 }
  0xc6   : > { %v510_v48 = vmax.f32 %v470_v46, %v310_v41 }
  0xc8   : > { %498 = vrot.lane.b32.xlu1 %v1162_v22, %s1045_s12 }
  0xc9   : > { %496 = vrot.lane.b32.xlu0 %v1156_v20, %s1045_s12 }
  0xca   : > { %500 = vrot.lane.b32.xlu2 %v1358_v28, %s1045_s12  ;;  %v262_v49 = vpop.permute.xlu1 %261 }
  0xcb   : > { %v260_v4 = vpop.permute.xlu0 %259  ;;  %v474_v32 = vmax.f32 %v458_v50, %v262_v49 }
  0xcc   : > { %v280_v51 = vmax.f32 %v248_v19, %v260_v4  ;;  %v322_v58 = vpop.permute.xlu2 %321 }
  0xce   : > { %v296_v17 = vmax.f32 %v280_v51, %v1192_v27 }
  0xd0   : > { %v336_v34 = vmax.f32 %v296_v17, %v316_v47  ;;  %520 = vrot.lane.b32.xlu1 %v1135_v13, %s1046_s13 }
  0xd1   : > { %518 = vrot.lane.b32.xlu0 %v1127_v12, %s1046_s13 }
  0xd2   : > { %522 = vrot.lane.b32.xlu2 %v1139_v15, %s1046_s13  ;;  %v268_v53 = vpop.permute.xlu1 %267 }
  0xd3   : > { %v266_v54 = vpop.permute.xlu0 %265  ;;  %v340_v56 = vmax.f32 %v1324_v2, %v268_v53 }
  0xd4   : > { %v283_v57 = vmax.f32 %v251_v39, %v266_v54  ;;  %v344_v50 = vpop.permute.xlu2 %343 }
  0xd5   : > { %v372_v25 = vmax.f32 %v340_v56, %v1358_v28 }
  0xd6   : > { %v299_v59 = vmax.f32 %v283_v57, %v1209_v31 }
  0xd8   : > { %v339_v60 = vmax.f32 %v299_v59, %v322_v58  ;;  %526 = vrot.lane.b32.xlu1 %v1159_v21, %s1046_s13 }
  0xd9   : > { %524 = vrot.lane.b32.xlu0 %v1142_v16, %s1046_s13 }
  0xda   : > { %528 = vrot.lane.b32.xlu2 %v1156_v20, %s1046_s13  ;;  %v314_v12 = vpop.permute.xlu1 %313 }
  0xdb   : > { %v312_v61 = vpop.permute.xlu0 %311  ;;  %v512_v63 = vmax.f32 %v1336_v36, %v314_v12 }
  0xdc   : > { %v511_v1 = vmax.f32 %v471_v45, %v312_v61  ;;  %v350_v2 = vpop.permute.xlu2 %349  ;;  %v1407_v45 = vld [vmem:[%s1071_s11 + $0x82] sm:$0xff] }
  0xde   : > { %v1382_v55 = vmax.f32 %v511_v1, %v344_v50 }
  0xe0   : > { %532 = vrot.lane.b32.xlu1 %v1358_v28, %s1046_s13 }
  0xe1   : > { %530 = vrot.lane.b32.xlu0 %v1162_v22, %s1046_s13 }
  0xe2   : > { %574 = vrot.lane.b32.xlu2 %v1165_v23, %s1045_s12  ;;  %v320_v5 = vpop.permute.xlu1 %319 }
  0xe3   : > { %v318_v43 = vpop.permute.xlu0 %317  ;;  %v515_v6 = vmax.f32 %v1346_v42, %v320_v5 }
  0xe4   : > { %v514_v7 = vmax.f32 %v474_v32, %v318_v43  ;;  %v356_v19 = vpop.permute.xlu2 %355 }
  0xe6   : > { %v1391_v24 = vmax.f32 %v514_v7, %v350_v2 }
  0xe8   : > { %578 = vrot.lane.b32.xlu1 %v1192_v27, %s1045_s12 }
  0xe9   : > { %576 = vrot.lane.b32.xlu0 %v1152_v18, %s1045_s12 }
  0xea   : > { %580 = vrot.lane.b32.xlu2 %v1206_v30, %s1045_s12  ;;  %v342_v26 = vpop.permute.xlu1 %341 }
  0xeb   : > { %v324_v36 = vpop.permute.xlu0 %323  ;;  %v542_v14 = vmax.f32 %v510_v48, %v342_v26 }
  0xec   : > { %v389_v52 = vmax.f32 %v372_v25, %v324_v36  ;;  %v403_v37 = vpop.permute.xlu2 %402 }
  0xee   : > { %v429_v38 = vmax.f32 %v389_v52, %v356_v19 }
  0xf0   : > { %584 = vrot.lane.b32.xlu1 %v1209_v31, %s1045_s12  ;;  %v461_v61 = vmax.f32 %v429_v38, %v1407_v45 }
  0xf1   : > { %582 = vrot.lane.b32.xlu0 %v1203_v29, %s1045_s12 }
  0xf2   : > { %586 = vrot.lane.b32.xlu2 %v1220_v33, %s1045_s12  ;;  %v348_v39 = vpop.permute.xlu1 %347 }
  0xf3   : > { %v346_v40 = vpop.permute.xlu0 %345  ;;  %v368_v41 = vmax.f32 %v336_v34, %v348_v39 }
  0xf4   : > { %v544_v42 = vmax.f32 %v512_v63, %v346_v40  ;;  %v409_v62 = vpop.permute.xlu2 %408 }
  0xf5   : > { %v385_v54 = vmax.f32 %v368_v41, %v1082_v3 }
  0xf6   : > { %v560_v44 = vmax.f32 %v544_v42, %v403_v37 }
  0xf8   : > { %606 = vrot.lane.b32.xlu1 %v1165_v23, %s1046_s13 }
  0xf9   : > { %588 = vrot.lane.b32.xlu0 %v1407_v45, %s1045_s12 }
  0xfa   : > { %608 = vrot.lane.b32.xlu2 %v1152_v18, %s1046_s13  ;;  %v354_v46 = vpop.permute.xlu1 %353 }
  0xfb   : > { %v352_v47 = vpop.permute.xlu0 %351  ;;  %v371_v48 = vmax.f32 %v339_v60, %v354_v46 }
  0xfc   : > { %v547_v49 = vmax.f32 %v515_v6, %v352_v47  ;;  %v431_v4 = vpop.permute.xlu2 %430 }
  0xfd   : > { %v388_v63 = vmax.f32 %v371_v48, %v1104_v10 }
  0xfe   : > { %v563_v32 = vmax.f32 %v547_v49, %v409_v62 }
 0x100   : > { %612 = vrot.lane.b32.xlu1 %v1206_v30, %s1046_s13 }
 0x101   : > { %610 = vrot.lane.b32.xlu0 %v1192_v27, %s1046_s13 }
 0x102   : > { %614 = vrot.lane.b32.xlu2 %v1203_v29, %s1046_s13  ;;  %v401_v23 = vpop.permute.xlu1 %400 }
 0x103   : > { %v399_v51 = vpop.permute.xlu0 %398  ;;  %v559_v58 = vmax.f32 %v1382_v55, %v401_v23  ;;  %v1006_v55 = vld [vmem:[%s1071_s11 + $0x90] sm:$0xff] }
 0x104   : > { %v558_v17 = vmax.f32 %v542_v14, %v399_v51  ;;  %v437_v34 = vpop.permute.xlu2 %436 }
 0x106   : > { %v1422_v53 = vmax.f32 %v558_v17, %v431_v4 }
 0x108   : > { %618 = vrot.lane.b32.xlu1 %v1220_v33, %s1046_s13 }
 0x109   : > { %616 = vrot.lane.b32.xlu0 %v1209_v31, %s1046_s13 }
 0x10a   : > { %620 = vrot.lane.b32.xlu2 %v1407_v45, %s1046_s13  ;;  %v407_v56 = vpop.permute.xlu1 %406 }
 0x10b   : > { %v405_v57 = vpop.permute.xlu0 %404  ;;  %v562_v50 = vmax.f32 %v1391_v24, %v407_v56 }
 0x10c   : > { %v425_v59 = vmax.f32 %v385_v54, %v405_v57  ;;  %v443_v60 = vpop.permute.xlu2 %442 }
 0x10e   : > { %v457_v12 = vmax.f32 %v425_v59, %v437_v34 }
 0x110   : > { %665 = vrot.lane.b32.xlu1 %v1092_v8, %s1045_s12 }
 0x111   : > { %663 = vrot.lane.b32.xlu0 %v1074_v0, %s1045_s12 }
 0x112   : > { %667 = vrot.lane.b32.xlu2 %v1082_v3, %s1045_s12  ;;  %v413_v1 = vpop.permute.xlu1 %412 }
 0x113   : > { %v411_v2 = vpop.permute.xlu0 %410  ;;  %v477_v5 = vmax.f32 %v461_v61, %v413_v1  ;;  %v1014_v61 = vld [vmem:[%s1071_s11 + $0x91] sm:$0xff] }
 0x114   : > { %v428_v43 = vmax.f32 %v388_v63, %v411_v2  ;;  %v489_v6 = vpop.permute.xlu2 %488 }
 0x115   : > { %v517_v19 = vmax.f32 %v477_v5, %v1006_v55 }
 0x116   : > { %v460_v7 = vmax.f32 %v428_v43, %v443_v60 }
 0x118   : > { %671 = vrot.lane.b32.xlu1 %v1107_v11, %s1045_s12 }
 0x119   : > { %669 = vrot.lane.b32.xlu0 %v1095_v9, %s1045_s12 }
 0x11a   : > { %673 = vrot.lane.b32.xlu2 %v1104_v10, %s1045_s12  ;;  %v435_v24 = vpop.permute.xlu1 %434 }
 0x11b   : > { %v433_v25 = vpop.permute.xlu0 %432  ;;  %v600_v26 = vmax.f32 %v560_v44, %v435_v24 }
 0x11c   : > { %v599_v36 = vmax.f32 %v559_v58, %v433_v25  ;;  %v495_v14 = vpop.permute.xlu2 %494 }
 0x11e   : > { %v631_v52 = vmax.f32 %v599_v36, %v489_v6 }
 0x120   : > { %677 = vrot.lane.b32.xlu1 %v1006_v55, %s1045_s12 }
 0x121   : > { %675 = vrot.lane.b32.xlu0 %v1291_v35, %s1045_s12 }
 0x122   : > { %695 = vrot.lane.b32.xlu2 %v1074_v0, %s1046_s13  ;;  %v441_v37 = vpop.permute.xlu1 %440 }
 0x123   : > { %v439_v38 = vpop.permute.xlu0 %438  ;;  %v603_v39 = vmax.f32 %v563_v32, %v441_v37 }
 0x124   : > { %v602_v40 = vmax.f32 %v562_v50, %v439_v38  ;;  %v501_v41 = vpop.permute.xlu2 %500 }
 0x126   : > { %v634_v42 = vmax.f32 %v602_v40, %v495_v14 }
 0x128   : > { %699 = vrot.lane.b32.xlu1 %v1082_v3, %s1046_s13  ;;  %v473_v3 = vmax.f32 %v457_v12, %v1142_v16 }
 0x129   : > { %697 = vrot.lane.b32.xlu0 %v1092_v8, %s1046_s13 }
 0x12a   : > { %701 = vrot.lane.b32.xlu2 %v1095_v9, %s1046_s13  ;;  %v487_v62 = vpop.permute.xlu1 %486 }
 0x12b   : > { %v445_v44 = vpop.permute.xlu0 %444  ;;  %v630_v46 = vmax.f32 %v1422_v53, %v487_v62 }
 0x12c   : > { %v549_v0 = vmax.f32 %v517_v19, %v445_v44  ;;  %v523_v47 = vpop.permute.xlu2 %522 }
 0x12e   : > { %v565_v48 = vmax.f32 %v549_v0, %v501_v41 }
 0x130   : > { %705 = vrot.lane.b32.xlu1 %v1104_v10, %s1046_s13  ;;  %v476_v10 = vmax.f32 %v460_v7, %v1162_v22 }
 0x131   : > { %703 = vrot.lane.b32.xlu0 %v1107_v11, %s1046_s13 }
 0x132   : > { %707 = vrot.lane.b32.xlu2 %v1291_v35, %s1046_s13  ;;  %v493_v8 = vpop.permute.xlu1 %492 }
 0x133   : > { %v491_v49 = vpop.permute.xlu0 %490  ;;  %v513_v4 = vmax.f32 %v473_v3, %v493_v8  ;;  %v1022_v3 = vld [vmem:[%s1071_s11 + $0x92] sm:$0xff] }
 0x134   : > { %v632_v32 = vmax.f32 %v600_v26, %v491_v49  ;;  %v529_v23 = vpop.permute.xlu2 %528 }
 0x136   : > { %v1466_v51 = vmax.f32 %v632_v32, %v523_v47 }
 0x138   : > { %751 = vrot.lane.b32.xlu1 %v1135_v13, %s1045_s12 }
 0x139   : > { %709 = vrot.lane.b32.xlu0 %v1006_v55, %s1046_s13 }
 0x13a   : > { %753 = vrot.lane.b32.xlu2 %v1139_v15, %s1045_s12  ;;  %v499_v11 = vpop.permute.xlu1 %498 }
 0x13b   : > { %v497_v58 = vpop.permute.xlu0 %496  ;;  %v516_v17 = vmax.f32 %v476_v10, %v499_v11 }
 0x13c   : > { %v635_v34 = vmax.f32 %v603_v39, %v497_v58  ;;  %v575_v53 = vpop.permute.xlu2 %574 }
 0x13e   : > { %v1474_v54 = vmax.f32 %v635_v34, %v529_v23 }
 0x140   : > { %757 = vrot.lane.b32.xlu1 %v1159_v21, %s1045_s12 }
 0x141   : > { %755 = vrot.lane.b32.xlu0 %v1142_v16, %s1045_s12 }
 0x142   : > { %759 = vrot.lane.b32.xlu2 %v1156_v20, %s1045_s12  ;;  %v521_v56 = vpop.permute.xlu1 %520 }
 0x143   : > { %v519_v57 = vpop.permute.xlu0 %518  ;;  %v648_v50 = vmax.f32 %v631_v52, %v521_v56 }
 0x144   : > { %v647_v59 = vmax.f32 %v630_v46, %v519_v57  ;;  %v581_v60 = vpop.permute.xlu2 %580 }
 0x146   : > { %v687_v12 = vmax.f32 %v647_v59, %v575_v53 }
 0x148   : > { %763 = vrot.lane.b32.xlu1 %v1358_v28, %s1045_s12 }
 0x149   : > { %761 = vrot.lane.b32.xlu0 %v1162_v22, %s1045_s12 }
 0x14a   : > { %765 = vrot.lane.b32.xlu2 %v1014_v61, %s1045_s12  ;;  %v527_v63 = vpop.permute.xlu1 %526 }
 0x14b   : > { %v525_v1 = vpop.permute.xlu0 %524  ;;  %v651_v2 = vmax.f32 %v634_v42, %v527_v63 }
 0x14c   : > { %v545_v55 = vmax.f32 %v513_v4, %v525_v1  ;;  %v587_v5 = vpop.permute.xlu2 %586 }
 0x14e   : > { %v561_v43 = vmax.f32 %v545_v55, %v1206_v30 }
 0x150   : > { %v1489_v6 = vmax.f32 %v561_v43, %v581_v60  ;;  %785 = vrot.lane.b32.xlu1 %v1139_v15, %s1046_s13 }
 0x151   : > { %783 = vrot.lane.b32.xlu0 %v1135_v13, %s1046_s13 }
 0x152   : > { %787 = vrot.lane.b32.xlu2 %v1142_v16, %s1046_s13  ;;  %v533_v7 = vpop.permute.xlu1 %532 }
 0x153   : > { %v531_v19 = vpop.permute.xlu0 %530  ;;  %v605_v24 = vmax.f32 %v565_v48, %v533_v7 }
 0x154   : > { %v548_v25 = vmax.f32 %v516_v17, %v531_v19  ;;  %v609_v26 = vpop.permute.xlu2 %608 }
 0x155   : > { %v637_v36 = vmax.f32 %v605_v24, %v1014_v61 }
 0x156   : > { %v564_v14 = vmax.f32 %v548_v25, %v1220_v33 }
 0x158   : > { %v1498_v52 = vmax.f32 %v564_v14, %v587_v5  ;;  %791 = vrot.lane.b32.xlu1 %v1156_v20, %s1046_s13 }
 0x159   : > { %789 = vrot.lane.b32.xlu0 %v1159_v21, %s1046_s13 }
 0x15a   : > { %793 = vrot.lane.b32.xlu2 %v1162_v22, %s1046_s13  ;;  %v579_v13 = vpop.permute.xlu1 %578 }
 0x15b   : > { %v577_v15 = vpop.permute.xlu0 %576  ;;  %v689_v16 = vmax.f32 %v1466_v51, %v579_v13 }
 0x15c   : > { %v688_v37 = vmax.f32 %v648_v50, %v577_v15  ;;  %v615_v38 = vpop.permute.xlu2 %614 }
 0x15e   : > { %v1507_v39 = vmax.f32 %v688_v37, %v609_v26 }
 0x160   : > { %797 = vrot.lane.b32.xlu1 %v1014_v61, %s1046_s13 }
 0x161   : > { %795 = vrot.lane.b32.xlu0 %v1358_v28, %s1046_s13 }
 0x162   : > { %839 = vrot.lane.b32.xlu2 %v1152_v18, %s1045_s12  ;;  %v585_v20 = vpop.permute.xlu1 %584 }
 0x163   : > { %v583_v40 = vpop.permute.xlu0 %582  ;;  %v692_v22 = vmax.f32 %v1474_v54, %v585_v20 }
 0x164   : > { %v691_v41 = vmax.f32 %v651_v2, %v583_v40  ;;  %v621_v42 = vpop.permute.xlu2 %620 }
 0x166   : > { %v1515_v62 = vmax.f32 %v691_v41, %v615_v38 }
 0x168   : > { %843 = vrot.lane.b32.xlu1 %v1206_v30, %s1045_s12 }
 0x169   : > { %841 = vrot.lane.b32.xlu0 %v1192_v27, %s1045_s12 }
 0x16a   : > { %845 = vrot.lane.b32.xlu2 %v1203_v29, %s1045_s12  ;;  %v607_v44 = vpop.permute.xlu1 %606 }
 0x16b   : > { %v589_v46 = vpop.permute.xlu0 %588  ;;  %v719_v0 = vmax.f32 %v687_v12, %v607_v44 }
 0x16c   : > { %v654_v47 = vmax.f32 %v637_v36, %v589_v46  ;;  %v668_v48 = vpop.permute.xlu2 %667 }
 0x16e   : > { %v694_v8 = vmax.f32 %v654_v47, %v621_v42 }
 0x170   : > { %v1524_v49 = vmax.f32 %v694_v8, %v1022_v3  ;;  %849 = vrot.lane.b32.xlu1 %v1220_v33, %s1045_s12 }
 0x171   : > { %847 = vrot.lane.b32.xlu0 %v1209_v31, %s1045_s12 }
 0x172   : > { %851 = vrot.lane.b32.xlu2 %v1407_v45, %s1045_s12  ;;  %v613_v4 = vpop.permute.xlu1 %612 }
 0x173   : > { %v611_v32 = vpop.permute.xlu0 %610  ;;  %v633_v23 = vmax.f32 %v1489_v6, %v613_v4 }
 0x174   : > { %v721_v51 = vmax.f32 %v689_v16, %v611_v32  ;;  %v674_v10 = vpop.permute.xlu2 %673 }
 0x175   : > { %v650_v12 = vmax.f32 %v633_v23, %v1095_v9 }
 0x176   : > { %v737_v11 = vmax.f32 %v721_v51, %v668_v48 }
 0x178   : > { %871 = vrot.lane.b32.xlu1 %v1152_v18, %s1046_s13 }
 0x179   : > { %853 = vrot.lane.b32.xlu0 %v1022_v3, %s1045_s12 }
 0x17a   : > { %873 = vrot.lane.b32.xlu2 %v1192_v27, %s1046_s13  ;;  %v619_v58 = vpop.permute.xlu1 %618 }
 0x17b   : > { %v617_v17 = vpop.permute.xlu0 %616  ;;  %v636_v34 = vmax.f32 %v1498_v52, %v619_v58 }
 0x17c   : > { %v724_v53 = vmax.f32 %v692_v22, %v617_v17  ;;  %v696_v54 = vpop.permute.xlu2 %695 }
 0x17d   : > { %v653_v55 = vmax.f32 %v636_v34, %v1291_v35 }
 0x17e   : > { %v740_v56 = vmax.f32 %v724_v53, %v674_v10 }
 0x180   : > { %877 = vrot.lane.b32.xlu1 %v1203_v29, %s1046_s13 }
 0x181   : > { %875 = vrot.lane.b32.xlu0 %v1206_v30, %s1046_s13 }
 0x182   : > { %879 = vrot.lane.b32.xlu2 %v1209_v31, %s1046_s13  ;;  %v666_v18 = vpop.permute.xlu1 %665 }
 0x183   : > { %v664_v57 = vpop.permute.xlu0 %663  ;;  %v736_v27 = vmax.f32 %v1507_v39, %v666_v18 }
 0x184   : > { %v735_v50 = vmax.f32 %v719_v0, %v664_v57  ;;  %v702_v59 = vpop.permute.xlu2 %701 }
 0x186   : > { %v1546_v60 = vmax.f32 %v735_v50, %v696_v54 }
 0x188   : > { %883 = vrot.lane.b32.xlu1 %v1407_v45, %s1046_s13 }
 0x189   : > { %881 = vrot.lane.b32.xlu0 %v1220_v33, %s1046_s13 }
 0x18a   : > { %885 = vrot.lane.b32.xlu2 %v1022_v3, %s1046_s13  ;;  %v672_v30 = vpop.permute.xlu1 %671 }
 0x18b   : > { %v670_v31 = vpop.permute.xlu0 %669  ;;  %v739_v61 = vmax.f32 %v1515_v62, %v672_v30 }
 0x18c   : > { %v690_v63 = vmax.f32 %v650_v12, %v670_v31  ;;  %v708_v1 = vpop.permute.xlu2 %707 }
 0x18e   : > { %v722_v2 = vmax.f32 %v690_v63, %v702_v59 }
 0x192   : > { %v678_v5 = vpop.permute.xlu1 %677 }
 0x193   : > { %v676_v43 = vpop.permute.xlu0 %675  ;;  %v742_v6 = vmax.f32 %v1524_v49, %v678_v5 }
 0x194   : > { %v693_v7 = vmax.f32 %v653_v55, %v676_v43  ;;  %v754_v19 = vpop.permute.xlu2 %753 }
 0x196   : > { %v1557_v33 = vmax.f32 %v693_v7, %v708_v1 }
 0x19a   : > { %v700_v9 = vpop.permute.xlu1 %699 }
 0x19b   : > { %v698_v24 = vpop.permute.xlu0 %697  ;;  %v1559_v25 = vmax.f32 %v737_v11, %v700_v9 }
 0x19c   : > { %v760_v26 = vpop.permute.xlu2 %759  ;;  %v776_v3 = vmax.f32 %v736_v27, %v698_v24  ;;  %v738_v27 = vmax.f32 %v722_v2, %v1159_v21  ;;  %v741_v21 = vmax.f32 %v1557_v33, %v1358_v28 }
 0x19e   : > { %v808_v49 = vmax.f32 %v776_v3, %v754_v19 }
 0x1a2   : > { %v706_v36 = vpop.permute.xlu1 %705 }
 0x1a3   : > { %v704_v14 = vpop.permute.xlu0 %703  ;;  %v1561_v52 = vmax.f32 %v740_v56, %v706_v36 }
 0x1a4   : > { %v766_v13 = vpop.permute.xlu2 %765  ;;  %v779_v51 = vmax.f32 %v739_v61, %v704_v14 }
 0x1a6   : > { %v811_v58 = vmax.f32 %v779_v51, %v760_v26 }
 0x1aa   : > { %v752_v15 = vpop.permute.xlu1 %751 }
 0x1ab   : > { %v710_v35 = vpop.permute.xlu0 %709  ;;  %v807_v56 = vmax.f32 %v1546_v60, %v752_v15 }
 0x1ac   : > { %v788_v16 = vpop.permute.xlu2 %787  ;;  %v782_v18 = vmax.f32 %v742_v6, %v710_v35 }
 0x1ae   : > { %v814_v12 = vmax.f32 %v782_v18, %v766_v13 }
 0x1b2   : > { %v758_v37 = vpop.permute.xlu1 %757 }
 0x1b3   : > { %v756_v38 = vpop.permute.xlu0 %755  ;;  %v778_v30 = vmax.f32 %v738_v27, %v758_v37 }
 0x1b4   : > { %v1563_v39 = vpop.permute.xlu2 %793  ;;  %v809_v60 = vmax.f32 %v1559_v25, %v756_v38 }
 0x1b6   : > { %v825_v19 = vmax.f32 %v809_v60, %v788_v16 }
 0x1ba   : > { %v764_v20 = vpop.permute.xlu1 %763 }
 0x1bb   : > { %v1565_v40 = vpop.permute.xlu0 %761  ;;  %v781_v9 = vmax.f32 %v741_v21, %v764_v20 }
 0x1bc   : > { %v840_v22 = vpop.permute.xlu2 %839  ;;  %v812_v28 = vmax.f32 %v1561_v52, %v1565_v40 }
 0x1be   : > { %v828_v15 = vmax.f32 %v812_v28, %v1563_v39 }
 0x1c2   : > { %v786_v41 = vpop.permute.xlu1 %785 }
 0x1c3   : > { %v784_v42 = vpop.permute.xlu0 %783  ;;  %v824_v4 = vmax.f32 %v808_v49, %v786_v41 }
 0x1c4   : > { %v846_v62 = vpop.permute.xlu2 %845  ;;  %v823_v50 = vmax.f32 %v807_v56, %v784_v42 }
 0x1c6   : > { %v863_v31 = vmax.f32 %v823_v50, %v840_v22 }
 0x1ca   : > { %v792_v44 = vpop.permute.xlu1 %791 }
 0x1cb   : > { %v790_v46 = vpop.permute.xlu0 %789  ;;  %v827_v34 = vmax.f32 %v811_v58, %v792_v44 }
 0x1cc   : > { %v1567_v0 = vpop.permute.xlu2 %851  ;;  %v810_v61 = vmax.f32 %v778_v30, %v790_v46 }
 0x1ce   : > { %v826_v2 = vmax.f32 %v810_v61, %v1203_v29 }
 0x1d0   : > { %v866_v24 = vmax.f32 %v826_v2, %v846_v62 }
 0x1d2   : > { %v798_v47 = vpop.permute.xlu1 %797 }
 0x1d3   : > { %v796_v48 = vpop.permute.xlu0 %795  ;;  %v830_v63 = vmax.f32 %v814_v12, %v798_v47 }
 0x1d4   : > { %v874_v8 = vpop.permute.xlu2 %873  ;;  %v813_v26 = vmax.f32 %v781_v9, %v796_v48 }
 0x1d6   : > { %v829_v13 = vmax.f32 %v813_v26, %v1407_v45 }
 0x1d8   : > { %v869_v35 = vmax.f32 %v829_v13, %v1567_v0 }
 0x1da   : > { %v844_v32 = vpop.permute.xlu1 %843 }
 0x1db   : > { %v842_v23 = vpop.permute.xlu0 %841  ;;  %v865_v36 = vmax.f32 %v825_v19, %v844_v32 }
 0x1dc   : > { %v864_v10 = vmax.f32 %v824_v4, %v842_v23  ;;  %v880_v17 = vpop.permute.xlu2 %879 }
 0x1de   : > { %v896_v11 = vmax.f32 %v864_v10, %v874_v8 }
 0x1e0   : > { %905 = vst.msk [vmem:[%s1573_s17 + $0x8] sm:$0xff] %vm903_vm0, %v896_v11 }
 0x1e2   : > { %v850_v53 = vpop.permute.xlu1 %849 }
 0x1e3   : > { %v848_v54 = vpop.permute.xlu0 %847  ;;  %v868_v16 = vmax.f32 %v828_v15, %v850_v53 }
 0x1e4   : > { %v867_v57 = vmax.f32 %v827_v34, %v848_v54  ;;  %v886_v1 = vpop.permute.xlu2 %885 }
 0x1e6   : > { %v899_v59 = vmax.f32 %v867_v57, %v880_v17 }
 0x1e8   : > { %908 = vst.msk [vmem:[%s1573_s17 + $0x20] sm:$0xff] %vm903_vm0, %v899_v59 }
 0x1ea   : > { %v872_v55 = vpop.permute.xlu1 %871 }
 0x1eb   : > { %v854_v5 = vpop.permute.xlu0 %853  ;;  %v895_v43 = vmax.f32 %v863_v31, %v872_v55 }
 0x1ec   : > { %v870_v6 = vmax.f32 %v830_v63, %v854_v5 }
 0x1ed   : > { %904 = vst.msk [vmem:[%s1573_s17] sm:$0xff] %vm903_vm0, %v895_v43 }
 0x1ee   : > { %v902_v7 = vmax.f32 %v870_v6, %v886_v1 }
 0x1f0   : > { %911 = vst.msk [vmem:[%s1573_s17 + $0x38] sm:$0xff] %vm903_vm0, %v902_v7 }
 0x1f2   : > { %v878_v25 = vpop.permute.xlu1 %877 }
 0x1f3   : > { %v876_v14 = vpop.permute.xlu0 %875  ;;  %v898_v33 = vmax.f32 %v866_v24, %v878_v25 }
 0x1f4   : > { %v897_v29 = vmax.f32 %v865_v36, %v876_v14 }
 0x1f5   : > { %907 = vst.msk [vmem:[%s1573_s17 + $0x18] sm:$0xff] %vm903_vm0, %v898_v33 }
 0x1f6   : > { %906 = vst.msk [vmem:[%s1573_s17 + $0x10] sm:$0xff] %vm903_vm0, %v897_v29 }
 0x1fa   : > { %v884_v37 = vpop.permute.xlu1 %883 }
 0x1fb   : > { %v882_v38 = vpop.permute.xlu0 %881  ;;  %v901_v20 = vmax.f32 %v869_v35, %v884_v37 }
 0x1fc   : > { %v900_v22 = vmax.f32 %v868_v16, %v882_v38 }
 0x1fd   : > { %910 = vst.msk [vmem:[%s1573_s17 + $0x30] sm:$0xff] %vm903_vm0, %v901_v20 }
 0x1fe   : > { %909 = vst.msk [vmem:[%s1573_s17 + $0x28] sm:$0xff] %vm903_vm0, %v900_v22 }
 0x1ff PF: > { %s11_s6 = sadd.s32 1, %s1043_s6  }
 0x200   : > { %p8_p4 = scmp.ge.s32.totalorder %s11_s6, 4  }
 0x202   :  { %10 = sbr.rel (!%p8_p4) target bundleno = 1 (0x1), region = 56 }

// kernel: insert_b_forward.10
= control target key start
LH: loop header
LB: loop body
LE: loop exit
PB: predicated region body
PF: predicated region fallthrough
CT: control target
= control target key end

     0   :  { %s783_s12 = smov 0   ;;  %s1007_s0 = inlined_call_operand.vmem [shape: bf16[2,8,256], index: 0, kind: input, shape index: {}]   ;;  %s1008_s1 = inlined_call_operand.vmem [shape: bf16[1,256,256], index: 1, kind: input, shape index: {}]   ;;  %s1009_s2 = inlined_call_operand.vmem [shape: bf16[2,8,256], index: 2, kind: output, shape index: {0}]   ;;  %s1010_s3 = inlined_call_operand.vmem [shape: f32[2,2,256], index: 3, kind: output, shape index: {1}]  }
   0x1 LB: > { %s570_s13 = sadd.s32 4294967295, %s761_s12   ;;  %p574_p0 = scmp.ge.s32.totalorder %s761_s12, 1  ;;  %s761_s12 = sphi %s783_s12, %s14_s12  }
   0x2   : > { %p140_p1 = scmp.lt.s32.totalorder %s761_s12, 3 }
   0x4   : > { %p141_p2 = pnand %p574_p0, %p140_p1 }
   0x5   : > { %p169_p3 = scmp.lt.s32.totalorder (!%p141_p2), %s570_s13, 1 }
   0x6   : > { %144 = sbr.rel (%p141_p2) target bundleno = 199 (0xc7), region = 28 }
   0xb   : > { %v639_v0 = vld [vmem:[%s1008_s1 + $0x70] sm:$0xf]  ;;  %v730_v1 = vld [vmem:[%s1008_s1 + $0x74] sm:$0xf0]  ;;  %v729_v5 = vld [vmem:[%s1008_s1 + $0x74] sm:$0xf] }
   0xc   : > { %v703_v2 = vld [vmem:[%s1008_s1 + $0xf0] sm:$0xf]  ;;  %v640_v3 = vor.u32 %v730_v1, %v639_v0  ;;  %v746_v4 = vld [vmem:[%s1008_s1 + $0xf4] sm:$0xf0]  ;;  %v641_v6 = vld [vmem:[%s1008_s1 + $0x78] sm:$0xf0] }
   0xd   : > { %v704_v7 = vor.u32 %v746_v4, %v703_v2  ;;  %v644_v8 = vor.u32 %v729_v5, %v641_v6  ;;  %v745_v9 = vld [vmem:[%s1008_s1 + $0xf4] sm:$0xf]  ;;  %v705_v10 = vld [vmem:[%s1008_s1 + $0xf8] sm:$0xf0]  ;;  %v631_v11 = vld [vmem:[%s1008_s1 + $0x60] sm:$0xf] }
   0xe   : > { %384 = vmatpush.bf16.msra.mxu0 %v640_v3  ;;  %v708_v12 = vor.u32 %v745_v9, %v705_v10  ;;  %v728_v13 = vld [vmem:[%s1008_s1 + $0x64] sm:$0xf0]  ;;  %v695_v14 = vld [vmem:[%s1008_s1 + $0xe0] sm:$0xf]  ;;  %v727_v18 = vld [vmem:[%s1008_s1 + $0x64] sm:$0xf] }
   0xf   : > { %v744_v15 = vld [vmem:[%s1008_s1 + $0xe4] sm:$0xf0]  ;;  %397 = vmatpush.bf16.msra.mxu1 %v704_v7  ;;  %410 = vmatpush.bf16.msra.mxu2 %v644_v8  ;;  %v632_v16 = vor.u32 %v728_v13, %v631_v11  ;;  %v633_v19 = vld [vmem:[%s1008_s1 + $0x68] sm:$0xf0]  ;;  %v743_v20 = vld [vmem:[%s1008_s1 + $0xe4] sm:$0xf] }
  0x10   : > { %v696_v17 = vor.u32 %v744_v15, %v695_v14  ;;  %423 = vmatpush.bf16.msra.mxu3 %v708_v12  ;;  %v636_v21 = vor.u32 %v727_v18, %v633_v19  ;;  %v697_v22 = vld [vmem:[%s1008_s1 + $0xe8] sm:$0xf0]  ;;  %v623_v23 = vld [vmem:[%s1008_s1 + $0x50] sm:$0xf]  ;;  %v726_v24 = vld [vmem:[%s1008_s1 + $0x54] sm:$0xf0] }
  0x11   : > { %v700_v25 = vor.u32 %v743_v20, %v697_v22  ;;  %v687_v26 = vld [vmem:[%s1008_s1 + $0xd0] sm:$0xf]  ;;  %v742_v27 = vld [vmem:[%s1008_s1 + $0xd4] sm:$0xf0]  ;;  %v725_v28 = vld [vmem:[%s1008_s1 + $0x54] sm:$0xf]  ;;  %v624_v29 = vor.u32 %v726_v24, %v623_v23 }
  0x12   : > { %385 = vmatpush.bf16.msra.mxu0 %v632_v16  ;;  %v625_v30 = vld [vmem:[%s1008_s1 + $0x58] sm:$0xf0]  ;;  %v741_v31 = vld [vmem:[%s1008_s1 + $0xd4] sm:$0xf]  ;;  %v688_v33 = vor.u32 %v742_v27, %v687_v26  ;;  %v615_v35 = vld [vmem:[%s1008_s1 + $0x40] sm:$0xf] }
  0x13   : > { %v689_v32 = vld [vmem:[%s1008_s1 + $0xd8] sm:$0xf0]  ;;  %398 = vmatpush.bf16.msra.mxu1 %v696_v17  ;;  %411 = vmatpush.bf16.msra.mxu2 %v636_v21  ;;  %v628_v34 = vor.u32 %v725_v28, %v625_v30  ;;  %v724_v36 = vld [vmem:[%s1008_s1 + $0x44] sm:$0xf0]  ;;  %v679_v37 = vld [vmem:[%s1008_s1 + $0xc0] sm:$0xf] }
  0x14   : > { %424 = vmatpush.bf16.msra.mxu3 %v700_v25  ;;  %v692_v38 = vor.u32 %v741_v31, %v689_v32  ;;  %v740_v39 = vld [vmem:[%s1008_s1 + $0xc4] sm:$0xf0]  ;;  %v723_v40 = vld [vmem:[%s1008_s1 + $0x44] sm:$0xf]  ;;  %v617_v41 = vld [vmem:[%s1008_s1 + $0x48] sm:$0xf0]  ;;  %v616_v44 = vor.u32 %v724_v36, %v615_v35 }
  0x15   : > { %v739_v42 = vld [vmem:[%s1008_s1 + $0xc4] sm:$0xf]  ;;  %v681_v43 = vld [vmem:[%s1008_s1 + $0xc8] sm:$0xf0]  ;;  %v680_v45 = vor.u32 %v740_v39, %v679_v37  ;;  %v620_v46 = vor.u32 %v723_v40, %v617_v41  ;;  %v607_v47 = vld [vmem:[%s1008_s1 + $0x30] sm:$0xf] }
  0x16   : > { %386 = vmatpush.bf16.msra.mxu0 %v624_v29  ;;  %v722_v48 = vld [vmem:[%s1008_s1 + $0x34] sm:$0xf0]  ;;  %v671_v49 = vld [vmem:[%s1008_s1 + $0xb0] sm:$0xf]  ;;  %v684_v50 = vor.u32 %v739_v42, %v681_v43  ;;  %v721_v52 = vld [vmem:[%s1008_s1 + $0x34] sm:$0xf] }
  0x17   : > { %399 = vmatpush.bf16.msra.mxu1 %v688_v33  ;;  %412 = vmatpush.bf16.msra.mxu2 %v628_v34  ;;  %v738_v51 = vld [vmem:[%s1008_s1 + $0xb4] sm:$0xf0]  ;;  %v609_v53 = vld [vmem:[%s1008_s1 + $0x38] sm:$0xf0]  ;;  %v737_v54 = vld [vmem:[%s1008_s1 + $0xb4] sm:$0xf]  ;;  %v608_v56 = vor.u32 %v722_v48, %v607_v47 }
  0x18   : > { %425 = vmatpush.bf16.msra.mxu3 %v692_v38  ;;  %v673_v55 = vld [vmem:[%s1008_s1 + $0xb8] sm:$0xf0]  ;;  %v672_v57 = vor.u32 %v738_v51, %v671_v49  ;;  %v612_v58 = vor.u32 %v721_v52, %v609_v53  ;;  %v599_v59 = vld [vmem:[%s1008_s1 + $0x20] sm:$0xf]  ;;  %v720_v60 = vld [vmem:[%s1008_s1 + $0x24] sm:$0xf0] }
  0x19   : > { %v663_v61 = vld [vmem:[%s1008_s1 + $0xa0] sm:$0xf]  ;;  %v676_v62 = vor.u32 %v737_v54, %v673_v55  ;;  %v736_v63 = vld [vmem:[%s1008_s1 + $0xa4] sm:$0xf0]  ;;  %v719_v0 = vld [vmem:[%s1008_s1 + $0x24] sm:$0xf]  ;;  %v600_v4 = vor.u32 %v720_v60, %v599_v59 }
  0x1a   : > { %387 = vmatpush.bf16.msra.mxu0 %v616_v44  ;;  %v601_v1 = vld [vmem:[%s1008_s1 + $0x28] sm:$0xf0]  ;;  %v735_v2 = vld [vmem:[%s1008_s1 + $0xa4] sm:$0xf]  ;;  %v591_v5 = vld [vmem:[%s1008_s1 + $0x10] sm:$0xf]  ;;  %v664_v6 = vor.u32 %v736_v63, %v663_v61 }
  0x1b   : > { %400 = vmatpush.bf16.msra.mxu1 %v680_v45  ;;  %413 = vmatpush.bf16.msra.mxu2 %v620_v46  ;;  %v665_v3 = vld [vmem:[%s1008_s1 + $0xa8] sm:$0xf0]  ;;  %v604_v7 = vor.u32 %v719_v0, %v601_v1  ;;  %v718_v8 = vld [vmem:[%s1008_s1 + $0x14] sm:$0xf0]  ;;  %v655_v9 = vld [vmem:[%s1008_s1 + $0x90] sm:$0xf] }
  0x1c   : > { %426 = vmatpush.bf16.msra.mxu3 %v684_v50  ;;  %v734_v10 = vld [vmem:[%s1008_s1 + $0x94] sm:$0xf0]  ;;  %v668_v11 = vor.u32 %v735_v2, %v665_v3  ;;  %v717_v12 = vld [vmem:[%s1008_s1 + $0x14] sm:$0xf]  ;;  %v593_v13 = vld [vmem:[%s1008_s1 + $0x18] sm:$0xf0]  ;;  %v592_v16 = vor.u32 %v718_v8, %v591_v5  ;;  %v456_v3 = vlaneseq }
  0x1d   : > { %v733_v14 = vld [vmem:[%s1008_s1 + $0x94] sm:$0xf]  ;;  %v657_v15 = vld [vmem:[%s1008_s1 + $0x98] sm:$0xf0]  ;;  %v583_v17 = vld [vmem:[%s1008_s1] sm:$0xf]  ;;  %v656_v18 = vor.u32 %v734_v10, %v655_v9  ;;  %v596_v19 = vor.u32 %v717_v12, %v593_v13 }
  0x1e   : > { %388 = vmatpush.bf16.msra.mxu0 %v608_v56  ;;  %s1012_s13 = smov (!%p169_p3, %s570_s13), 1  ;;  %v716_v20 = vld [vmem:[%s1008_s1 + $0x4] sm:$0xf0]  ;;  %v647_v21 = vld [vmem:[%s1008_s1 + $0x80] sm:$0xf]  ;;  %v660_v23 = vor.u32 %v733_v14, %v657_v15  ;;  %vm453_vm0 = vcmask 1040384  }
  0x1f   : > { %401 = vmatpush.bf16.msra.mxu1 %v672_v57  ;;  %414 = vmatpush.bf16.msra.mxu2 %v612_v58  ;;  %v732_v22 = vld [vmem:[%s1008_s1 + $0x84] sm:$0xf0]  ;;  %v715_v24 = vld [vmem:[%s1008_s1 + $0x4] sm:$0xf]  ;;  %v585_v25 = vld [vmem:[%s1008_s1 + $0x8] sm:$0xf0]  ;;  %v584_v28 = vor.u32 %v716_v20, %v583_v17 }
  0x20   : > { %427 = vmatpush.bf16.msra.mxu3 %v676_v62  ;;  %s712_s11 = sshll.u32 %s1012_s13, 3  ;;  %v731_v26 = vld [vmem:[%s1008_s1 + $0x84] sm:$0xf]  ;;  %v649_v27 = vld [vmem:[%s1008_s1 + $0x88] sm:$0xf0]  ;;  %v648_v30 = vor.u32 %v732_v22, %v647_v21  ;;  %v588_v31 = vor.u32 %v715_v24, %v585_v25  ;;  %s714_s24 = sshll.u32 %s1012_s13, 2 }
  0x21   : > { %s173_s20 = scalar_lea.vmem %s1007_s0, %s712_s11  ;;  %v652_v34 = vor.u32 %v731_v26, %v649_v27  ;;  %s178_s23 = scalar_lea.vmem %s1009_s2, %s712_s11  ;;  %vm458_vm1 = vcmp.lt.s32.totalorder %v456_v3, 256 }
  0x22   : > { %389 = vmatpush.bf16.msra.mxu0 %v600_v4  ;;  %v184_v29 = vld [vmem:[%s173_s20] sm:$0xff]  ;;  %s183_s27 = scalar_lea.vmem %s1010_s3, %s714_s24 }
  0x23   : > { %402 = vmatpush.bf16.msra.mxu1 %v664_v6  ;;  %415 = vmatpush.bf16.msra.mxu2 %v604_v7  ;;  %v218_v32 = vunpack.c.l.b16 %v184_v29  ;;  %v219_v33 = vunpack.c.h.b16 %v184_v29 }
  0x24   : > { %428 = vmatpush.bf16.msra.mxu3 %v668_v11 }
  0x25   : > { %v220_v35 = vpack.c.b16 %v218_v32, %v218_v32  ;;  %v221_v36 = vpack.c.b16 %v219_v33, %v219_v33 }
  0x26   : > { %390 = vmatpush.bf16.msra.mxu0 %v592_v16 }
  0x27   : > { %403 = vmatpush.bf16.msra.mxu1 %v656_v18  ;;  %416 = vmatpush.bf16.msra.mxu2 %v596_v19 }
  0x28   : > { %429 = vmatpush.bf16.msra.mxu3 %v660_v23 }
  0x2a   : > { %391 = vmatpush.bf16.msra.mxu0 %v584_v28 }
  0x2b   : > { %404 = vmatpush.bf16.msra.mxu1 %v648_v30  ;;  %417 = vmatpush.bf16.msra.mxu2 %v588_v31 }
  0x2c   : > { %430 = vmatpush.bf16.msra.mxu3 %v652_v34 }
  0x2d   : > { %392 = vmatmul.bf16.vlgmr.msra.gmra.mxu0 %v220_v35 }
  0x2e   : > { %405 = vmatmul.bf16.vlgmr.msra.gmra.mxu1 %v221_v36  ;;  %418 = vmatmul.bf16.vlgmr.msra.gmra.mxu2 %v220_v35 }
  0x2f   : > { %431 = vmatmul.bf16.vlgmr.msra.gmra.mxu3 %v221_v36 }
  0xaa   : > { %v393_v37 = vpop.f32.mrf.mxu0 }
  0xab   : > { %v406_v38 = vpop.f32.mrf.mxu1 }
  0xac   : > { %v407_v39 = vadd.f32 %v406_v38, %v393_v37 }
  0xae   : > { %v438_v40 = vrot.slane %v407_v39, 4  ;;  %v461_v41 = vmul.f32 %v407_v39, %v407_v39 }
  0xb0   : > { %v463_v42 = vrot.slane %v461_v41, 4  ;;  %v439_v43 = vadd.f32 %v438_v40, %v407_v39 }
  0xb1   : > { %v419_v44 = vpop.f32.mrf.mxu2 }
  0xb2   : > { %v432_v45 = vpop.f32.mrf.mxu3  ;;  %v395_v46 = vpop.f32.mrf.mxu0  ;;  %v464_v47 = vadd.f32 %v463_v42, %v461_v41  ;;  %v440_v50 = vrot.slane %v439_v43, 2 }
  0xb3   : > { %v433_v48 = vadd.f32 %v432_v45, %v419_v44  ;;  %v408_v49 = vpop.f32.mrf.mxu1 }
  0xb4   : > { %v465_v54 = vrot.slane %v464_v47, 2  ;;  %v441_v57 = vadd.f32 %v440_v50, %v439_v43 }
  0xb5   : > { %v436_v51 = vpack.c.bf16 %v433_v48, %v407_v39  ;;  %v444_v52 = vrot.slane %v433_v48, 4  ;;  %v462_v53 = vmul.f32 %v433_v48, %v433_v48 }
  0xb6   : > { %v466_v62 = vadd.f32 %v465_v54, %v464_v47  ;;  %v442_v1 = vrot.slane %v441_v57, 1 }
  0xb7   : > { %437 = vst [vmem:[%s178_s23] sm:$0xff] %v436_v51  ;;  %v445_v55 = vadd.f32 %v444_v52, %v433_v48  ;;  %v469_v56 = vrot.slane %v462_v53, 4 }
  0xb8   : > { %v467_v5 = vrot.slane %v466_v62, 1  ;;  %v443_v8 = vadd.f32 %v442_v1, %v441_v57 }
  0xb9   : > { %v446_v58 = vrot.slane %v445_v55, 2  ;;  %v470_v59 = vadd.f32 %v469_v56, %v462_v53  ;;  %v421_v60 = vpop.f32.mrf.mxu2 }
  0xba   : > { %v434_v61 = vpop.f32.mrf.mxu3  ;;  %v468_v11 = vadd.f32 %v467_v5, %v466_v62 }
  0xbb   : > { %v447_v63 = vadd.f32 %v446_v58, %v445_v55  ;;  %v471_v0 = vrot.slane %v470_v59, 2 }
  0xbd   : > { %v448_v2 = vrot.slane %v447_v63, 1  ;;  %v472_v4 = vadd.f32 %v471_v0, %v470_v59 }
  0xbf   : > { %v449_v6 = vadd.f32 %v448_v2, %v447_v63  ;;  %v473_v7 = vrot.slane %v472_v4, 1 }
  0xc1   : > { %v452_v9 = vrot.slane %v449_v6, 7  ;;  %v474_v10 = vadd.f32 %v473_v7, %v472_v4 }
  0xc3   : > { %v454_v12 = vsel %vm453_vm0, %v443_v8, %v452_v9  ;;  %v477_v13 = vrot.slane %v474_v10, 7 }
  0xc4   : > { %460 = vst.msk [vmem:[%s183_s27] ss:$2 sm:$0x3] %vm458_vm1, %v454_v12 }
  0xc5   : > { %v478_v14 = vsel %vm453_vm0, %v468_v11, %v477_v13 }
  0xc6   : > { %709 = vst.msk [vmem:[%s183_s27 + $0x1] ss:$2 sm:$0x3] %vm458_vm1, %v478_v14 }
  0xc7 PF: > { %s14_s12 = sadd.s32 1, %s761_s12  }
  0xc8   : > { %p11_p4 = scmp.ge.s32.totalorder %s14_s12, 4  }
  0xca   :  { %13 = sbr.rel (!%p11_p4) target bundleno = 1 (0x1), region = 71 }

// kernel: tile.78
= control target key start
LH: loop header
LB: loop body
LE: loop exit
PB: predicated region body
PF: predicated region fallthrough
CT: control target
= control target key end

     0   :  { %s64_s0 = inlined_call_operand.vmem [shape: f32[4], index: 0, kind: input, shape index: {}]   ;;  %s65_s1 = inlined_call_operand.vmem [shape: f32[64,4], index: 1, kind: output, shape index: {}]  }
   0x1   :  { %v4_v0 = vld [vmem:[%s64_s0] ss:$0 sm:$0xff] }
   0x2   :  { %5 = vst [vmem:[%s65_s1] sm:$0xff] %v4_v0 }
   0x3   :  { %20 = vst [vmem:[%s65_s1 + $0x8] sm:$0xff] %v4_v0 }
   0x4   :  { %21 = vst [vmem:[%s65_s1 + $0x10] sm:$0xff] %v4_v0 }
   0x5   :  { %22 = vst [vmem:[%s65_s1 + $0x18] sm:$0xff] %v4_v0 }
   0x6   :  { %23 = vst [vmem:[%s65_s1 + $0x20] sm:$0xff] %v4_v0 }
   0x7   :  { %24 = vst [vmem:[%s65_s1 + $0x28] sm:$0xff] %v4_v0 }
   0x8   :  { %25 = vst [vmem:[%s65_s1 + $0x30] sm:$0xff] %v4_v0 }
   0x9   :  { %26 = vst [vmem:[%s65_s1 + $0x38] sm:$0xff] %v4_v0 }

// kernel: tile.79
= control target key start
LH: loop header
LB: loop body
LE: loop exit
PB: predicated region body
PF: predicated region fallthrough
CT: control target
= control target key end

     0   :  { %vm5_vm0 = vcmask 1041409   ;;  %s426_s14 = smov 124   ;;  %s427_s15 = smov 116   ;;  %vm7_vm1 = vcmask 31744   ;;  %vm17_vm2 = vcmask 1048544   ;;  %vm27_vm3 = vcmask 1015744   ;;  %s697_s0 = inlined_call_operand.vmem [shape: f32[64,4], index: 0, kind: input, shape index: {}]   ;;  %s698_s1 = inlined_call_operand.vmem [shape: f32[1,256], index: 1, kind: output, shape index: {}]  }
   0x1   :  { %v332_v0 = vld [vmem:[%s697_s0 + $0x1f] sm:$0x1]   ;;  %v336_v3 = vld [vmem:[%s697_s0 + $0x1d] sm:$0x1]   ;;  %v334_v6 = vld [vmem:[%s697_s0 + $0x1e] sm:$0x1]  }
   0x2   :  { %v333_v1 = vld [vmem:[%s697_s0 + $0x3e] sm:$0x2]   ;;  %v337_v4 = vld [vmem:[%s697_s0 + $0x3c] sm:$0x2]   ;;  %v335_v7 = vld [vmem:[%s697_s0 + $0x3d] sm:$0x2]  }
   0x3   :  { %v14_v2 = vsel %vm5_vm0, %v333_v1, %v332_v0  ;;  %v34_v5 = vsel %vm5_vm0, %v337_v4, %v336_v3  ;;  %v338_v8 = vld [vmem:[%s697_s0 + $0x1c] sm:$0x1]   ;;  %v24_v10 = vsel %vm5_vm0, %v335_v7, %v334_v6  ;;  %v340_v11 = vld [vmem:[%s697_s0 + $0x1b] sm:$0x1]   ;;  %s428_s28 = smov 108   ;;  %s429_s29 = smov 120  }
   0x4   :  { %15 = vrot.lane.b32.xlu0 %v14_v2, %s426_s14  ;;  %35 = vrot.lane.b32.xlu1 %v34_v5, %s427_s15  ;;  %v339_v9 = vld [vmem:[%s697_s0 + $0x3b] sm:$0x2]   ;;  %v341_v12 = vld [vmem:[%s697_s0 + $0x3a] sm:$0x2]   ;;  %s430_s30 = smov 112   ;;  %s431_s14 = smov 104  }
   0x5   :  { %v44_v13 = vsel %vm5_vm0, %v339_v9, %v338_v8  ;;  %v54_v14 = vsel %vm5_vm0, %v341_v12, %v340_v11  ;;  %v342_v15 = vld [vmem:[%s697_s0 + $0x1a] sm:$0x1]   ;;  %v344_v17 = vld [vmem:[%s697_s0 + $0x19] sm:$0x1]   ;;  %v346_v19 = vld [vmem:[%s697_s0 + $0x18] sm:$0x1]  }
   0x6   :  { %55 = vrot.lane.b32.xlu2 %v54_v14, %s428_s28  ;;  %v343_v16 = vld [vmem:[%s697_s0 + $0x39] sm:$0x2]   ;;  %v345_v18 = vld [vmem:[%s697_s0 + $0x38] sm:$0x2]   ;;  %v347_v20 = vld [vmem:[%s697_s0 + $0x37] sm:$0x2]  }
   0x7   :  { %v64_v21 = vsel %vm5_vm0, %v343_v16, %v342_v15  ;;  %v74_v22 = vsel %vm5_vm0, %v345_v18, %v344_v17  ;;  %v84_v23 = vsel %vm5_vm0, %v347_v20, %v346_v19  ;;  %s432_s15 = smov 100   ;;  %s433_s16 = smov 96   ;;  %v348_v24 = vld [vmem:[%s697_s0 + $0x17] sm:$0x1]   ;;  %v350_v26 = vld [vmem:[%s697_s0 + $0x16] sm:$0x1]  }
   0x8   :  { %v349_v25 = vld [vmem:[%s697_s0 + $0x36] sm:$0x2]   ;;  %v351_v27 = vld [vmem:[%s697_s0 + $0x35] sm:$0x2]   ;;  %v352_v28 = vld [vmem:[%s697_s0 + $0x15] sm:$0x1]  }
   0x9   :  { %v353_v29 = vld [vmem:[%s697_s0 + $0x34] sm:$0x2]   ;;  %v94_v30 = vsel %vm5_vm0, %v349_v25, %v348_v24  ;;  %v104_v31 = vsel %vm5_vm0, %v351_v27, %v350_v26  ;;  %s436_s2 = smov 84   ;;  %v354_v33 = vld [vmem:[%s697_s0 + $0x14] sm:$0x1]   ;;  %s439_s17 = smov 72  }
   0xa   :  { %v114_v32 = vsel %vm5_vm0, %v353_v29, %v352_v28  ;;  %v355_v34 = vld [vmem:[%s697_s0 + $0x33] sm:$0x2]   ;;  %v356_v35 = vld [vmem:[%s697_s0 + $0x13] sm:$0x1]   ;;  %v358_v37 = vld [vmem:[%s697_s0 + $0x12] sm:$0x1]  }
   0xb   :  { %v357_v36 = vld [vmem:[%s697_s0 + $0x32] sm:$0x2]   ;;  %v359_v38 = vld [vmem:[%s697_s0 + $0x31] sm:$0x2]   ;;  %v124_v39 = vsel %vm5_vm0, %v355_v34, %v354_v33  ;;  %v360_v42 = vld [vmem:[%s697_s0 + $0x11] sm:$0x1]  }
   0xc   :  { %25 = vrot.lane.b32.xlu0 %v24_v10, %s429_s29  ;;  %45 = vrot.lane.b32.xlu1 %v44_v13, %s430_s30  ;;  %s434_s29 = smov 92   ;;  %s435_s30 = smov 88   ;;  %v134_v40 = vsel %vm5_vm0, %v357_v36, %v356_v35  ;;  %v144_v41 = vsel %vm5_vm0, %v359_v38, %v358_v37  ;;  %v361_v43 = vld [vmem:[%s697_s0 + $0x30] sm:$0x2]   ;;  %v362_v44 = vld [vmem:[%s697_s0 + $0x10] sm:$0x1]  }
   0xd   :  { %v363_v45 = vld [vmem:[%s697_s0 + $0x2f] sm:$0x2]   ;;  %v364_v46 = vld [vmem:[%s697_s0 + $0xf] sm:$0x1]   ;;  %v154_v48 = vsel %vm5_vm0, %v361_v43, %v360_v42  ;;  %s442_s3 = smov 60   ;;  %s445_s18 = smov 48  }
   0xe   :  { %65 = vrot.lane.b32.xlu2 %v64_v21, %s431_s14  ;;  %v365_v47 = vld [vmem:[%s697_s0 + $0x2e] sm:$0x2]   ;;  %v164_v49 = vsel %vm5_vm0, %v363_v45, %v362_v44  ;;  %v366_v51 = vld [vmem:[%s697_s0 + $0xe] sm:$0x1]   ;;  %v368_v53 = vld [vmem:[%s697_s0 + $0xd] sm:$0x1]  }
   0xf   :  { %v174_v50 = vsel %vm5_vm0, %v365_v47, %v364_v46  ;;  %v367_v52 = vld [vmem:[%s697_s0 + $0x2d] sm:$0x2]   ;;  %v369_v54 = vld [vmem:[%s697_s0 + $0x2c] sm:$0x2]   ;;  %v370_v55 = vld [vmem:[%s697_s0 + $0xc] sm:$0x1]  }
  0x10   :  { %v371_v56 = vld [vmem:[%s697_s0 + $0x2b] sm:$0x2]   ;;  %v184_v57 = vsel %vm5_vm0, %v367_v52, %v366_v51  ;;  %v194_v58 = vsel %vm5_vm0, %v369_v54, %v368_v53  ;;  %v372_v60 = vld [vmem:[%s697_s0 + $0xb] sm:$0x1]   ;;  %v374_v62 = vld [vmem:[%s697_s0 + $0xa] sm:$0x1]  }
  0x11   :  { %v204_v59 = vsel %vm5_vm0, %v371_v56, %v370_v55  ;;  %v373_v61 = vld [vmem:[%s697_s0 + $0x2a] sm:$0x2]   ;;  %v375_v63 = vld [vmem:[%s697_s0 + $0x29] sm:$0x2]   ;;  %v376_v0 = vld [vmem:[%s697_s0 + $0x9] sm:$0x1]  }
  0x12   :  { %v377_v1 = vld [vmem:[%s697_s0 + $0x28] sm:$0x2]   ;;  %v214_v2 = vsel %vm5_vm0, %v373_v61, %v372_v60  ;;  %v224_v3 = vsel %vm5_vm0, %v375_v63, %v374_v62  ;;  %s448_s4 = smov 36   ;;  %v378_v5 = vld [vmem:[%s697_s0 + $0x8] sm:$0x1]   ;;  %s451_s19 = smov 24  }
  0x13   :  { %v234_v4 = vsel %vm5_vm0, %v377_v1, %v376_v0  ;;  %v379_v6 = vld [vmem:[%s697_s0 + $0x27] sm:$0x2]   ;;  %v380_v7 = vld [vmem:[%s697_s0 + $0x7] sm:$0x1]   ;;  %v382_v9 = vld [vmem:[%s697_s0 + $0x6] sm:$0x1]  }
  0x14   :  { %75 = vrot.lane.b32.xlu0 %v74_v22, %s432_s15  ;;  %85 = vrot.lane.b32.xlu1 %v84_v23, %s433_s16  ;;  %s437_s15 = smov 80   ;;  %s438_s16 = smov 76   ;;  %v381_v8 = vld [vmem:[%s697_s0 + $0x26] sm:$0x2]   ;;  %v383_v10 = vld [vmem:[%s697_s0 + $0x25] sm:$0x2]   ;;  %v244_v11 = vsel %vm5_vm0, %v379_v6, %v378_v5 }
  0x15   :  { %v254_v12 = vsel %vm5_vm0, %v381_v8, %v380_v7  ;;  %v264_v13 = vsel %vm5_vm0, %v383_v10, %v382_v9  ;;  %v384_v14 = vld [vmem:[%s697_s0 + $0x5] sm:$0x1]   ;;  %v386_v16 = vld [vmem:[%s697_s0 + $0x4] sm:$0x1]   ;;  %v388_v18 = vld [vmem:[%s697_s0 + $0x3] sm:$0x1]  }
  0x16   :  { %95 = vrot.lane.b32.xlu2 %v94_v30, %s434_s29  ;;  %v385_v15 = vld [vmem:[%s697_s0 + $0x24] sm:$0x2]   ;;  %v387_v17 = vld [vmem:[%s697_s0 + $0x23] sm:$0x2]   ;;  %v389_v19 = vld [vmem:[%s697_s0 + $0x22] sm:$0x2]  }
  0x17   :  { %v274_v20 = vsel %vm5_vm0, %v385_v15, %v384_v14  ;;  %v284_v21 = vsel %vm5_vm0, %v387_v17, %v386_v16  ;;  %v294_v22 = vsel %vm5_vm0, %v389_v19, %v388_v18  ;;  %s454_s5 = smov 12   ;;  %v390_v23 = vld [vmem:[%s697_s0 + $0x2] sm:$0x1]   ;;  %v392_v25 = vld [vmem:[%s697_s0 + $0x1] sm:$0x1]   ;;  %s455_s14 = smov 8  }
  0x18   :  { %v391_v24 = vld [vmem:[%s697_s0 + $0x21] sm:$0x2]   ;;  %v393_v26 = vld [vmem:[%s697_s0 + $0x20] sm:$0x2]   ;;  %v2_v29 = vld [vmem:[%s697_s0] sm:$0x1]  }
  0x19   :  { %v304_v27 = vsel %vm5_vm0, %v391_v24, %v390_v23  ;;  %v314_v28 = vsel %vm5_vm0, %v393_v26, %v392_v25  ;;  %v331_v30 = vld [vmem:[%s697_s0 + $0x1f] sm:$0x2]   ;;  %vm37_vm4 = vcmask 982944   ;;  %vm47_vm5 = vcmask 950144  }
  0x1a   :  { %vm57_vm6 = vcmask 917344   ;;  %vm67_vm7 = vcmask 884544   ;;  %vm77_vm8 = vcmask 851744   ;;  %vm87_vm9 = vcmask 818944  }
  0x1b   :  { %vm97_vm10 = vcmask 786144   ;;  %vm107_vm11 = vcmask 753344   ;;  %vm117_vm12 = vcmask 720544   ;;  %vm127_vm13 = vcmask 687744  }
  0x1c   :  { %105 = vrot.lane.b32.xlu0 %v104_v31, %s435_s30  ;;  %115 = vrot.lane.b32.xlu1 %v114_v32, %s436_s2  ;;  %s440_s30 = smov 68   ;;  %s441_s2 = smov 64   ;;  %v6_v31 = vsel %vm5_vm0, %v331_v30, %v2_v29  ;;  %vm137_vm14 = vcmask 654944   ;;  %vm147_vm15 = vcmask 622144   ;;  %vm157_vm0 = vcmask 589344  }
  0x1d   :  { %8 = vst.msk [vmem:[#allocation0] ss:$8 sm:$0x3] %vm7_vm1, %v6_v31   ;;  %vm167_vm1 = vcmask 556544  }
  0x1e   :  { %125 = vrot.lane.b32.xlu2 %v124_v39, %s437_s15  ;;  %s456_s15 = smov 4  }
  0x24   :  { %135 = vrot.lane.b32.xlu0 %v134_v40, %s438_s16  ;;  %145 = vrot.lane.b32.xlu1 %v144_v41, %s439_s17  ;;  %s443_s16 = smov 56   ;;  %s444_s17 = smov 52  }
  0x26   :  { %155 = vrot.lane.b32.xlu2 %v154_v48, %s440_s30 }
  0x2c   :  { %165 = vrot.lane.b32.xlu0 %v164_v49, %s441_s2  ;;  %175 = vrot.lane.b32.xlu1 %v174_v50, %s442_s3  ;;  %s446_s2 = smov 44   ;;  %s447_s3 = smov 40  }
  0x2e   :  { %185 = vrot.lane.b32.xlu2 %v184_v57, %s443_s16 }
  0x34   :  { %195 = vrot.lane.b32.xlu0 %v194_v58, %s444_s17  ;;  %205 = vrot.lane.b32.xlu1 %v204_v59, %s445_s18  ;;  %s449_s17 = smov 32   ;;  %s450_s18 = smov 28  }
  0x36   :  { %215 = vrot.lane.b32.xlu2 %v214_v2, %s446_s2 }
  0x3c   :  { %225 = vrot.lane.b32.xlu0 %v224_v3, %s447_s3  ;;  %235 = vrot.lane.b32.xlu1 %v234_v4, %s448_s4  ;;  %s452_s3 = smov 20   ;;  %s453_s4 = smov 16  }
  0x3e   :  { %245 = vrot.lane.b32.xlu2 %v244_v11, %s449_s17 }
  0x44   :  { %255 = vrot.lane.b32.xlu0 %v254_v12, %s450_s18  ;;  %265 = vrot.lane.b32.xlu1 %v264_v13, %s451_s19 }
  0x46   :  { %275 = vrot.lane.b32.xlu2 %v274_v20, %s452_s3 }
  0x4c   :  { %285 = vrot.lane.b32.xlu0 %v284_v21, %s453_s4  ;;  %295 = vrot.lane.b32.xlu1 %v294_v22, %s454_s5 }
  0x4e   :  { %305 = vrot.lane.b32.xlu2 %v304_v27, %s455_s14 }
  0x54   :  { %315 = vrot.lane.b32.xlu0 %v314_v28, %s456_s15 }
  0x60   :  { %v56_v32 = vpop.permute.xlu2 %55  }
  0x68   :  { %v66_v33 = vpop.permute.xlu2 %65  }
  0x70   :  { %v96_v34 = vpop.permute.xlu2 %95  }
  0x76   :  { %v16_v35 = vpop.permute.xlu0 %15   ;;  %v36_v36 = vpop.permute.xlu1 %35  }
  0x77   :  { %18 = vst.msk [vmem:[#allocation0] ss:$8 sm:$0x3] %vm17_vm2, %v16_v35   ;;  %vm177_vm2 = vcmask 523744  }
  0x78   :  { %v126_v37 = vpop.permute.xlu2 %125  }
  0x7e   :  { %v26_v38 = vpop.permute.xlu0 %25   ;;  %v46_v39 = vpop.permute.xlu1 %45  }
  0x7f   :  { %28 = vst.msk [vmem:[#allocation0] ss:$8 sm:$0x3] %vm27_vm3, %v26_v38   ;;  %vm187_vm3 = vcmask 490944  }
  0x80   :  { %38 = vst.msk [vmem:[#allocation0] ss:$8 sm:$0x3] %vm37_vm4, %v36_v36   ;;  %v156_v40 = vpop.permute.xlu2 %155   ;;  %vm197_vm4 = vcmask 458144  }
  0x81   :  { %48 = vst.msk [vmem:[#allocation0] ss:$8 sm:$0x3] %vm47_vm5, %v46_v39   ;;  %vm207_vm5 = vcmask 425344  }
  0x82   :  { %58 = vst.msk [vmem:[#allocation0] ss:$8 sm:$0x3] %vm57_vm6, %v56_v32   ;;  %vm217_vm6 = vcmask 392544  }
  0x83   :  { %68 = vst.msk [vmem:[#allocation0] ss:$8 sm:$0x3] %vm67_vm7, %v66_v33   ;;  %vm227_vm7 = vcmask 359744  }
  0x86   :  { %v76_v41 = vpop.permute.xlu0 %75   ;;  %v86_v42 = vpop.permute.xlu1 %85  }
  0x87   :  { %78 = vst.msk [vmem:[#allocation0] ss:$8 sm:$0x3] %vm77_vm8, %v76_v41   ;;  %vm237_vm8 = vcmask 326944  }
  0x88   :  { %88 = vst.msk [vmem:[#allocation0] ss:$8 sm:$0x3] %vm87_vm9, %v86_v42   ;;  %v186_v43 = vpop.permute.xlu2 %185   ;;  %vm247_vm9 = vcmask 294144  }
  0x89   :  { %98 = vst.msk [vmem:[#allocation0] ss:$8 sm:$0x3] %vm97_vm10, %v96_v34   ;;  %vm257_vm10 = vcmask 261344  }
  0x8e   :  { %v106_v44 = vpop.permute.xlu0 %105   ;;  %v116_v45 = vpop.permute.xlu1 %115  }
  0x8f   :  { %108 = vst.msk [vmem:[#allocation0] ss:$8 sm:$0x3] %vm107_vm11, %v106_v44   ;;  %vm267_vm11 = vcmask 228544  }
  0x90   :  { %118 = vst.msk [vmem:[#allocation0] ss:$8 sm:$0x3] %vm117_vm12, %v116_v45   ;;  %v216_v46 = vpop.permute.xlu2 %215   ;;  %vm277_vm12 = vcmask 195744  }
  0x91   :  { %128 = vst.msk [vmem:[#allocation0] ss:$8 sm:$0x3] %vm127_vm13, %v126_v37   ;;  %vm287_vm13 = vcmask 162944  }
  0x96   :  { %v136_v47 = vpop.permute.xlu0 %135   ;;  %v146_v48 = vpop.permute.xlu1 %145  }
  0x97   :  { %138 = vst.msk [vmem:[#allocation0] ss:$8 sm:$0x3] %vm137_vm14, %v136_v47   ;;  %vm297_vm14 = vcmask 130144  }
  0x98   :  { %148 = vst.msk [vmem:[#allocation0] ss:$8 sm:$0x3] %vm147_vm15, %v146_v48   ;;  %v246_v49 = vpop.permute.xlu2 %245   ;;  %vm307_vm15 = vcmask 97344  }
  0x99   :  { %158 = vst.msk [vmem:[#allocation0] ss:$8 sm:$0x3] %vm157_vm0, %v156_v40   ;;  %vm317_vm0 = vcmask 64544  }
  0x9e   :  { %v166_v50 = vpop.permute.xlu0 %165   ;;  %v176_v51 = vpop.permute.xlu1 %175  }
  0x9f   :  { %168 = vst.msk [vmem:[#allocation0] ss:$8 sm:$0x3] %vm167_vm1, %v166_v50  }
  0xa0   :  { %178 = vst.msk [vmem:[#allocation0] ss:$8 sm:$0x3] %vm177_vm2, %v176_v51   ;;  %v276_v52 = vpop.permute.xlu2 %275  }
  0xa1   :  { %188 = vst.msk [vmem:[#allocation0] ss:$8 sm:$0x3] %vm187_vm3, %v186_v43  }
  0xa6   :  { %v196_v53 = vpop.permute.xlu0 %195   ;;  %v206_v54 = vpop.permute.xlu1 %205  }
  0xa7   :  { %198 = vst.msk [vmem:[#allocation0] ss:$8 sm:$0x3] %vm197_vm4, %v196_v53  }
  0xa8   :  { %208 = vst.msk [vmem:[#allocation0] ss:$8 sm:$0x3] %vm207_vm5, %v206_v54   ;;  %v306_v55 = vpop.permute.xlu2 %305  }
  0xa9   :  { %218 = vst.msk [vmem:[#allocation0] ss:$8 sm:$0x3] %vm217_vm6, %v216_v46  }
  0xae   :  { %v226_v56 = vpop.permute.xlu0 %225   ;;  %v236_v57 = vpop.permute.xlu1 %235  }
  0xaf   :  { %228 = vst.msk [vmem:[#allocation0] ss:$8 sm:$0x3] %vm227_vm7, %v226_v56  }
  0xb0   :  { %238 = vst.msk [vmem:[#allocation0] ss:$8 sm:$0x3] %vm237_vm8, %v236_v57  }
  0xb1   :  { %248 = vst.msk [vmem:[#allocation0] ss:$8 sm:$0x3] %vm247_vm9, %v246_v49  }
  0xb6   :  { %v256_v58 = vpop.permute.xlu0 %255   ;;  %v266_v59 = vpop.permute.xlu1 %265  }
  0xb7   :  { %258 = vst.msk [vmem:[#allocation0] ss:$8 sm:$0x3] %vm257_vm10, %v256_v58  }
  0xb8   :  { %268 = vst.msk [vmem:[#allocation0] ss:$8 sm:$0x3] %vm267_vm11, %v266_v59  }
  0xb9   :  { %278 = vst.msk [vmem:[#allocation0] ss:$8 sm:$0x3] %vm277_vm12, %v276_v52  }
  0xbe   :  { %v286_v60 = vpop.permute.xlu0 %285   ;;  %v296_v61 = vpop.permute.xlu1 %295  }
  0xbf   :  { %288 = vst.msk [vmem:[#allocation0] ss:$8 sm:$0x3] %vm287_vm13, %v286_v60  }
  0xc0   :  { %298 = vst.msk [vmem:[#allocation0] ss:$8 sm:$0x3] %vm297_vm14, %v296_v61  }
  0xc1   :  { %308 = vst.msk [vmem:[#allocation0] ss:$8 sm:$0x3] %vm307_vm15, %v306_v55  }
  0xc6   :  { %v316_v62 = vpop.permute.xlu0 %315  }
  0xc7   :  { %318 = vst.msk [vmem:[#allocation0] ss:$8 sm:$0x3] %vm317_vm0, %v316_v62  }
  0xce   :  { %v321_v63 = vld [vmem:[#allocation0] sm:$0x1]  ;;  %v326_v0 = vld [vmem:[#allocation0 + $0x8] sm:$0x1] }
  0xcf   :  { %324 = vst [vmem:[%s698_s1] sm:$0x1] %v321_v63 }
  0xd0   :  { %394 = vst [vmem:[%s698_s1 + $0x1] sm:$0x1] %v326_v0 }

// kernel: insert_b_forward.14
= control target key start
LH: loop header
LB: loop body
LE: loop exit
PB: predicated region body
PF: predicated region fallthrough
CT: control target
= control target key end

     0   :  { %s866_s18 = smov 0   ;;  %s1096_s0 = inlined_call_operand.vmem [shape: bf16[2,8,256], index: 0, kind: input, shape index: {}]   ;;  %s1097_s1 = inlined_call_operand.vmem [shape: f32[1,256], index: 1, kind: input, shape index: {}]   ;;  %s1098_s2 = inlined_call_operand.vmem [shape: f32[1,256], index: 2, kind: input, shape index: {}]   ;;  %s1099_s3 = inlined_call_operand.vmem [shape: bf16[1,256,256], index: 3, kind: input, shape index: {}]   ;;  %s1100_s4 = inlined_call_operand.vmem [shape: bf16[2,8,256], index: 4, kind: output, shape index: {0}]   ;;  %s1101_s5 = inlined_call_operand.vmem [shape: f32[2,2,256], index: 5, kind: output, shape index: {1}]  }
   0x1 LB: > { %s643_s19 = sadd.s32 4294967295, %s834_s18   ;;  %p647_p0 = scmp.ge.s32.totalorder %s834_s18, 1  ;;  %s834_s18 = sphi %s866_s18, %s16_s18  }
   0x2   : > { %p190_p1 = scmp.lt.s32.totalorder %s834_s18, 3 }
   0x4   : > { %p191_p2 = pnand %p647_p0, %p190_p1 }
   0x5   : > { %p223_p3 = scmp.lt.s32.totalorder (!%p191_p2), %s643_s19, 1 }
   0x6   : > { %194 = sbr.rel (%p191_p2) target bundleno = 199 (0xc7), region = 36 }
   0xb   : > { %v712_v0 = vld [vmem:[%s1099_s3 + $0x70] sm:$0xf]  ;;  %v803_v1 = vld [vmem:[%s1099_s3 + $0x74] sm:$0xf0]  ;;  %v802_v5 = vld [vmem:[%s1099_s3 + $0x74] sm:$0xf] }
   0xc   : > { %v776_v2 = vld [vmem:[%s1099_s3 + $0xf0] sm:$0xf]  ;;  %v713_v3 = vor.u32 %v803_v1, %v712_v0  ;;  %v819_v4 = vld [vmem:[%s1099_s3 + $0xf4] sm:$0xf0]  ;;  %v714_v6 = vld [vmem:[%s1099_s3 + $0x78] sm:$0xf0] }
   0xd   : > { %v777_v7 = vor.u32 %v819_v4, %v776_v2  ;;  %v717_v8 = vor.u32 %v802_v5, %v714_v6  ;;  %v818_v9 = vld [vmem:[%s1099_s3 + $0xf4] sm:$0xf]  ;;  %v778_v10 = vld [vmem:[%s1099_s3 + $0xf8] sm:$0xf0]  ;;  %v704_v11 = vld [vmem:[%s1099_s3 + $0x60] sm:$0xf] }
   0xe   : > { %457 = vmatpush.bf16.msra.mxu0 %v713_v3  ;;  %v781_v12 = vor.u32 %v818_v9, %v778_v10  ;;  %v801_v13 = vld [vmem:[%s1099_s3 + $0x64] sm:$0xf0]  ;;  %v768_v14 = vld [vmem:[%s1099_s3 + $0xe0] sm:$0xf]  ;;  %v800_v18 = vld [vmem:[%s1099_s3 + $0x64] sm:$0xf] }
   0xf   : > { %v817_v15 = vld [vmem:[%s1099_s3 + $0xe4] sm:$0xf0]  ;;  %470 = vmatpush.bf16.msra.mxu1 %v777_v7  ;;  %483 = vmatpush.bf16.msra.mxu2 %v717_v8  ;;  %v705_v16 = vor.u32 %v801_v13, %v704_v11  ;;  %v706_v19 = vld [vmem:[%s1099_s3 + $0x68] sm:$0xf0]  ;;  %v816_v20 = vld [vmem:[%s1099_s3 + $0xe4] sm:$0xf] }
  0x10   : > { %v769_v17 = vor.u32 %v817_v15, %v768_v14  ;;  %496 = vmatpush.bf16.msra.mxu3 %v781_v12  ;;  %v709_v21 = vor.u32 %v800_v18, %v706_v19  ;;  %v770_v22 = vld [vmem:[%s1099_s3 + $0xe8] sm:$0xf0]  ;;  %v696_v23 = vld [vmem:[%s1099_s3 + $0x50] sm:$0xf]  ;;  %v799_v24 = vld [vmem:[%s1099_s3 + $0x54] sm:$0xf0] }
  0x11   : > { %v773_v25 = vor.u32 %v816_v20, %v770_v22  ;;  %v760_v26 = vld [vmem:[%s1099_s3 + $0xd0] sm:$0xf]  ;;  %v815_v27 = vld [vmem:[%s1099_s3 + $0xd4] sm:$0xf0]  ;;  %v798_v28 = vld [vmem:[%s1099_s3 + $0x54] sm:$0xf]  ;;  %v697_v29 = vor.u32 %v799_v24, %v696_v23 }
  0x12   : > { %458 = vmatpush.bf16.msra.mxu0 %v705_v16  ;;  %v698_v30 = vld [vmem:[%s1099_s3 + $0x58] sm:$0xf0]  ;;  %v814_v31 = vld [vmem:[%s1099_s3 + $0xd4] sm:$0xf]  ;;  %v761_v33 = vor.u32 %v815_v27, %v760_v26  ;;  %v688_v35 = vld [vmem:[%s1099_s3 + $0x40] sm:$0xf] }
  0x13   : > { %v762_v32 = vld [vmem:[%s1099_s3 + $0xd8] sm:$0xf0]  ;;  %471 = vmatpush.bf16.msra.mxu1 %v769_v17  ;;  %484 = vmatpush.bf16.msra.mxu2 %v709_v21  ;;  %v701_v34 = vor.u32 %v798_v28, %v698_v30  ;;  %v797_v36 = vld [vmem:[%s1099_s3 + $0x44] sm:$0xf0]  ;;  %v752_v37 = vld [vmem:[%s1099_s3 + $0xc0] sm:$0xf] }
  0x14   : > { %497 = vmatpush.bf16.msra.mxu3 %v773_v25  ;;  %v765_v38 = vor.u32 %v814_v31, %v762_v32  ;;  %v813_v39 = vld [vmem:[%s1099_s3 + $0xc4] sm:$0xf0]  ;;  %v796_v40 = vld [vmem:[%s1099_s3 + $0x44] sm:$0xf]  ;;  %v690_v41 = vld [vmem:[%s1099_s3 + $0x48] sm:$0xf0]  ;;  %v689_v44 = vor.u32 %v797_v36, %v688_v35 }
  0x15   : > { %v812_v42 = vld [vmem:[%s1099_s3 + $0xc4] sm:$0xf]  ;;  %v754_v43 = vld [vmem:[%s1099_s3 + $0xc8] sm:$0xf0]  ;;  %v753_v45 = vor.u32 %v813_v39, %v752_v37  ;;  %v693_v46 = vor.u32 %v796_v40, %v690_v41  ;;  %v680_v47 = vld [vmem:[%s1099_s3 + $0x30] sm:$0xf] }
  0x16   : > { %459 = vmatpush.bf16.msra.mxu0 %v697_v29  ;;  %v795_v48 = vld [vmem:[%s1099_s3 + $0x34] sm:$0xf0]  ;;  %v744_v49 = vld [vmem:[%s1099_s3 + $0xb0] sm:$0xf]  ;;  %v757_v50 = vor.u32 %v812_v42, %v754_v43  ;;  %v794_v52 = vld [vmem:[%s1099_s3 + $0x34] sm:$0xf] }
  0x17   : > { %472 = vmatpush.bf16.msra.mxu1 %v761_v33  ;;  %485 = vmatpush.bf16.msra.mxu2 %v701_v34  ;;  %v811_v51 = vld [vmem:[%s1099_s3 + $0xb4] sm:$0xf0]  ;;  %v682_v53 = vld [vmem:[%s1099_s3 + $0x38] sm:$0xf0]  ;;  %v810_v54 = vld [vmem:[%s1099_s3 + $0xb4] sm:$0xf]  ;;  %v681_v56 = vor.u32 %v795_v48, %v680_v47 }
  0x18   : > { %498 = vmatpush.bf16.msra.mxu3 %v765_v38  ;;  %v746_v55 = vld [vmem:[%s1099_s3 + $0xb8] sm:$0xf0]  ;;  %v745_v57 = vor.u32 %v811_v51, %v744_v49  ;;  %v685_v58 = vor.u32 %v794_v52, %v682_v53  ;;  %v672_v59 = vld [vmem:[%s1099_s3 + $0x20] sm:$0xf]  ;;  %v793_v60 = vld [vmem:[%s1099_s3 + $0x24] sm:$0xf0] }
  0x19   : > { %v736_v61 = vld [vmem:[%s1099_s3 + $0xa0] sm:$0xf]  ;;  %v749_v62 = vor.u32 %v810_v54, %v746_v55  ;;  %v809_v63 = vld [vmem:[%s1099_s3 + $0xa4] sm:$0xf0]  ;;  %v792_v0 = vld [vmem:[%s1099_s3 + $0x24] sm:$0xf]  ;;  %v673_v4 = vor.u32 %v793_v60, %v672_v59 }
  0x1a   : > { %460 = vmatpush.bf16.msra.mxu0 %v689_v44  ;;  %v674_v1 = vld [vmem:[%s1099_s3 + $0x28] sm:$0xf0]  ;;  %v808_v2 = vld [vmem:[%s1099_s3 + $0xa4] sm:$0xf]  ;;  %v664_v5 = vld [vmem:[%s1099_s3 + $0x10] sm:$0xf]  ;;  %v737_v7 = vor.u32 %v809_v63, %v736_v61 }
  0x1b   : > { %473 = vmatpush.bf16.msra.mxu1 %v753_v45  ;;  %486 = vmatpush.bf16.msra.mxu2 %v693_v46  ;;  %v738_v3 = vld [vmem:[%s1099_s3 + $0xa8] sm:$0xf0]  ;;  %v791_v6 = vld [vmem:[%s1099_s3 + $0x14] sm:$0xf0]  ;;  %v677_v8 = vor.u32 %v792_v0, %v674_v1  ;;  %v728_v9 = vld [vmem:[%s1099_s3 + $0x90] sm:$0xf] }
  0x1c   : > { %499 = vmatpush.bf16.msra.mxu3 %v757_v50  ;;  %v807_v10 = vld [vmem:[%s1099_s3 + $0x94] sm:$0xf0]  ;;  %v790_v11 = vld [vmem:[%s1099_s3 + $0x14] sm:$0xf]  ;;  %v741_v12 = vor.u32 %v808_v2, %v738_v3  ;;  %v666_v13 = vld [vmem:[%s1099_s3 + $0x18] sm:$0xf0]  ;;  %v665_v18 = vor.u32 %v791_v6, %v664_v5 }
  0x1d   : > { %v806_v14 = vld [vmem:[%s1099_s3 + $0x94] sm:$0xf]  ;;  %v730_v15 = vld [vmem:[%s1099_s3 + $0x98] sm:$0xf0]  ;;  %v656_v16 = vld [vmem:[%s1099_s3] sm:$0xf]  ;;  %v729_v21 = vor.u32 %v807_v10, %v728_v9  ;;  %v669_v22 = vor.u32 %v790_v11, %v666_v13 }
  0x1e   : > { %461 = vmatpush.bf16.msra.mxu0 %v681_v56  ;;  %v789_v17 = vld [vmem:[%s1099_s3 + $0x4] sm:$0xf0]  ;;  %v720_v19 = vld [vmem:[%s1099_s3 + $0x80] sm:$0xf]  ;;  %s1103_s19 = smov (!%p223_p3, %s643_s19), 1  ;;  %v733_v26 = vor.u32 %v806_v14, %v730_v15  ;;  %vm526_vm2 = vcmask 1040384  }
  0x1f   : > { %474 = vmatpush.bf16.msra.mxu1 %v745_v57  ;;  %487 = vmatpush.bf16.msra.mxu2 %v685_v58  ;;  %v241_v20 = vld [vmem:[%s1097_s1] sm:$0x3]  ;;  %v805_v23 = vld [vmem:[%s1099_s3 + $0x84] sm:$0xf0]  ;;  %v788_v24 = vld [vmem:[%s1099_s3 + $0x4] sm:$0xf]  ;;  %v657_v32 = vor.u32 %v789_v17, %v656_v16  ;;  %v529_v17 = vlaneseq }
  0x20   : > { %500 = vmatpush.bf16.msra.mxu3 %v749_v62  ;;  %v658_v25 = vld [vmem:[%s1099_s3 + $0x8] sm:$0xf0]  ;;  %s785_s6 = sshll.u32 %s1103_s19, 3  ;;  %v249_v27 = vld [vmem:[%s1098_s2] sm:$0x3]  ;;  %v243_v30 = vperm.slane %v241_v20, 0  ;;  %v721_v33 = vor.u32 %v805_v23, %v720_v19 }
  0x21   : > { %v804_v28 = vld [vmem:[%s1099_s3 + $0x84] sm:$0xf]  ;;  %v722_v29 = vld [vmem:[%s1099_s3 + $0x88] sm:$0xf0]  ;;  %s227_s15 = scalar_lea.vmem %s1096_s0, %s785_s6  ;;  %v244_v31 = vperm.slane %v241_v20, 1  ;;  %v661_v34 = vor.u32 %v788_v24, %v658_v25  ;;  %v251_v37 = vperm.slane %v249_v27, 0  ;;  %s232_s20 = scalar_lea.vmem %s1100_s4, %s785_s6 }
  0x22   : > { %462 = vmatpush.bf16.msra.mxu0 %v673_v4  ;;  %v238_v35 = vld [vmem:[%s227_s15] sm:$0xff]  ;;  %v252_v39 = vperm.slane %v249_v27, 1  ;;  %v725_v40 = vor.u32 %v804_v28, %v722_v29  ;;  %s787_s21 = sshll.u32 %s1103_s19, 2  ;;  %vm531_vm3 = vcmp.lt.s32.totalorder %v529_v17, 256 }
  0x23   : > { %475 = vmatpush.bf16.msra.mxu1 %v737_v7  ;;  %488 = vmatpush.bf16.msra.mxu2 %v677_v8  ;;  %v239_v36 = vunpack.c.l.bf16 %v238_v35  ;;  %v240_v38 = vunpack.c.h.bf16 %v238_v35  ;;  %s237_s24 = scalar_lea.vmem %s1101_s5, %s787_s21 }
  0x24   : > { %501 = vmatpush.bf16.msra.mxu3 %v741_v12 }
  0x25   : > { %v247_v41 = vmul.f32 %v243_v30, %v239_v36  ;;  %v248_v42 = vmul.f32 %v244_v31, %v240_v38 }
  0x26   : > { %463 = vmatpush.bf16.msra.mxu0 %v665_v18 }
  0x27   : > { %476 = vmatpush.bf16.msra.mxu1 %v729_v21  ;;  %489 = vmatpush.bf16.msra.mxu2 %v669_v22  ;;  %v255_v43 = vadd.f32 %v251_v37, %v247_v41  ;;  %v256_v44 = vadd.f32 %v252_v39, %v248_v42 }
  0x28   : > { %502 = vmatpush.bf16.msra.mxu3 %v733_v26 }
  0x29   : > { %vm257_vm0 = vcmp.ge.f32.partialorder %v255_v43, 0.0  ;;  %v259_v45 = vmul.f32 0.01, %v255_v43  ;;  %vm258_vm1 = vcmp.ge.f32.partialorder %v256_v44, 0.0  ;;  %v260_v46 = vmul.f32 0.01, %v256_v44 }
  0x2a   : > { %464 = vmatpush.bf16.msra.mxu0 %v657_v32 }
  0x2b   : > { %477 = vmatpush.bf16.msra.mxu1 %v721_v33  ;;  %490 = vmatpush.bf16.msra.mxu2 %v661_v34  ;;  %v261_v47 = vsel %vm257_vm0, %v255_v43, %v259_v45  ;;  %v262_v48 = vsel %vm258_vm1, %v256_v44, %v260_v46 }
  0x2c   : > { %503 = vmatpush.bf16.msra.mxu3 %v725_v40  ;;  %v263_v49 = vpack.c.bf16 %v261_v47, %v261_v47  ;;  %v264_v50 = vpack.c.bf16 %v262_v48, %v262_v48 }
  0x2e   : > { %465 = vmatmul.bf16.vlgmr.msra.gmra.mxu0 %v263_v49  ;;  %478 = vmatmul.bf16.vlgmr.msra.gmra.mxu1 %v264_v50 }
  0x2f   : > { %491 = vmatmul.bf16.vlgmr.msra.gmra.mxu2 %v263_v49  ;;  %504 = vmatmul.bf16.vlgmr.msra.gmra.mxu3 %v264_v50 }
  0xab   : > { %v466_v51 = vpop.f32.mrf.mxu0  ;;  %v479_v52 = vpop.f32.mrf.mxu1 }
  0xac   : > { %v480_v53 = vadd.f32 %v479_v52, %v466_v51 }
  0xae   : > { %v511_v54 = vrot.slane %v480_v53, 4  ;;  %v534_v55 = vmul.f32 %v480_v53, %v480_v53 }
  0xb0   : > { %v536_v56 = vrot.slane %v534_v55, 4  ;;  %v512_v57 = vadd.f32 %v511_v54, %v480_v53 }
  0xb2   : > { %v492_v58 = vpop.f32.mrf.mxu2  ;;  %v505_v59 = vpop.f32.mrf.mxu3  ;;  %v537_v60 = vadd.f32 %v536_v56, %v534_v55  ;;  %v513_v0 = vrot.slane %v512_v57, 2 }
  0xb3   : > { %v506_v61 = vadd.f32 %v505_v59, %v492_v58  ;;  %v468_v62 = vpop.f32.mrf.mxu0  ;;  %v481_v63 = vpop.f32.mrf.mxu1 }
  0xb4   : > { %v538_v4 = vrot.slane %v537_v60, 2  ;;  %v514_v7 = vadd.f32 %v513_v0, %v512_v57 }
  0xb5   : > { %v509_v1 = vpack.c.bf16 %v506_v61, %v480_v53  ;;  %v517_v2 = vrot.slane %v506_v61, 4  ;;  %v535_v3 = vmul.f32 %v506_v61, %v506_v61 }
  0xb6   : > { %v539_v12 = vadd.f32 %v538_v4, %v537_v60  ;;  %v515_v15 = vrot.slane %v514_v7, 1 }
  0xb7   : > { %510 = vst [vmem:[%s232_s20] sm:$0xff] %v509_v1  ;;  %v518_v5 = vadd.f32 %v517_v2, %v506_v61  ;;  %v542_v6 = vrot.slane %v535_v3, 4 }
  0xb8   : > { %v540_v19 = vrot.slane %v539_v12, 1  ;;  %v516_v22 = vadd.f32 %v515_v15, %v514_v7 }
  0xb9   : > { %v519_v8 = vrot.slane %v518_v5, 2  ;;  %v543_v9 = vadd.f32 %v542_v6, %v535_v3 }
  0xba   : > { %v494_v10 = vpop.f32.mrf.mxu2  ;;  %v507_v11 = vpop.f32.mrf.mxu3  ;;  %v541_v25 = vadd.f32 %v540_v19, %v539_v12 }
  0xbb   : > { %v520_v13 = vadd.f32 %v519_v8, %v518_v5  ;;  %v544_v14 = vrot.slane %v543_v9, 2 }
  0xbd   : > { %v521_v16 = vrot.slane %v520_v13, 1  ;;  %v545_v18 = vadd.f32 %v544_v14, %v543_v9 }
  0xbf   : > { %v522_v20 = vadd.f32 %v521_v16, %v520_v13  ;;  %v546_v21 = vrot.slane %v545_v18, 1 }
  0xc1   : > { %v525_v23 = vrot.slane %v522_v20, 7  ;;  %v547_v24 = vadd.f32 %v546_v21, %v545_v18 }
  0xc3   : > { %v527_v26 = vsel %vm526_vm2, %v516_v22, %v525_v23  ;;  %v550_v27 = vrot.slane %v547_v24, 7 }
  0xc4   : > { %533 = vst.msk [vmem:[%s237_s24] ss:$2 sm:$0x3] %vm531_vm3, %v527_v26 }
  0xc5   : > { %v551_v28 = vsel %vm526_vm2, %v541_v25, %v550_v27 }
  0xc6   : > { %782 = vst.msk [vmem:[%s237_s24 + $0x1] ss:$2 sm:$0x3] %vm531_vm3, %v551_v28 }
  0xc7 PF: > { %s16_s18 = sadd.s32 1, %s834_s18  }
  0xc8   : > { %p13_p4 = scmp.ge.s32.totalorder %s16_s18, 4  }
  0xca   :  { %15 = sbr.rel (!%p13_p4) target bundleno = 1 (0x1), region = 79 }

// kernel: insert_b_forward.11
= control target key start
LH: loop header
LB: loop body
LE: loop exit
PB: predicated region body
PF: predicated region fallthrough
CT: control target
= control target key end

     0   :  { %s3114_s18 = smov 0   ;;  %s4350_s0 = inlined_call_operand.vmem [shape: bf16[2,8,256], index: 0, kind: input, shape index: {}]   ;;  %s4351_s1 = inlined_call_operand.vmem [shape: f32[1,256], index: 1, kind: input, shape index: {}]   ;;  %s4352_s2 = inlined_call_operand.vmem [shape: f32[1,256], index: 2, kind: input, shape index: {}]   ;;  %s4353_s3 = inlined_call_operand.vmem [shape: bf16[3,256,512], index: 3, kind: input, shape index: {}]   ;;  %s4354_s4 = inlined_call_operand.vmem [shape: bf16[2,8,512], index: 4, kind: output, shape index: {0}]   ;;  %s4355_s5 = inlined_call_operand.vmem [shape: f32[2,2,512], index: 5, kind: output, shape index: {1}]  }
   0x1 LB: > { %s1961_s19 = sadd.s32 4294967295, %s3081_s18   ;;  %p1965_p0 = scmp.ge.s32.totalorder %s3081_s18, 1  ;;  %s3081_s18 = sphi %s3114_s18, %s16_s18  }
   0x2   : > { %p190_p1 = scmp.lt.s32.totalorder %s3081_s18, 3 }
   0x4   : > { %p191_p2 = pnand %p1965_p0, %p190_p1 }
   0x5   : > { %p223_p3 = scmp.lt.s32.totalorder (!%p191_p2), %s1961_s19, 1 }
   0x6   : > { %194 = sbr.rel (%p191_p2) target bundleno = 362 (0x16a), region = 36 }
   0xb   : > { %v2150_v0 = vld [vmem:[%s4353_s3 + $0x2e0] sm:$0xf]  ;;  %v2968_v1 = vld [vmem:[%s4353_s3 + $0x2ec] sm:$0xf0]  ;;  %v2966_v5 = vld [vmem:[%s4353_s3 + $0x2e4] sm:$0xf] }
   0xc   : > { %v2278_v2 = vld [vmem:[%s4353_s3 + $0x3e0] sm:$0xf]  ;;  %v2151_v3 = vor.u32 %v2968_v1, %v2150_v0  ;;  %v3000_v4 = vld [vmem:[%s4353_s3 + $0x3ec] sm:$0xf0]  ;;  %v2152_v6 = vld [vmem:[%s4353_s3 + $0x2f0] sm:$0xf0] }
   0xd   : > { %v2279_v7 = vor.u32 %v3000_v4, %v2278_v2  ;;  %v2155_v8 = vor.u32 %v2966_v5, %v2152_v6  ;;  %v2998_v9 = vld [vmem:[%s4353_s3 + $0x3e4] sm:$0xf]  ;;  %v2280_v10 = vld [vmem:[%s4353_s3 + $0x3f0] sm:$0xf0]  ;;  %v2134_v11 = vld [vmem:[%s4353_s3 + $0x2c0] sm:$0xf] }
   0xe   : > { %758 = vmatpush.bf16.msra.mxu0 %v2151_v3  ;;  %v2283_v12 = vor.u32 %v2998_v9, %v2280_v10  ;;  %v2964_v13 = vld [vmem:[%s4353_s3 + $0x2cc] sm:$0xf0]  ;;  %v2262_v14 = vld [vmem:[%s4353_s3 + $0x3c0] sm:$0xf]  ;;  %v2962_v18 = vld [vmem:[%s4353_s3 + $0x2c4] sm:$0xf] }
   0xf   : > { %v2996_v15 = vld [vmem:[%s4353_s3 + $0x3cc] sm:$0xf0]  ;;  %771 = vmatpush.bf16.msra.mxu1 %v2279_v7  ;;  %784 = vmatpush.bf16.msra.mxu2 %v2155_v8  ;;  %v2135_v16 = vor.u32 %v2964_v13, %v2134_v11  ;;  %v2136_v19 = vld [vmem:[%s4353_s3 + $0x2d0] sm:$0xf0]  ;;  %v2994_v20 = vld [vmem:[%s4353_s3 + $0x3c4] sm:$0xf] }
  0x10   : > { %v2263_v17 = vor.u32 %v2996_v15, %v2262_v14  ;;  %797 = vmatpush.bf16.msra.mxu3 %v2283_v12  ;;  %v2139_v21 = vor.u32 %v2962_v18, %v2136_v19  ;;  %v2264_v22 = vld [vmem:[%s4353_s3 + $0x3d0] sm:$0xf0]  ;;  %v2118_v23 = vld [vmem:[%s4353_s3 + $0x2a0] sm:$0xf]  ;;  %v2960_v24 = vld [vmem:[%s4353_s3 + $0x2ac] sm:$0xf0] }
  0x11   : > { %v2267_v25 = vor.u32 %v2994_v20, %v2264_v22  ;;  %v2246_v26 = vld [vmem:[%s4353_s3 + $0x3a0] sm:$0xf]  ;;  %v2992_v27 = vld [vmem:[%s4353_s3 + $0x3ac] sm:$0xf0]  ;;  %v2958_v28 = vld [vmem:[%s4353_s3 + $0x2a4] sm:$0xf]  ;;  %v2119_v29 = vor.u32 %v2960_v24, %v2118_v23 }
  0x12   : > { %759 = vmatpush.bf16.msra.mxu0 %v2135_v16  ;;  %v2120_v30 = vld [vmem:[%s4353_s3 + $0x2b0] sm:$0xf0]  ;;  %v2990_v31 = vld [vmem:[%s4353_s3 + $0x3a4] sm:$0xf]  ;;  %v2247_v33 = vor.u32 %v2992_v27, %v2246_v26  ;;  %v2102_v35 = vld [vmem:[%s4353_s3 + $0x280] sm:$0xf] }
  0x13   : > { %v2248_v32 = vld [vmem:[%s4353_s3 + $0x3b0] sm:$0xf0]  ;;  %772 = vmatpush.bf16.msra.mxu1 %v2263_v17  ;;  %785 = vmatpush.bf16.msra.mxu2 %v2139_v21  ;;  %v2123_v34 = vor.u32 %v2958_v28, %v2120_v30  ;;  %v2956_v36 = vld [vmem:[%s4353_s3 + $0x28c] sm:$0xf0]  ;;  %v2230_v37 = vld [vmem:[%s4353_s3 + $0x380] sm:$0xf] }
  0x14   : > { %798 = vmatpush.bf16.msra.mxu3 %v2267_v25  ;;  %v2251_v38 = vor.u32 %v2990_v31, %v2248_v32  ;;  %v2988_v39 = vld [vmem:[%s4353_s3 + $0x38c] sm:$0xf0]  ;;  %v2954_v40 = vld [vmem:[%s4353_s3 + $0x284] sm:$0xf]  ;;  %v2104_v41 = vld [vmem:[%s4353_s3 + $0x290] sm:$0xf0]  ;;  %v2103_v44 = vor.u32 %v2956_v36, %v2102_v35 }
  0x15   : > { %v2986_v42 = vld [vmem:[%s4353_s3 + $0x384] sm:$0xf]  ;;  %v2232_v43 = vld [vmem:[%s4353_s3 + $0x390] sm:$0xf0]  ;;  %v2231_v45 = vor.u32 %v2988_v39, %v2230_v37  ;;  %v2107_v46 = vor.u32 %v2954_v40, %v2104_v41  ;;  %v2086_v47 = vld [vmem:[%s4353_s3 + $0x260] sm:$0xf] }
  0x16   : > { %760 = vmatpush.bf16.msra.mxu0 %v2119_v29  ;;  %v2952_v48 = vld [vmem:[%s4353_s3 + $0x26c] sm:$0xf0]  ;;  %v2214_v49 = vld [vmem:[%s4353_s3 + $0x360] sm:$0xf]  ;;  %v2235_v50 = vor.u32 %v2986_v42, %v2232_v43  ;;  %v2950_v52 = vld [vmem:[%s4353_s3 + $0x264] sm:$0xf] }
  0x17   : > { %773 = vmatpush.bf16.msra.mxu1 %v2247_v33  ;;  %786 = vmatpush.bf16.msra.mxu2 %v2123_v34  ;;  %v2984_v51 = vld [vmem:[%s4353_s3 + $0x36c] sm:$0xf0]  ;;  %v2088_v53 = vld [vmem:[%s4353_s3 + $0x270] sm:$0xf0]  ;;  %v2982_v54 = vld [vmem:[%s4353_s3 + $0x364] sm:$0xf]  ;;  %v2087_v56 = vor.u32 %v2952_v48, %v2086_v47 }
  0x18   : > { %799 = vmatpush.bf16.msra.mxu3 %v2251_v38  ;;  %v2216_v55 = vld [vmem:[%s4353_s3 + $0x370] sm:$0xf0]  ;;  %v2215_v57 = vor.u32 %v2984_v51, %v2214_v49  ;;  %v2091_v58 = vor.u32 %v2950_v52, %v2088_v53  ;;  %v2070_v59 = vld [vmem:[%s4353_s3 + $0x240] sm:$0xf]  ;;  %v2948_v60 = vld [vmem:[%s4353_s3 + $0x24c] sm:$0xf0] }
  0x19   : > { %v2198_v61 = vld [vmem:[%s4353_s3 + $0x340] sm:$0xf]  ;;  %v2219_v62 = vor.u32 %v2982_v54, %v2216_v55  ;;  %v2980_v63 = vld [vmem:[%s4353_s3 + $0x34c] sm:$0xf0]  ;;  %v2946_v0 = vld [vmem:[%s4353_s3 + $0x244] sm:$0xf]  ;;  %v2071_v4 = vor.u32 %v2948_v60, %v2070_v59 }
  0x1a   : > { %761 = vmatpush.bf16.msra.mxu0 %v2103_v44  ;;  %v2072_v1 = vld [vmem:[%s4353_s3 + $0x250] sm:$0xf0]  ;;  %v2978_v2 = vld [vmem:[%s4353_s3 + $0x344] sm:$0xf]  ;;  %v2199_v5 = vor.u32 %v2980_v63, %v2198_v61  ;;  %v2054_v7 = vld [vmem:[%s4353_s3 + $0x220] sm:$0xf] }
  0x1b   : > { %774 = vmatpush.bf16.msra.mxu1 %v2231_v45  ;;  %787 = vmatpush.bf16.msra.mxu2 %v2107_v46  ;;  %v2200_v3 = vld [vmem:[%s4353_s3 + $0x350] sm:$0xf0]  ;;  %v2075_v6 = vor.u32 %v2946_v0, %v2072_v1  ;;  %v2944_v8 = vld [vmem:[%s4353_s3 + $0x22c] sm:$0xf0]  ;;  %v2182_v9 = vld [vmem:[%s4353_s3 + $0x320] sm:$0xf] }
  0x1c   : > { %800 = vmatpush.bf16.msra.mxu3 %v2235_v50  ;;  %v2203_v10 = vor.u32 %v2978_v2, %v2200_v3  ;;  %v2976_v11 = vld [vmem:[%s4353_s3 + $0x32c] sm:$0xf0]  ;;  %v2942_v12 = vld [vmem:[%s4353_s3 + $0x224] sm:$0xf]  ;;  %v2056_v13 = vld [vmem:[%s4353_s3 + $0x230] sm:$0xf0]  ;;  %v2055_v16 = vor.u32 %v2944_v8, %v2054_v7 }
  0x1d   : > { %v2974_v14 = vld [vmem:[%s4353_s3 + $0x324] sm:$0xf]  ;;  %v2184_v15 = vld [vmem:[%s4353_s3 + $0x330] sm:$0xf0]  ;;  %v2038_v17 = vld [vmem:[%s4353_s3 + $0x200] sm:$0xf]  ;;  %v2183_v19 = vor.u32 %v2976_v11, %v2182_v9  ;;  %v2059_v20 = vor.u32 %v2942_v12, %v2056_v13 }
  0x1e   : > { %762 = vmatpush.bf16.msra.mxu0 %v2087_v56  ;;  %v2940_v18 = vld [vmem:[%s4353_s3 + $0x20c] sm:$0xf0]  ;;  %v2166_v21 = vld [vmem:[%s4353_s3 + $0x300] sm:$0xf]  ;;  %v2938_v23 = vld [vmem:[%s4353_s3 + $0x204] sm:$0xf]  ;;  %v2187_v24 = vor.u32 %v2974_v14, %v2184_v15 }
  0x1f   : > { %775 = vmatpush.bf16.msra.mxu1 %v2215_v57  ;;  %788 = vmatpush.bf16.msra.mxu2 %v2091_v58  ;;  %v2972_v22 = vld [vmem:[%s4353_s3 + $0x30c] sm:$0xf0]  ;;  %v2040_v25 = vld [vmem:[%s4353_s3 + $0x210] sm:$0xf0]  ;;  %v2970_v26 = vld [vmem:[%s4353_s3 + $0x304] sm:$0xf]  ;;  %v2039_v31 = vor.u32 %v2940_v18, %v2038_v17 }
  0x20   : > { %801 = vmatpush.bf16.msra.mxu3 %v2219_v62  ;;  %v2168_v27 = vld [vmem:[%s4353_s3 + $0x310] sm:$0xf0]  ;;  %v2158_v28 = vld [vmem:[%s4353_s3 + $0x2e8] sm:$0xf]  ;;  %v2969_v29 = vld [vmem:[%s4353_s3 + $0x2f4] sm:$0xf0]  ;;  %v2167_v35 = vor.u32 %v2972_v22, %v2166_v21  ;;  %v2043_v36 = vor.u32 %v2938_v23, %v2040_v25 }
  0x21   : > { %v2286_v30 = vld [vmem:[%s4353_s3 + $0x3e8] sm:$0xf]  ;;  %v3001_v32 = vld [vmem:[%s4353_s3 + $0x3f4] sm:$0xf0]  ;;  %v2967_v33 = vld [vmem:[%s4353_s3 + $0x2ec] sm:$0xf]  ;;  %v2171_v39 = vor.u32 %v2970_v26, %v2168_v27  ;;  %v2159_v40 = vor.u32 %v2969_v29, %v2158_v28 }
  0x22   : > { %763 = vmatpush.bf16.msra.mxu0 %v2071_v4  ;;  %v2160_v34 = vld [vmem:[%s4353_s3 + $0x2f8] sm:$0xf0]  ;;  %v2999_v37 = vld [vmem:[%s4353_s3 + $0x3ec] sm:$0xf]  ;;  %v2287_v41 = vor.u32 %v3001_v32, %v2286_v30  ;;  %v2142_v43 = vld [vmem:[%s4353_s3 + $0x2c8] sm:$0xf] }
  0x23   : > { %776 = vmatpush.bf16.msra.mxu1 %v2199_v5  ;;  %789 = vmatpush.bf16.msra.mxu2 %v2075_v6  ;;  %v2288_v38 = vld [vmem:[%s4353_s3 + $0x3f8] sm:$0xf0]  ;;  %v2163_v42 = vor.u32 %v2967_v33, %v2160_v34  ;;  %v2965_v44 = vld [vmem:[%s4353_s3 + $0x2d4] sm:$0xf0]  ;;  %v2270_v45 = vld [vmem:[%s4353_s3 + $0x3c8] sm:$0xf] }
  0x24   : > { %802 = vmatpush.bf16.msra.mxu3 %v2203_v10  ;;  %v2291_v46 = vor.u32 %v2999_v37, %v2288_v38  ;;  %v2997_v47 = vld [vmem:[%s4353_s3 + $0x3d4] sm:$0xf0]  ;;  %v2963_v48 = vld [vmem:[%s4353_s3 + $0x2cc] sm:$0xf]  ;;  %v2144_v49 = vld [vmem:[%s4353_s3 + $0x2d8] sm:$0xf0]  ;;  %v2143_v52 = vor.u32 %v2965_v44, %v2142_v43 }
  0x25   : > { %v2995_v50 = vld [vmem:[%s4353_s3 + $0x3cc] sm:$0xf]  ;;  %v2272_v51 = vld [vmem:[%s4353_s3 + $0x3d8] sm:$0xf0]  ;;  %v2126_v53 = vld [vmem:[%s4353_s3 + $0x2a8] sm:$0xf]  ;;  %v2271_v54 = vor.u32 %v2997_v47, %v2270_v45  ;;  %v2147_v55 = vor.u32 %v2963_v48, %v2144_v49 }
  0x26   : > { %764 = vmatpush.bf16.msra.mxu0 %v2055_v16  ;;  %v2961_v56 = vld [vmem:[%s4353_s3 + $0x2b4] sm:$0xf0]  ;;  %v2254_v57 = vld [vmem:[%s4353_s3 + $0x3a8] sm:$0xf]  ;;  %v2275_v59 = vor.u32 %v2995_v50, %v2272_v51  ;;  %v2959_v60 = vld [vmem:[%s4353_s3 + $0x2ac] sm:$0xf] }
  0x27   : > { %777 = vmatpush.bf16.msra.mxu1 %v2183_v19  ;;  %790 = vmatpush.bf16.msra.mxu2 %v2059_v20  ;;  %v2993_v58 = vld [vmem:[%s4353_s3 + $0x3b4] sm:$0xf0]  ;;  %v2128_v61 = vld [vmem:[%s4353_s3 + $0x2b8] sm:$0xf0]  ;;  %v2991_v62 = vld [vmem:[%s4353_s3 + $0x3ac] sm:$0xf]  ;;  %v2127_v2 = vor.u32 %v2961_v56, %v2126_v53 }
  0x28   : > { %803 = vmatpush.bf16.msra.mxu3 %v2187_v24  ;;  %v2256_v63 = vld [vmem:[%s4353_s3 + $0x3b8] sm:$0xf0]  ;;  %v2110_v0 = vld [vmem:[%s4353_s3 + $0x288] sm:$0xf]  ;;  %v2957_v1 = vld [vmem:[%s4353_s3 + $0x294] sm:$0xf0]  ;;  %v2255_v7 = vor.u32 %v2993_v58, %v2254_v57  ;;  %v2131_v8 = vor.u32 %v2959_v60, %v2128_v61 }
  0x29   : > { %v2238_v3 = vld [vmem:[%s4353_s3 + $0x388] sm:$0xf]  ;;  %v2989_v4 = vld [vmem:[%s4353_s3 + $0x394] sm:$0xf0]  ;;  %v2955_v5 = vld [vmem:[%s4353_s3 + $0x28c] sm:$0xf]  ;;  %v2259_v12 = vor.u32 %v2991_v62, %v2256_v63  ;;  %v2111_v16 = vor.u32 %v2957_v1, %v2110_v0 }
  0x2a   : > { %765 = vmatpush.bf16.msra.mxu0 %v2039_v31  ;;  %v2112_v6 = vld [vmem:[%s4353_s3 + $0x298] sm:$0xf0]  ;;  %v2987_v9 = vld [vmem:[%s4353_s3 + $0x38c] sm:$0xf]  ;;  %v3083_v11 = vmov 0.0   ;;  %s4357_s19 = smov (!%p223_p3, %s1961_s19), 1  ;;  %v2239_v18 = vor.u32 %v2989_v4, %v2238_v3 }
  0x2b   : > { %778 = vmatpush.bf16.msra.mxu1 %v2167_v35  ;;  %791 = vmatpush.bf16.msra.mxu2 %v2043_v36  ;;  %v2240_v10 = vld [vmem:[%s4353_s3 + $0x398] sm:$0xf0]  ;;  %263 = vst [vmem:[#allocation2 + $0x10] sm:$0xff] %v3083_v11  ;;  %v241_v13 = vld [vmem:[%s4351_s1] sm:$0x3]  ;;  %s2871_s9 = sshll.u32 %s4357_s19, 3  ;;  %v2115_v19 = vor.u32 %v2955_v5, %v2112_v6 }
  0x2c   : > { %804 = vmatpush.bf16.msra.mxu3 %v2171_v39  ;;  %265 = vst [vmem:[#allocation2 + $0x18] sm:$0x3] %v3083_v11  ;;  %v2094_v14 = vld [vmem:[%s4353_s3 + $0x268] sm:$0xf]  ;;  %v2953_v15 = vld [vmem:[%s4353_s3 + $0x274] sm:$0xf0]  ;;  %s227_s20 = scalar_lea.vmem %s4350_s0, %s2871_s9  ;;  %v2243_v24 = vor.u32 %v2987_v9, %v2240_v10  ;;  %s237_s23 = scalar_lea.vmem %s4355_s5, %s2871_s9 }
  0x2d   : > { %264 = vst [vmem:[#allocation2] sm:$0xff] %v3083_v11  ;;  %v249_v17 = vld [vmem:[%s4352_s2] sm:$0x3]  ;;  %v2222_v20 = vld [vmem:[%s4353_s3 + $0x368] sm:$0xf]  ;;  %v243_v22 = vperm.slane %v241_v13, 0  ;;  %v2095_v34 = vor.u32 %v2953_v15, %v2094_v14 }
  0x2e   : > { %810 = vmatpush.bf16.msrb.mxu0 %v2159_v40  ;;  %266 = vst [vmem:[#allocation2 + $0x8] sm:$0x3] %v3083_v11  ;;  %v2985_v21 = vld [vmem:[%s4353_s3 + $0x374] sm:$0xf0]  ;;  %v244_v23 = vperm.slane %v241_v13, 1  ;;  %v238_v27 = vld [vmem:[%s227_s20] sm:$0xff] }
  0x2f   : > { %823 = vmatpush.bf16.msrb.mxu1 %v2287_v41  ;;  %836 = vmatpush.bf16.msrb.mxu2 %v2163_v42  ;;  %v2951_v25 = vld [vmem:[%s4353_s3 + $0x26c] sm:$0xf]  ;;  %v2096_v26 = vld [vmem:[%s4353_s3 + $0x278] sm:$0xf0]  ;;  %v239_v30 = vunpack.c.l.bf16 %v238_v27  ;;  %v251_v31 = vperm.slane %v249_v17, 0  ;;  %v240_v32 = vunpack.c.h.bf16 %v238_v27  ;;  %v252_v33 = vperm.slane %v249_v17, 1 }
  0x30   : > { %849 = vmatpush.bf16.msrb.mxu3 %v2291_v46  ;;  %v2983_v28 = vld [vmem:[%s4353_s3 + $0x36c] sm:$0xf]  ;;  %v2224_v29 = vld [vmem:[%s4353_s3 + $0x378] sm:$0xf0]  ;;  %v2223_v35 = vor.u32 %v2985_v21, %v2222_v20  ;;  %v2078_v36 = vld [vmem:[%s4353_s3 + $0x248] sm:$0xf]  ;;  %v2099_v39 = vor.u32 %v2951_v25, %v2096_v26 }
  0x31   : > { %v2949_v37 = vld [vmem:[%s4353_s3 + $0x254] sm:$0xf0]  ;;  %v2206_v38 = vld [vmem:[%s4353_s3 + $0x348] sm:$0xf]  ;;  %v2947_v41 = vld [vmem:[%s4353_s3 + $0x24c] sm:$0xf]  ;;  %v247_v43 = vmul.f32 %v243_v22, %v239_v30  ;;  %v248_v44 = vmul.f32 %v244_v23, %v240_v32  ;;  %v2227_v45 = vor.u32 %v2983_v28, %v2224_v29 }
  0x32   : > { %811 = vmatpush.bf16.msrb.mxu0 %v2143_v52  ;;  %v2981_v40 = vld [vmem:[%s4353_s3 + $0x354] sm:$0xf0]  ;;  %v2080_v42 = vld [vmem:[%s4353_s3 + $0x258] sm:$0xf0]  ;;  %v2979_v46 = vld [vmem:[%s4353_s3 + $0x34c] sm:$0xf]  ;;  %v2079_v50 = vor.u32 %v2949_v37, %v2078_v36 }
  0x33   : > { %824 = vmatpush.bf16.msrb.mxu1 %v2271_v54  ;;  %837 = vmatpush.bf16.msrb.mxu2 %v2147_v55  ;;  %v2208_v47 = vld [vmem:[%s4353_s3 + $0x358] sm:$0xf0]  ;;  %v255_v48 = vadd.f32 %v251_v31, %v247_v43  ;;  %v256_v49 = vadd.f32 %v252_v33, %v248_v44  ;;  %v2207_v51 = vor.u32 %v2981_v40, %v2206_v38  ;;  %v2062_v53 = vld [vmem:[%s4353_s3 + $0x228] sm:$0xf]  ;;  %v2945_v54 = vld [vmem:[%s4353_s3 + $0x234] sm:$0xf0] }
  0x34   : > { %850 = vmatpush.bf16.msrb.mxu3 %v2275_v59  ;;  %v2083_v52 = vor.u32 %v2947_v41, %v2080_v42  ;;  %v2190_v55 = vld [vmem:[%s4353_s3 + $0x328] sm:$0xf]  ;;  %v2211_v58 = vor.u32 %v2979_v46, %v2208_v47  ;;  %v2977_v59 = vld [vmem:[%s4353_s3 + $0x334] sm:$0xf0]  ;;  %v2943_v60 = vld [vmem:[%s4353_s3 + $0x22c] sm:$0xf]  ;;  %v2063_v4 = vor.u32 %v2945_v54, %v2062_v53 }
  0x35   : > { %vm257_vm0 = vcmp.ge.f32.partialorder %v255_v48, 0.0  ;;  %v259_v56 = vmul.f32 0.01, %v255_v48  ;;  %vm258_vm1 = vcmp.ge.f32.partialorder %v256_v49, 0.0  ;;  %v260_v57 = vmul.f32 0.01, %v256_v49 }
  0x36   : > { %812 = vmatpush.bf16.msrb.mxu0 %v2127_v2  ;;  %v2064_v61 = vld [vmem:[%s4353_s3 + $0x238] sm:$0xf0]  ;;  %v2975_v0 = vld [vmem:[%s4353_s3 + $0x32c] sm:$0xf]  ;;  %v2046_v5 = vld [vmem:[%s4353_s3 + $0x208] sm:$0xf]  ;;  %v2191_v6 = vor.u32 %v2977_v59, %v2190_v55 }
  0x37   : > { %825 = vmatpush.bf16.msrb.mxu1 %v2255_v7  ;;  %838 = vmatpush.bf16.msrb.mxu2 %v2131_v8  ;;  %v261_v62 = vsel %vm257_vm0, %v255_v48, %v259_v56  ;;  %v262_v63 = vsel %vm258_vm1, %v256_v49, %v260_v57  ;;  %v2192_v1 = vld [vmem:[%s4353_s3 + $0x338] sm:$0xf0]  ;;  %v2067_v7 = vor.u32 %v2943_v60, %v2064_v61  ;;  %v2941_v8 = vld [vmem:[%s4353_s3 + $0x214] sm:$0xf0]  ;;  %v2174_v9 = vld [vmem:[%s4353_s3 + $0x308] sm:$0xf] }
  0x38   : > { %851 = vmatpush.bf16.msrb.mxu3 %v2259_v12  ;;  %v269_v2 = vrot.slane %v261_v62, 7  ;;  %v270_v3 = vrot.slane %v262_v63, 7  ;;  %v2973_v10 = vld [vmem:[%s4353_s3 + $0x314] sm:$0xf0]  ;;  %v2195_v11 = vor.u32 %v2975_v0, %v2192_v1  ;;  %v2939_v12 = vld [vmem:[%s4353_s3 + $0x20c] sm:$0xf] }
  0x39   : > { %v2048_v13 = vld [vmem:[%s4353_s3 + $0x218] sm:$0xf0]  ;;  %v2971_v14 = vld [vmem:[%s4353_s3 + $0x30c] sm:$0xf]  ;;  %v2175_v17 = vor.u32 %v2973_v10, %v2174_v9  ;;  %v2406_v25 = vld [vmem:[%s4353_s3 + $0xe0] sm:$0xf] }
  0x3a   : > { %813 = vmatpush.bf16.msrb.mxu0 %v2111_v16  ;;  %273 = vst [vmem:[#allocation2 + $0x10] sm:$0xfe] %v269_v2  ;;  %v2176_v15 = vld [vmem:[%s4353_s3 + $0x318] sm:$0xf0]  ;;  %v2047_v16 = vor.u32 %v2941_v8, %v2046_v5  ;;  %v2904_v26 = vld [vmem:[%s4353_s3 + $0xec] sm:$0xf0] }
  0x3b   : > { %826 = vmatpush.bf16.msrb.mxu1 %v2239_v18  ;;  %839 = vmatpush.bf16.msrb.mxu2 %v2115_v19  ;;  %275 = vst [vmem:[#allocation2 + $0x18] sm:$0x1] %v269_v2  ;;  %v2051_v18 = vor.u32 %v2939_v12, %v2048_v13  ;;  %v2179_v19 = vor.u32 %v2971_v14, %v2176_v15  ;;  %v2902_v30 = vld [vmem:[%s4353_s3 + $0xe4] sm:$0xf]  ;;  %v2408_v31 = vld [vmem:[%s4353_s3 + $0xf0] sm:$0xf0] }
  0x3c   : > { %852 = vmatpush.bf16.msrb.mxu3 %v2243_v24  ;;  %274 = vst [vmem:[#allocation2] sm:$0xfe] %v270_v3  ;;  %v2534_v32 = vld [vmem:[%s4353_s3 + $0x1e0] sm:$0xf]  ;;  %v2936_v33 = vld [vmem:[%s4353_s3 + $0x1ec] sm:$0xf0]  ;;  %v2411_v40 = vor.u32 %v2902_v30, %v2408_v31 }
  0x3d   : > { %276 = vst [vmem:[#allocation2 + $0x8] sm:$0x1] %v270_v3  ;;  %v2536_v38 = vld [vmem:[%s4353_s3 + $0x1f0] sm:$0xf0]  ;;  %v2390_v41 = vld [vmem:[%s4353_s3 + $0xc0] sm:$0xf]  ;;  %v2535_v47 = vor.u32 %v2936_v33, %v2534_v32 }
  0x3e   : > { %814 = vmatpush.bf16.msrb.mxu0 %v2095_v34  ;;  %v2934_v34 = vld [vmem:[%s4353_s3 + $0x1e4] sm:$0xf]  ;;  %v2900_v42 = vld [vmem:[%s4353_s3 + $0xcc] sm:$0xf0]  ;;  %v2392_v46 = vld [vmem:[%s4353_s3 + $0xd0] sm:$0xf0] }
  0x3f   : > { %827 = vmatpush.bf16.msrb.mxu1 %v2223_v35  ;;  %840 = vmatpush.bf16.msrb.mxu2 %v2099_v39  ;;  %v2407_v39 = vor.u32 %v2904_v26, %v2406_v25  ;;  %v2539_v48 = vor.u32 %v2934_v34, %v2536_v38  ;;  %v2518_v49 = vld [vmem:[%s4353_s3 + $0x1c0] sm:$0xf]  ;;  %v2520_v53 = vld [vmem:[%s4353_s3 + $0x1d0] sm:$0xf0]  ;;  %v2391_v54 = vor.u32 %v2900_v42, %v2390_v41  ;;  %v2896_v57 = vld [vmem:[%s4353_s3 + $0xac] sm:$0xf0] }
  0x40   : > { %853 = vmatpush.bf16.msrb.mxu3 %v2227_v45  ;;  %v2898_v45 = vld [vmem:[%s4353_s3 + $0xc4] sm:$0xf]  ;;  %v2374_v56 = vld [vmem:[%s4353_s3 + $0xa0] sm:$0xf]  ;;  %v2376_v59 = vld [vmem:[%s4353_s3 + $0xb0] sm:$0xf0] }
  0x41   : > { %v281_v20 = vld [vmem:[#allocation2 + $0x10] sm:$0xfe]  ;;  %v2395_v55 = vor.u32 %v2898_v45, %v2392_v46  ;;  %v2502_v62 = vld [vmem:[%s4353_s3 + $0x1a0] sm:$0xf]  ;;  %v2926_v0 = vld [vmem:[%s4353_s3 + $0x1a4] sm:$0xf]  ;;  %v2375_v2 = vor.u32 %v2896_v57, %v2374_v56 }
  0x42   : > { %815 = vmatpush.bf16.msrb.mxu0 %v2079_v50  ;;  %v283_v21 = vld [vmem:[#allocation2 + $0x18] sm:$0x1]  ;;  %v2928_v63 = vld [vmem:[%s4353_s3 + $0x1ac] sm:$0xf0]  ;;  %v2504_v1 = vld [vmem:[%s4353_s3 + $0x1b0] sm:$0xf0] }
  0x43   : > { %828 = vmatpush.bf16.msrb.mxu1 %v2207_v51  ;;  %841 = vmatpush.bf16.msrb.mxu2 %v2083_v52  ;;  %v285_v22 = vpack.c.bf16 %v283_v21, %v281_v20  ;;  %v282_v23 = vld [vmem:[#allocation2] sm:$0xfe]  ;;  %v2932_v51 = vld [vmem:[%s4353_s3 + $0x1cc] sm:$0xf0]  ;;  %v2503_v8 = vor.u32 %v2928_v63, %v2502_v62  ;;  %v2507_v9 = vor.u32 %v2926_v0, %v2504_v1  ;;  %v2488_v13 = vld [vmem:[%s4353_s3 + $0x190] sm:$0xf0] }
  0x44   : > { %854 = vmatpush.bf16.msrb.mxu3 %v2211_v58  ;;  %v284_v24 = vld [vmem:[#allocation2 + $0x8] sm:$0x1]  ;;  %v2930_v52 = vld [vmem:[%s4353_s3 + $0x1c4] sm:$0xf]  ;;  %v2519_v60 = vor.u32 %v2932_v51, %v2518_v49  ;;  %v2892_v5 = vld [vmem:[%s4353_s3 + $0x8c] sm:$0xf0] }
  0x45   : > { %v423_v27 = vshrl.u32 %v285_v22, 16  ;;  %v425_v28 = vshll.u32 %v285_v22, 16  ;;  %v286_v29 = vpack.c.bf16 %v284_v24, %v282_v23  ;;  %v2894_v58 = vld [vmem:[%s4353_s3 + $0xa4] sm:$0xf]  ;;  %v2523_v61 = vor.u32 %v2930_v52, %v2520_v53  ;;  %v2486_v10 = vld [vmem:[%s4353_s3 + $0x180] sm:$0xf] }
  0x46   : > { %816 = vmatpush.bf16.msrb.mxu0 %v2063_v4  ;;  %v2379_v3 = vor.u32 %v2894_v58, %v2376_v59  ;;  %v2358_v4 = vld [vmem:[%s4353_s3 + $0x80] sm:$0xf]  ;;  %v2922_v12 = vld [vmem:[%s4353_s3 + $0x184] sm:$0xf]  ;;  %v2920_v23 = vld [vmem:[%s4353_s3 + $0x16c] sm:$0xf0] }
  0x47   : > { %829 = vmatpush.bf16.msrb.mxu1 %v2191_v6  ;;  %842 = vmatpush.bf16.msrb.mxu2 %v2067_v7  ;;  %v427_v35 = vrot.slane %v425_v28, 1  ;;  %v430_v36 = vshrl.u32 %v286_v29, 16  ;;  %v432_v37 = vshll.u32 %v286_v29, 16  ;;  %v2890_v6 = vld [vmem:[%s4353_s3 + $0x84] sm:$0xf]  ;;  %v2359_v14 = vor.u32 %v2892_v5, %v2358_v4  ;;  %s2872_s15 = sshll.u32 %s4357_s19, 4 }
  0x48   : > { %855 = vmatpush.bf16.msrb.mxu3 %v2195_v11  ;;  %v2360_v7 = vld [vmem:[%s4353_s3 + $0x90] sm:$0xf0]  ;;  %v2924_v11 = vld [vmem:[%s4353_s3 + $0x18c] sm:$0xf0]  ;;  %v2491_v21 = vor.u32 %v2922_v12, %v2488_v13  ;;  %v2470_v22 = vld [vmem:[%s4353_s3 + $0x160] sm:$0xf]  ;;  %s4336_s20 = scalar_lea.vmem %s4354_s4, %s2872_s15 }
  0x49   : > { %v3554_v43 = vor.u32 %v427_v35, %v423_v27  ;;  %v434_v44 = vrot.slane %v432_v37, 1  ;;  %v2363_v15 = vor.u32 %v2890_v6, %v2360_v7  ;;  %v2487_v20 = vor.u32 %v2924_v11, %v2486_v10  ;;  %v2918_v24 = vld [vmem:[%s4353_s3 + $0x164] sm:$0xf]  ;;  %v2472_v25 = vld [vmem:[%s4353_s3 + $0x170] sm:$0xf0] }
  0x4a   : > { %817 = vmatpush.bf16.msrb.mxu0 %v2047_v16  ;;  %v2342_v16 = vld [vmem:[%s4353_s3 + $0x60] sm:$0xf]  ;;  %v2884_v29 = vld [vmem:[%s4353_s3 + $0x4c] sm:$0xf0]  ;;  %v2882_v30 = vld [vmem:[%s4353_s3 + $0x44] sm:$0xf]  ;;  %v2471_v32 = vor.u32 %v2920_v23, %v2470_v22  ;;  %v2475_v33 = vor.u32 %v2918_v24, %v2472_v25 }
  0x4b   : > { %830 = vmatpush.bf16.msrb.mxu1 %v2175_v17  ;;  %843 = vmatpush.bf16.msrb.mxu2 %v2051_v18  ;;  %v3566_v50 = vor.u32 %v434_v44, %v430_v36  ;;  %v2888_v17 = vld [vmem:[%s4353_s3 + $0x6c] sm:$0xf0]  ;;  %v2886_v18 = vld [vmem:[%s4353_s3 + $0x64] sm:$0xf]  ;;  %v2326_v28 = vld [vmem:[%s4353_s3 + $0x40] sm:$0xf] }
  0x4c   : > { %856 = vmatpush.bf16.msrb.mxu3 %v2179_v19  ;;  %792 = vmatmul.bf16.vlgmr.msra.gmra.mxu2 %v3554_v43  ;;  %v2344_v19 = vld [vmem:[%s4353_s3 + $0x70] sm:$0xf0]  ;;  %v2343_v26 = vor.u32 %v2888_v17, %v2342_v16  ;;  %v2454_v34 = vld [vmem:[%s4353_s3 + $0x140] sm:$0xf]  ;;  %v2916_v35 = vld [vmem:[%s4353_s3 + $0x14c] sm:$0xf0]  ;;  %v2327_v38 = vor.u32 %v2884_v29, %v2326_v28 }
  0x4d   : > { %766 = vmatmul.bf16.vlgmr.msra.gmra.mxu0 %v3554_v43  ;;  %805 = vmatmul.bf16.vlgmr.msra.gmra.mxu3 %v3566_v50  ;;  %v2347_v27 = vor.u32 %v2886_v18, %v2344_v19  ;;  %v2328_v31 = vld [vmem:[%s4353_s3 + $0x50] sm:$0xf0]  ;;  %v2914_v36 = vld [vmem:[%s4353_s3 + $0x144] sm:$0xf]  ;;  %v2880_v41 = vld [vmem:[%s4353_s3 + $0x2c] sm:$0xf0]  ;;  %v2455_v44 = vor.u32 %v2916_v35, %v2454_v34 }
  0x4e   : > { %1182 = vmatpush.bf16.msra.mxu0 %v2407_v39  ;;  %779 = vmatmul.bf16.vlgmr.msra.gmra.mxu1 %v3566_v50  ;;  %v2456_v37 = vld [vmem:[%s4353_s3 + $0x150] sm:$0xf0]  ;;  %v2331_v39 = vor.u32 %v2882_v30, %v2328_v31  ;;  %v2878_v42 = vld [vmem:[%s4353_s3 + $0x24] sm:$0xf]  ;;  %v2438_v46 = vld [vmem:[%s4353_s3 + $0x120] sm:$0xf] }
  0x4f   : > { %1208 = vmatpush.bf16.msra.mxu2 %v2411_v40  ;;  %1195 = vmatpush.bf16.msra.mxu1 %v2535_v47  ;;  %v2310_v40 = vld [vmem:[%s4353_s3 + $0x20] sm:$0xf]  ;;  %v2459_v45 = vor.u32 %v2914_v36, %v2456_v37  ;;  %v2912_v47 = vld [vmem:[%s4353_s3 + $0x12c] sm:$0xf0]  ;;  %v2440_v49 = vld [vmem:[%s4353_s3 + $0x130] sm:$0xf0] }
  0x50   : > { %1221 = vmatpush.bf16.msra.mxu3 %v2539_v48  ;;  %v2910_v48 = vld [vmem:[%s4353_s3 + $0x124] sm:$0xf]  ;;  %v2294_v52 = vld [vmem:[%s4353_s3] sm:$0xf]  ;;  %v2876_v53 = vld [vmem:[%s4353_s3 + $0xc] sm:$0xf0]  ;;  %v2439_v59 = vor.u32 %v2912_v47, %v2438_v46 }
  0x51   : > { %v2874_v56 = vld [vmem:[%s4353_s3 + $0x4] sm:$0xf]  ;;  %v2296_v57 = vld [vmem:[%s4353_s3 + $0x10] sm:$0xf0]  ;;  %v2414_v58 = vld [vmem:[%s4353_s3 + $0xe8] sm:$0xf] }
  0x52   : > { %1183 = vmatpush.bf16.msra.mxu0 %v2391_v54  ;;  %v2422_v54 = vld [vmem:[%s4353_s3 + $0x100] sm:$0xf]  ;;  %v2903_v62 = vld [vmem:[%s4353_s3 + $0xec] sm:$0xf]  ;;  %v2416_v63 = vld [vmem:[%s4353_s3 + $0xf8] sm:$0xf0]  ;;  %v2299_v4 = vor.u32 %v2874_v56, %v2296_v57 }
  0x53   : > { %1209 = vmatpush.bf16.msra.mxu2 %v2395_v55  ;;  %1196 = vmatpush.bf16.msra.mxu1 %v2519_v60  ;;  %v2908_v55 = vld [vmem:[%s4353_s3 + $0x10c] sm:$0xf0]  ;;  %v2443_v60 = vor.u32 %v2910_v48, %v2440_v49  ;;  %v2906_v0 = vld [vmem:[%s4353_s3 + $0x104] sm:$0xf]  ;;  %v2424_v1 = vld [vmem:[%s4353_s3 + $0x110] sm:$0xf0] }
  0x54   : > { %1222 = vmatpush.bf16.msra.mxu3 %v2523_v61  ;;  %v2905_v61 = vld [vmem:[%s4353_s3 + $0xf4] sm:$0xf0]  ;;  %v2935_v6 = vld [vmem:[%s4353_s3 + $0x1ec] sm:$0xf]  ;;  %v2544_v7 = vld [vmem:[%s4353_s3 + $0x1f8] sm:$0xf0]  ;;  %v2423_v11 = vor.u32 %v2908_v55, %v2422_v54  ;;  %v2427_v12 = vor.u32 %v2906_v0, %v2424_v1 }
  0x55   : > { %v2937_v5 = vld [vmem:[%s4353_s3 + $0x1f4] sm:$0xf0]  ;;  %v277_v10 = vld [vmem:[#allocation2 + $0x10] sm:$0xff]  ;;  %v278_v13 = vld [vmem:[#allocation2] sm:$0xff]  ;;  %v2547_v17 = vor.u32 %v2935_v6, %v2544_v7  ;;  %vm1820_vm2 = vcmask 1040384   ;;  %vm1822_vm3 = vcmask 1042434  }
  0x56   : > { %1184 = vmatpush.bf16.msra.mxu0 %v2375_v2  ;;  %v2542_v2 = vld [vmem:[%s4353_s3 + $0x1e8] sm:$0xf]  ;;  %v2899_v19 = vld [vmem:[%s4353_s3 + $0xcc] sm:$0xf]  ;;  %v2933_v22 = vld [vmem:[%s4353_s3 + $0x1d4] sm:$0xf0]  ;;  %v3778_v25 = vpack.c.bf16 %v278_v13, %v278_v13 }
  0x57   : > { %1210 = vmatpush.bf16.msra.mxu2 %v2379_v3  ;;  %1197 = vmatpush.bf16.msra.mxu1 %v2503_v8  ;;  %v2295_v3 = vor.u32 %v2876_v53, %v2294_v52  ;;  %v2415_v8 = vor.u32 %v2905_v61, %v2414_v58  ;;  %v2543_v16 = vor.u32 %v2937_v5, %v2542_v2  ;;  %v2526_v18 = vld [vmem:[%s4353_s3 + $0x1c8] sm:$0xf]  ;;  %v2931_v23 = vld [vmem:[%s4353_s3 + $0x1cc] sm:$0xf]  ;;  %v2528_v24 = vld [vmem:[%s4353_s3 + $0x1d8] sm:$0xf0] }
  0x58   : > { %1223 = vmatpush.bf16.msra.mxu3 %v2507_v9  ;;  %v2419_v9 = vor.u32 %v2903_v62, %v2416_v63  ;;  %v2382_v28 = vld [vmem:[%s4353_s3 + $0xa8] sm:$0xf]  ;;  %v2897_v29 = vld [vmem:[%s4353_s3 + $0xb4] sm:$0xf0]  ;;  %v2527_v30 = vor.u32 %v2933_v22, %v2526_v18  ;;  %v2531_v31 = vor.u32 %v2931_v23, %v2528_v24  ;;  %v2384_v34 = vld [vmem:[%s4353_s3 + $0xb8] sm:$0xf0] }
  0x59   : > { %v2929_v35 = vld [vmem:[%s4353_s3 + $0x1b4] sm:$0xf0]  ;;  %v2927_v36 = vld [vmem:[%s4353_s3 + $0x1ac] sm:$0xf]  ;;  %v2512_v37 = vld [vmem:[%s4353_s3 + $0x1b8] sm:$0xf0] }
  0x5a   : > { %1185 = vmatpush.bf16.msra.mxu0 %v2359_v14  ;;  %v2398_v14 = vld [vmem:[%s4353_s3 + $0xc8] sm:$0xf]  ;;  %v2368_v46 = vld [vmem:[%s4353_s3 + $0x98] sm:$0xf0]  ;;  %v2925_v47 = vld [vmem:[%s4353_s3 + $0x194] sm:$0xf0] }
  0x5b   : > { %1211 = vmatpush.bf16.msra.mxu2 %v2363_v15  ;;  %1198 = vmatpush.bf16.msra.mxu1 %v2487_v20  ;;  %v2901_v15 = vld [vmem:[%s4353_s3 + $0xd4] sm:$0xf0]  ;;  %v2400_v20 = vld [vmem:[%s4353_s3 + $0xd8] sm:$0xf0]  ;;  %v2923_v48 = vld [vmem:[%s4353_s3 + $0x18c] sm:$0xf] }
  0x5c   : > { %1224 = vmatpush.bf16.msra.mxu3 %v2491_v21  ;;  %844 = vmatmul.bf16.vlgmr.msrb.gmra.mxu2 %v3554_v43  ;;  %v3767_v21 = vpack.c.bf16 %v277_v10, %v277_v10  ;;  %v2496_v49 = vld [vmem:[%s4353_s3 + $0x198] sm:$0xf0]  ;;  %v2350_v52 = vld [vmem:[%s4353_s3 + $0x68] sm:$0xf]  ;;  %v2889_v53 = vld [vmem:[%s4353_s3 + $0x74] sm:$0xf0] }
  0x5d   : > { %818 = vmatmul.bf16.vlgmr.msrb.gmra.mxu0 %v3554_v43  ;;  %857 = vmatmul.bf16.vlgmr.msrb.gmra.mxu3 %v3566_v50  ;;  %v2312_v43 = vld [vmem:[%s4353_s3 + $0x30] sm:$0xf0]  ;;  %v2499_v55 = vor.u32 %v2923_v48, %v2496_v49  ;;  %v2478_v56 = vld [vmem:[%s4353_s3 + $0x168] sm:$0xf]  ;;  %v2887_v57 = vld [vmem:[%s4353_s3 + $0x6c] sm:$0xf]  ;;  %v2351_v62 = vor.u32 %v2889_v53, %v2350_v52 }
  0x5e   : > { %1186 = vmatpush.bf16.msra.mxu0 %v2343_v26  ;;  %831 = vmatmul.bf16.vlgmr.msrb.gmra.mxu1 %v3566_v50  ;;  %v2311_v50 = vor.u32 %v2880_v41, %v2310_v40  ;;  %v2315_v51 = vor.u32 %v2878_v42, %v2312_v43  ;;  %v2399_v26 = vor.u32 %v2901_v15, %v2398_v14  ;;  %v2366_v40 = vld [vmem:[%s4353_s3 + $0x88] sm:$0xf]  ;;  %v2893_v41 = vld [vmem:[%s4353_s3 + $0x94] sm:$0xf0]  ;;  %v2352_v58 = vld [vmem:[%s4353_s3 + $0x78] sm:$0xf0] }
  0x5f   : > { %1212 = vmatpush.bf16.msra.mxu2 %v2347_v27  ;;  %1199 = vmatpush.bf16.msra.mxu1 %v2471_v32  ;;  %v2403_v27 = vor.u32 %v2899_v19, %v2400_v20  ;;  %v2510_v32 = vld [vmem:[%s4353_s3 + $0x1a8] sm:$0xf]  ;;  %v2515_v43 = vor.u32 %v2927_v36, %v2512_v37  ;;  %v2480_v61 = vld [vmem:[%s4353_s3 + $0x178] sm:$0xf0]  ;;  %v2355_v63 = vor.u32 %v2887_v57, %v2352_v58  ;;  %v2885_v1 = vld [vmem:[%s4353_s3 + $0x54] sm:$0xf0] }
  0x60   : > { %1225 = vmatpush.bf16.msra.mxu3 %v2475_v33  ;;  %v2895_v33 = vld [vmem:[%s4353_s3 + $0xac] sm:$0xf]  ;;  %v2511_v42 = vor.u32 %v2929_v35, %v2510_v32  ;;  %v2334_v0 = vld [vmem:[%s4353_s3 + $0x48] sm:$0xf]  ;;  %v2336_v6 = vld [vmem:[%s4353_s3 + $0x58] sm:$0xf0] }
  0x61   : > { %v2883_v5 = vld [vmem:[%s4353_s3 + $0x4c] sm:$0xf]  ;;  %v2917_v7 = vld [vmem:[%s4353_s3 + $0x154] sm:$0xf0]  ;;  %v2335_v10 = vor.u32 %v2885_v1, %v2334_v0  ;;  %v2320_v18 = vld [vmem:[%s4353_s3 + $0x38] sm:$0xf0] }
  0x62   : > { %1187 = vmatpush.bf16.msra.mxu0 %v2327_v38  ;;  %v2383_v38 = vor.u32 %v2897_v29, %v2382_v28  ;;  %v2881_v13 = vld [vmem:[%s4353_s3 + $0x34] sm:$0xf0]  ;;  %v2911_v20 = vld [vmem:[%s4353_s3 + $0x12c] sm:$0xf]  ;;  %v2448_v22 = vld [vmem:[%s4353_s3 + $0x138] sm:$0xf0] }
  0x63   : > { %1213 = vmatpush.bf16.msra.mxu2 %v2331_v39  ;;  %1200 = vmatpush.bf16.msra.mxu1 %v2455_v44  ;;  %v2387_v39 = vor.u32 %v2895_v33, %v2384_v34  ;;  %v2494_v44 = vld [vmem:[%s4353_s3 + $0x188] sm:$0xf]  ;;  %v2913_v19 = vld [vmem:[%s4353_s3 + $0x134] sm:$0xf0]  ;;  %v2875_v32 = vld [vmem:[%s4353_s3 + $0xc] sm:$0xf] }
  0x64   : > { %1226 = vmatpush.bf16.msra.mxu3 %v2459_v45  ;;  %v2891_v45 = vld [vmem:[%s4353_s3 + $0x8c] sm:$0xf]  ;;  %v2495_v54 = vor.u32 %v2925_v47, %v2494_v44  ;;  %v2302_v23 = vld [vmem:[%s4353_s3 + $0x8] sm:$0xf]  ;;  %v2909_v29 = vld [vmem:[%s4353_s3 + $0x114] sm:$0xf0] }
  0x65   : > { %v2430_v28 = vld [vmem:[%s4353_s3 + $0x108] sm:$0xf]  ;;  %v2304_v33 = vld [vmem:[%s4353_s3 + $0x18] sm:$0xf0]  ;;  %v2907_v34 = vld [vmem:[%s4353_s3 + $0x10c] sm:$0xf] }
  0x66   : > { %1188 = vmatpush.bf16.msra.mxu0 %v2311_v50  ;;  %v2367_v50 = vor.u32 %v2893_v41, %v2366_v40  ;;  %v2432_v35 = vld [vmem:[%s4353_s3 + $0x118] sm:$0xf0]  ;;  %v2726_v36 = vld [vmem:[%s4353_s3 + $0x4e0] sm:$0xf]  ;;  %v3032_v37 = vld [vmem:[%s4353_s3 + $0x4ec] sm:$0xf0] }
  0x67   : > { %1214 = vmatpush.bf16.msra.mxu2 %v2315_v51  ;;  %1201 = vmatpush.bf16.msra.mxu1 %v2439_v59  ;;  %v2371_v51 = vor.u32 %v2891_v45, %v2368_v46  ;;  %v2921_v59 = vld [vmem:[%s4353_s3 + $0x174] sm:$0xf0]  ;;  %v3030_v40 = vld [vmem:[%s4353_s3 + $0x4e4] sm:$0xf]  ;;  %v2856_v45 = vld [vmem:[%s4353_s3 + $0x5f0] sm:$0xf0]  ;;  %v2431_v46 = vor.u32 %v2909_v29, %v2430_v28  ;;  %v2435_v47 = vor.u32 %v2907_v34, %v2432_v35 }
  0x68   : > { %1227 = vmatpush.bf16.msra.mxu3 %v2443_v60  ;;  %v2919_v60 = vld [vmem:[%s4353_s3 + $0x16c] sm:$0xf]  ;;  %v2479_v2 = vor.u32 %v2921_v59, %v2478_v56  ;;  %v3062_v44 = vld [vmem:[%s4353_s3 + $0x5e4] sm:$0xf]  ;;  %v2727_v48 = vor.u32 %v3032_v37, %v2726_v36  ;;  %v2712_v57 = vld [vmem:[%s4353_s3 + $0x4d0] sm:$0xf0] }
  0x69   : > { %v2859_v53 = vor.u32 %v3062_v44, %v2856_v45  ;;  %v3026_v56 = vld [vmem:[%s4353_s3 + $0x4c4] sm:$0xf]  ;;  %v2840_v59 = vld [vmem:[%s4353_s3 + $0x5d0] sm:$0xf0]  ;;  %v2646_v34 = vld [vmem:[%s4353_s3 + $0x440] sm:$0xf] }
  0x6a   : > { %1189 = vmatpush.bf16.msra.mxu0 %v2295_v3  ;;  %v2483_v3 = vor.u32 %v2919_v60, %v2480_v61  ;;  %v3058_v58 = vld [vmem:[%s4353_s3 + $0x5c4] sm:$0xf]  ;;  %v2715_v0 = vor.u32 %v3026_v56, %v2712_v57  ;;  %v2664_v29 = vld [vmem:[%s4353_s3 + $0x470] sm:$0xf0]  ;;  %v3012_v35 = vld [vmem:[%s4353_s3 + $0x44c] sm:$0xf0] }
  0x6b   : > { %1215 = vmatpush.bf16.msra.mxu2 %v2299_v4  ;;  %1202 = vmatpush.bf16.msra.mxu1 %v2423_v11  ;;  %v2462_v4 = vld [vmem:[%s4353_s3 + $0x148] sm:$0xf]  ;;  %v2339_v11 = vor.u32 %v2883_v5, %v2336_v6  ;;  %v2843_v1 = vor.u32 %v3058_v58, %v2840_v59  ;;  %v2696_v5 = vld [vmem:[%s4353_s3 + $0x4b0] sm:$0xf0]  ;;  %v3054_v6 = vld [vmem:[%s4353_s3 + $0x5a4] sm:$0xf]  ;;  %v2647_v44 = vor.u32 %v3012_v35, %v2646_v34 }
  0x6c   : > { %1228 = vmatpush.bf16.msra.mxu3 %v2427_v12  ;;  %v2318_v12 = vld [vmem:[%s4353_s3 + $0x28] sm:$0xf]  ;;  %v2463_v14 = vor.u32 %v2917_v7, %v2462_v4  ;;  %v3022_v4 = vld [vmem:[%s4353_s3 + $0x4a4] sm:$0xf]  ;;  %v2824_v7 = vld [vmem:[%s4353_s3 + $0x5b0] sm:$0xf0] }
  0x6d   : > { %1190 = vmatmul.bf16.vlgmr.msra.gmra.mxu0 %v3767_v21  ;;  %v2319_v24 = vor.u32 %v2881_v13, %v2318_v12  ;;  %v2827_v12 = vor.u32 %v3054_v6, %v2824_v7  ;;  %v3052_v13 = vld [vmem:[%s4353_s3 + $0x58c] sm:$0xf0]  ;;  %v3014_v28 = vld [vmem:[%s4353_s3 + $0x464] sm:$0xf]  ;;  %v2614_v56 = vld [vmem:[%s4353_s3 + $0x400] sm:$0xf] }
  0x6e   : > { %1234 = vmatpush.bf16.msrb.mxu0 %v2415_v8  ;;  %1216 = vmatmul.bf16.vlgmr.msra.gmra.mxu2 %v3767_v21  ;;  %v2915_v8 = vld [vmem:[%s4353_s3 + $0x14c] sm:$0xf]  ;;  %v2667_v36 = vor.u32 %v3014_v28, %v2664_v29  ;;  %v3004_v57 = vld [vmem:[%s4353_s3 + $0x40c] sm:$0xf0]  ;;  %v2742_v58 = vld [vmem:[%s4353_s3 + $0x500] sm:$0xf] }
  0x6f   : > { %1260 = vmatpush.bf16.msrb.mxu2 %v2419_v9  ;;  %1247 = vmatpush.bf16.msrb.mxu1 %v2543_v16  ;;  %v2464_v9 = vld [vmem:[%s4353_s3 + $0x158] sm:$0xf0]  ;;  %v2446_v16 = vld [vmem:[%s4353_s3 + $0x128] sm:$0xf]  ;;  %v3036_v59 = vld [vmem:[%s4353_s3 + $0x50c] sm:$0xf0] }
  0x70   : > { %1273 = vmatpush.bf16.msrb.mxu3 %v2547_v17  ;;  %1203 = vmatmul.bf16.vlgmr.msra.gmra.mxu1 %v3778_v25  ;;  %v2467_v15 = vor.u32 %v2915_v8, %v2464_v9  ;;  %v2879_v17 = vld [vmem:[%s4353_s3 + $0x2c] sm:$0xf]  ;;  %v2678_v9 = vld [vmem:[%s4353_s3 + $0x480] sm:$0xf]  ;;  %v290_v6 = vld [vmem:[#allocation2 + $0x8] sm:$0x3] }
  0x71   : > { %1229 = vmatmul.bf16.vlgmr.msra.gmra.mxu3 %v3778_v25  ;;  %v2744_v7 = vld [vmem:[%s4353_s3 + $0x510] sm:$0xf0]  ;;  %v3061_v29 = vld [vmem:[%s4353_s3 + $0x5d4] sm:$0xf0]  ;;  %v3059_v34 = vld [vmem:[%s4353_s3 + $0x5cc] sm:$0xf] }
  0x72   : > { %1235 = vmatpush.bf16.msrb.mxu0 %v2399_v26  ;;  %v2323_v26 = vor.u32 %v2879_v17, %v2320_v18  ;;  %v2808_v17 = vld [vmem:[%s4353_s3 + $0x590] sm:$0xf0]  ;;  %v2848_v35 = vld [vmem:[%s4353_s3 + $0x5d8] sm:$0xf0]  ;;  %vm1824_vm4 = vcmask 1041408  }
  0x73   : > { %1261 = vmatpush.bf16.msrb.mxu2 %v2403_v27  ;;  %1248 = vmatpush.bf16.msrb.mxu1 %v2527_v30  ;;  %v2877_v27 = vld [vmem:[%s4353_s3 + $0x14] sm:$0xf0]  ;;  %v2447_v30 = vor.u32 %v2913_v19, %v2446_v16  ;;  %v3050_v16 = vld [vmem:[%s4353_s3 + $0x584] sm:$0xf] }
  0x74   : > { %1274 = vmatpush.bf16.msrb.mxu3 %v2531_v31  ;;  %v2451_v31 = vor.u32 %v2911_v20, %v2448_v22  ;;  %v2303_v41 = vor.u32 %v2877_v27, %v2302_v23  ;;  %v2662_v20 = vld [vmem:[%s4353_s3 + $0x460] sm:$0xf]  ;;  %v3016_v22 = vld [vmem:[%s4353_s3 + $0x46c] sm:$0xf0] }
  0x75   : > { %v3048_v27 = vld [vmem:[%s4353_s3 + $0x56c] sm:$0xf0] }
  0x76   : > { %1236 = vmatpush.bf16.msrb.mxu0 %v2383_v38  ;;  %v2854_v38 = vld [vmem:[%s4353_s3 + $0x5e0] sm:$0xf] }
  0x77   : > { %1262 = vmatpush.bf16.msrb.mxu2 %v2387_v39  ;;  %1249 = vmatpush.bf16.msrb.mxu1 %v2511_v42  ;;  %v3064_v39 = vld [vmem:[%s4353_s3 + $0x5ec] sm:$0xf0]  ;;  %v2307_v42 = vor.u32 %v2875_v32, %v2304_v33  ;;  %v2663_v32 = vor.u32 %v3016_v22, %v2662_v20 }
  0x78   : > { %1275 = vmatpush.bf16.msrb.mxu3 %v2515_v43  ;;  %v2728_v43 = vld [vmem:[%s4353_s3 + $0x4f0] sm:$0xf0]  ;;  %v2855_v49 = vor.u32 %v3064_v39, %v2854_v38  ;;  %v2774_v38 = vld [vmem:[%s4353_s3 + $0x540] sm:$0xf]  ;;  %v3044_v39 = vld [vmem:[%s4353_s3 + $0x54c] sm:$0xf0] }
  0x79   : > { %v2731_v52 = vor.u32 %v3030_v40, %v2728_v43  ;;  %v3010_v40 = vld [vmem:[%s4353_s3 + $0x444] sm:$0xf]  ;;  %v2776_v43 = vld [vmem:[%s4353_s3 + $0x550] sm:$0xf0]  ;;  %v2775_v45 = vor.u32 %v3044_v39, %v2774_v38  ;;  %v2702_v38 = vld [vmem:[%s4353_s3 + $0x4a8] sm:$0xf] }
  0x7a   : > { %1237 = vmatpush.bf16.msrb.mxu0 %v2367_v50  ;;  %v2710_v50 = vld [vmem:[%s4353_s3 + $0x4c0] sm:$0xf]  ;;  %v3025_v39 = vld [vmem:[%s4353_s3 + $0x4b4] sm:$0xf0] }
  0x7b   : > { %1263 = vmatpush.bf16.msrb.mxu2 %v2371_v51  ;;  %1250 = vmatpush.bf16.msrb.mxu1 %v2495_v54  ;;  %v3028_v51 = vld [vmem:[%s4353_s3 + $0x4cc] sm:$0xf0]  ;;  %v2838_v54 = vld [vmem:[%s4353_s3 + $0x5c0] sm:$0xf] }
  0x7c   : > { %1276 = vmatpush.bf16.msrb.mxu3 %v2499_v55  ;;  %v3060_v55 = vld [vmem:[%s4353_s3 + $0x5cc] sm:$0xf0]  ;;  %v2711_v60 = vor.u32 %v3028_v51, %v2710_v50 }
  0x7d   : > { %v2839_v61 = vor.u32 %v3060_v55, %v2838_v54  ;;  %v3040_v51 = vld [vmem:[%s4353_s3 + $0x52c] sm:$0xf0]  ;;  %v3038_v54 = vld [vmem:[%s4353_s3 + $0x524] sm:$0xf]  ;;  %v2760_v55 = vld [vmem:[%s4353_s3 + $0x530] sm:$0xf0] }
  0x7e   : > { %1238 = vmatpush.bf16.msrb.mxu0 %v2351_v62  ;;  %v2694_v62 = vld [vmem:[%s4353_s3 + $0x4a0] sm:$0xf] }
  0x7f   : > { %1264 = vmatpush.bf16.msrb.mxu2 %v2355_v63  ;;  %1251 = vmatpush.bf16.msrb.mxu1 %v2479_v2  ;;  %v3024_v63 = vld [vmem:[%s4353_s3 + $0x4ac] sm:$0xf0]  ;;  %v2822_v2 = vld [vmem:[%s4353_s3 + $0x5a0] sm:$0xf] }
  0x80   : > { %1277 = vmatpush.bf16.msrb.mxu3 %v2483_v3  ;;  %v3056_v3 = vld [vmem:[%s4353_s3 + $0x5ac] sm:$0xf0]  ;;  %v2695_v8 = vor.u32 %v3024_v63, %v2694_v62  ;;  %v3002_v62 = vld [vmem:[%s4353_s3 + $0x404] sm:$0xf]  ;;  %v2616_v63 = vld [vmem:[%s4353_s3 + $0x410] sm:$0xf0] }
  0x82   : > { %1239 = vmatpush.bf16.msrb.mxu0 %v2335_v10  ;;  %v3020_v10 = vld [vmem:[%s4353_s3 + $0x48c] sm:$0xf0] }
  0x83   : > { %1265 = vmatpush.bf16.msrb.mxu2 %v2339_v11  ;;  %1252 = vmatpush.bf16.msrb.mxu1 %v2463_v14  ;;  %v2699_v11 = vor.u32 %v3022_v4, %v2696_v5  ;;  %v3018_v14 = vld [vmem:[%s4353_s3 + $0x484] sm:$0xf]  ;;  %v2679_v18 = vor.u32 %v3020_v10, %v2678_v9  ;;  %v289_v4 = vld [vmem:[#allocation2 + $0x18] sm:$0x3]  ;;  %v2615_v9 = vor.u32 %v3004_v57, %v2614_v56  ;;  %v2862_v10 = vld [vmem:[%s4353_s3 + $0x5e8] sm:$0xf] }
  0x84   : > { %1278 = vmatpush.bf16.msrb.mxu3 %v2467_v15  ;;  %v2680_v15 = vld [vmem:[%s4353_s3 + $0x490] sm:$0xf0]  ;;  %v288_v5 = vld [vmem:[#allocation2] sm:$0xfc]  ;;  %v3019_v56 = vld [vmem:[%s4353_s3 + $0x48c] sm:$0xf] }
  0x85   : > { %v2683_v23 = vor.u32 %v3018_v14, %v2680_v15  ;;  %v3063_v14 = vld [vmem:[%s4353_s3 + $0x5ec] sm:$0xf]  ;;  %v2864_v15 = vld [vmem:[%s4353_s3 + $0x5f8] sm:$0xf0] }
  0x86   : > { %1240 = vmatpush.bf16.msrb.mxu0 %v2319_v24  ;;  %v2811_v24 = vor.u32 %v3050_v16, %v2808_v17  ;;  %v292_v17 = vpack.c.bf16 %v290_v6, %v288_v5  ;;  %v2867_v28 = vor.u32 %v3063_v14, %v2864_v15  ;;  %v2688_v57 = vld [vmem:[%s4353_s3 + $0x498] sm:$0xf0]  ;;  %v3047_v6 = vld [vmem:[%s4353_s3 + $0x56c] sm:$0xf] }
  0x87   : > { %1266 = vmatpush.bf16.msrb.mxu2 %v2323_v26  ;;  %1253 = vmatpush.bf16.msrb.mxu1 %v2447_v30  ;;  %v2790_v26 = vld [vmem:[%s4353_s3 + $0x560] sm:$0xf]  ;;  %v3046_v30 = vld [vmem:[%s4353_s3 + $0x564] sm:$0xf]  ;;  %v2672_v5 = vld [vmem:[%s4353_s3 + $0x478] sm:$0xf0] }
  0x88   : > { %1279 = vmatpush.bf16.msrb.mxu3 %v2451_v31  ;;  %v2792_v31 = vld [vmem:[%s4353_s3 + $0x570] sm:$0xf0]  ;;  %v2791_v33 = vor.u32 %v3048_v27, %v2790_v26  ;;  %v2846_v26 = vld [vmem:[%s4353_s3 + $0x5c8] sm:$0xf]  ;;  %v3011_v14 = vld [vmem:[%s4353_s3 + $0x44c] sm:$0xf] }
  0x89   : > { %v2795_v37 = vor.u32 %v3046_v30, %v2792_v31  ;;  %v3027_v30 = vld [vmem:[%s4353_s3 + $0x4cc] sm:$0xf]  ;;  %v2720_v31 = vld [vmem:[%s4353_s3 + $0x4d8] sm:$0xf0] }
  0x8a   : > { %1241 = vmatpush.bf16.msrb.mxu0 %v2303_v41  ;;  %v2648_v41 = vld [vmem:[%s4353_s3 + $0x450] sm:$0xf0]  ;;  %v2656_v15 = vld [vmem:[%s4353_s3 + $0x458] sm:$0xf0] }
  0x8b   : > { %1267 = vmatpush.bf16.msrb.mxu2 %v2307_v42  ;;  %1254 = vmatpush.bf16.msrb.mxu1 %v2431_v46  ;;  %v3042_v42 = vld [vmem:[%s4353_s3 + $0x544] sm:$0xf]  ;;  %v2630_v46 = vld [vmem:[%s4353_s3 + $0x420] sm:$0xf] }
  0x8c   : > { %1280 = vmatpush.bf16.msrb.mxu3 %v2435_v47  ;;  %v3008_v47 = vld [vmem:[%s4353_s3 + $0x42c] sm:$0xf0]  ;;  %v2779_v50 = vor.u32 %v3042_v42, %v2776_v43  ;;  %v2830_v42 = vld [vmem:[%s4353_s3 + $0x5a8] sm:$0xf]  ;;  %v3057_v43 = vld [vmem:[%s4353_s3 + $0x5b4] sm:$0xf0] }
  0x8d   : > { %1242 = vmatmul.bf16.vlgmr.msrb.gmra.mxu0 %v3767_v21 }
  0x8e   : > { %1677 = vmatpush.bf16.msra.mxu0 %v2727_v48  ;;  %1268 = vmatmul.bf16.vlgmr.msrb.gmra.mxu2 %v3767_v21  ;;  %v2823_v21 = vor.u32 %v3056_v3, %v2822_v2  ;;  %v2758_v48 = vld [vmem:[%s4353_s3 + $0x520] sm:$0xf]  ;;  %v2763_v3 = vor.u32 %v3038_v54, %v2760_v55  ;;  %v2814_v54 = vld [vmem:[%s4353_s3 + $0x588] sm:$0xf]  ;;  %v3053_v55 = vld [vmem:[%s4353_s3 + $0x594] sm:$0xf0] }
  0x8f   : > { %1690 = vmatpush.bf16.msra.mxu1 %v2855_v49  ;;  %1703 = vmatpush.bf16.msra.mxu2 %v2731_v52  ;;  %v2651_v49 = vor.u32 %v3010_v40, %v2648_v41  ;;  %v3006_v52 = vld [vmem:[%s4353_s3 + $0x424] sm:$0xf]  ;;  %v2723_v40 = vor.u32 %v3027_v30, %v2720_v31  ;;  %v2851_v41 = vor.u32 %v3059_v34, %v2848_v35  ;;  %v3039_v30 = vld [vmem:[%s4353_s3 + $0x52c] sm:$0xf]  ;;  %v2768_v31 = vld [vmem:[%s4353_s3 + $0x538] sm:$0xf0] }
  0x90   : > { %1716 = vmatpush.bf16.msra.mxu3 %v2859_v53  ;;  %1255 = vmatmul.bf16.vlgmr.msrb.gmra.mxu1 %v3778_v25  ;;  %v2632_v53 = vld [vmem:[%s4353_s3 + $0x430] sm:$0xf0] }
  0x91   : > { %1281 = vmatmul.bf16.vlgmr.msrb.gmra.mxu3 %v3778_v25  ;;  %v2806_v25 = vld [vmem:[%s4353_s3 + $0x580] sm:$0xf]  ;;  %v2635_v2 = vor.u32 %v3006_v52, %v2632_v53 }
  0x92   : > { %1678 = vmatpush.bf16.msra.mxu0 %v2711_v60  ;;  %v2807_v19 = vor.u32 %v3052_v13, %v2806_v25  ;;  %v2631_v60 = vor.u32 %v3008_v47, %v2630_v46  ;;  %v2743_v25 = vor.u32 %v3036_v59, %v2742_v58  ;;  %v2736_v13 = vld [vmem:[%s4353_s3 + $0x4f8] sm:$0xf0]  ;;  %v3055_v46 = vld [vmem:[%s4353_s3 + $0x5ac] sm:$0xf] }
  0x93   : > { %1691 = vmatpush.bf16.msra.mxu1 %v2839_v61  ;;  %1704 = vmatpush.bf16.msra.mxu2 %v2715_v0  ;;  %v2759_v61 = vor.u32 %v3040_v51, %v2758_v48  ;;  %v3034_v0 = vld [vmem:[%s4353_s3 + $0x504] sm:$0xf]  ;;  %v2832_v47 = vld [vmem:[%s4353_s3 + $0x5b8] sm:$0xf0]  ;;  %v2703_v48 = vor.u32 %v3025_v39, %v2702_v38  ;;  %v3021_v51 = vld [vmem:[%s4353_s3 + $0x494] sm:$0xf0]  ;;  %v2771_v39 = vor.u32 %v3039_v30, %v2768_v31 }
  0x94   : > { %1717 = vmatpush.bf16.msra.mxu3 %v2843_v1  ;;  %v287_v1 = vld [vmem:[#allocation2 + $0x10] sm:$0xfc]  ;;  %v2835_v53 = vor.u32 %v3055_v46, %v2832_v47  ;;  %v3051_v58 = vld [vmem:[%s4353_s3 + $0x58c] sm:$0xf]  ;;  %v2816_v59 = vld [vmem:[%s4353_s3 + $0x598] sm:$0xf0] }
  0x95   : > { %v291_v16 = vpack.c.bf16 %v289_v4, %v287_v1  ;;  %v2819_v1 = vor.u32 %v3051_v58, %v2816_v59  ;;  %v3015_v4 = vld [vmem:[%s4353_s3 + $0x46c] sm:$0xf] }
  0x96   : > { %1679 = vmatpush.bf16.msra.mxu0 %v2695_v8  ;;  %v2734_v8 = vld [vmem:[%s4353_s3 + $0x4e8] sm:$0xf] }
  0x97   : > { %1692 = vmatpush.bf16.msra.mxu1 %v2823_v21  ;;  %1705 = vmatpush.bf16.msra.mxu2 %v2699_v11  ;;  %v3033_v21 = vld [vmem:[%s4353_s3 + $0x4f4] sm:$0xf0] }
  0x98   : > { %1718 = vmatpush.bf16.msra.mxu3 %v2827_v12  ;;  %v3065_v11 = vld [vmem:[%s4353_s3 + $0x5f4] sm:$0xf0]  ;;  %v3031_v12 = vld [vmem:[%s4353_s3 + $0x4ec] sm:$0xf]  ;;  %v2735_v20 = vor.u32 %v3033_v21, %v2734_v8 }
  0x99   : > { %v2863_v22 = vor.u32 %v3065_v11, %v2862_v10  ;;  %v2739_v27 = vor.u32 %v3031_v12, %v2736_v13  ;;  %v3013_v10 = vld [vmem:[%s4353_s3 + $0x454] sm:$0xf0]  ;;  %v2675_v11 = vor.u32 %v3015_v4, %v2672_v5 }
  0x9a   : > { %1680 = vmatpush.bf16.msra.mxu0 %v2679_v18  ;;  %v2619_v18 = vor.u32 %v3002_v62, %v2616_v63  ;;  %v2670_v62 = vld [vmem:[%s4353_s3 + $0x468] sm:$0xf]  ;;  %v3017_v63 = vld [vmem:[%s4353_s3 + $0x474] sm:$0xf0] }
  0x9b   : > { %1693 = vmatpush.bf16.msra.mxu1 %v2807_v19  ;;  %1706 = vmatpush.bf16.msra.mxu2 %v2683_v23  ;;  %v2747_v19 = vor.u32 %v3034_v0, %v2744_v7  ;;  %v2718_v23 = vld [vmem:[%s4353_s3 + $0x4c8] sm:$0xf]  ;;  %v2691_v0 = vor.u32 %v3019_v56, %v2688_v57  ;;  %v2800_v7 = vld [vmem:[%s4353_s3 + $0x578] sm:$0xf0]  ;;  %v2671_v8 = vor.u32 %v3017_v63, %v2670_v62  ;;  %v3045_v13 = vld [vmem:[%s4353_s3 + $0x554] sm:$0xf0] }
  0x9c   : > { %1719 = vmatpush.bf16.msra.mxu3 %v2811_v24  ;;  %v3029_v24 = vld [vmem:[%s4353_s3 + $0x4d4] sm:$0xf0]  ;;  %v2803_v12 = vor.u32 %v3047_v6, %v2800_v7 }
  0x9e   : > { %1681 = vmatpush.bf16.msra.mxu0 %v2663_v32  ;;  %v4166_v32 = vrot.slane %v291_v16, 1  ;;  %v3043_v16 = vld [vmem:[%s4353_s3 + $0x54c] sm:$0xf] }
  0x9f   : > { %1694 = vmatpush.bf16.msra.mxu1 %v2791_v33  ;;  %1707 = vmatpush.bf16.msra.mxu2 %v2667_v36  ;;  %v4168_v33 = vrot.slane %v292_v17, 1  ;;  %v2719_v36 = vor.u32 %v3029_v24, %v2718_v23  ;;  %v2784_v17 = vld [vmem:[%s4353_s3 + $0x558] sm:$0xf0]  ;;  %v2659_v23 = vor.u32 %v3011_v14, %v2656_v15 }
  0xa0   : > { %1720 = vmatpush.bf16.msra.mxu3 %v2795_v37  ;;  %v2847_v37 = vor.u32 %v3061_v29, %v2846_v26  ;;  %v2787_v24 = vor.u32 %v3043_v16, %v2784_v17  ;;  %v2766_v26 = vld [vmem:[%s4353_s3 + $0x528] sm:$0xf]  ;;  %v2640_v29 = vld [vmem:[%s4353_s3 + $0x438] sm:$0xf0] }
  0xa2   : > { %1682 = vmatpush.bf16.msra.mxu0 %v2647_v44  ;;  %v3023_v44 = vld [vmem:[%s4353_s3 + $0x4ac] sm:$0xf] }
  0xa3   : > { %1695 = vmatpush.bf16.msra.mxu1 %v2775_v45  ;;  %1708 = vmatpush.bf16.msra.mxu2 %v2651_v49  ;;  %v2704_v45 = vld [vmem:[%s4353_s3 + $0x4b8] sm:$0xf0]  ;;  %v2831_v49 = vor.u32 %v3057_v43, %v2830_v42  ;;  %v3003_v42 = vld [vmem:[%s4353_s3 + $0x40c] sm:$0xf] }
  0xa4   : > { %1721 = vmatpush.bf16.msra.mxu3 %v2779_v50  ;;  %v2686_v50 = vld [vmem:[%s4353_s3 + $0x488] sm:$0xf]  ;;  %v2707_v52 = vor.u32 %v3023_v44, %v2704_v45  ;;  %v2624_v43 = vld [vmem:[%s4353_s3 + $0x418] sm:$0xf0]  ;;  %v3035_v44 = vld [vmem:[%s4353_s3 + $0x50c] sm:$0xf] }
  0xa5   : > { %v2752_v45 = vld [vmem:[%s4353_s3 + $0x518] sm:$0xf0] }
  0xa6   : > { %1683 = vmatpush.bf16.msra.mxu0 %v2631_v60  ;;  %v2687_v60 = vor.u32 %v3021_v51, %v2686_v50 }
  0xa7   : > { %1696 = vmatpush.bf16.msra.mxu1 %v2759_v61  ;;  %1709 = vmatpush.bf16.msra.mxu2 %v2635_v2  ;;  %v2815_v61 = vor.u32 %v3053_v55, %v2814_v54  ;;  %v2798_v2 = vld [vmem:[%s4353_s3 + $0x568] sm:$0xf] }
  0xa8   : > { %1722 = vmatpush.bf16.msra.mxu3 %v2763_v3  ;;  %v3049_v3 = vld [vmem:[%s4353_s3 + $0x574] sm:$0xf0] }
  0xa9   : > { %v2799_v21 = vor.u32 %v3049_v3, %v2798_v2 }
  0xaa   : > { %1684 = vmatpush.bf16.msra.mxu0 %v2615_v9  ;;  %v2654_v9 = vld [vmem:[%s4353_s3 + $0x448] sm:$0xf] }
  0xab   : > { %1697 = vmatpush.bf16.msra.mxu1 %v2743_v25  ;;  %1710 = vmatpush.bf16.msra.mxu2 %v2619_v18  ;;  %v2782_v25 = vld [vmem:[%s4353_s3 + $0x548] sm:$0xf]  ;;  %v2655_v18 = vor.u32 %v3013_v10, %v2654_v9 }
  0xac   : > { %1723 = vmatpush.bf16.msra.mxu3 %v2747_v19  ;;  %v2783_v19 = vor.u32 %v3045_v13, %v2782_v25 }
  0xad   : > { %1685 = vmatmul.bf16.vlgmr.msra.gmra.mxu0 %v4166_v32 }
  0xae   : > { %1729 = vmatpush.bf16.msrb.mxu0 %v2735_v20  ;;  %1698 = vmatmul.bf16.vlgmr.msra.gmra.mxu1 %v4168_v33  ;;  %v2638_v20 = vld [vmem:[%s4353_s3 + $0x428] sm:$0xf] }
  0xaf   : > { %1742 = vmatpush.bf16.msrb.mxu1 %v2863_v22  ;;  %1755 = vmatpush.bf16.msrb.mxu2 %v2739_v27  ;;  %v3009_v22 = vld [vmem:[%s4353_s3 + $0x434] sm:$0xf0] }
  0xb0   : > { %1768 = vmatpush.bf16.msrb.mxu3 %v2867_v28  ;;  %1711 = vmatmul.bf16.vlgmr.msra.gmra.mxu2 %v4166_v32  ;;  %v3041_v27 = vld [vmem:[%s4353_s3 + $0x534] sm:$0xf0]  ;;  %v3007_v28 = vld [vmem:[%s4353_s3 + $0x42c] sm:$0xf]  ;;  %v2639_v34 = vor.u32 %v3009_v22, %v2638_v20 }
  0xb1   : > { %1724 = vmatmul.bf16.vlgmr.msra.gmra.mxu3 %v4168_v33  ;;  %v2767_v35 = vor.u32 %v3041_v27, %v2766_v26  ;;  %v2643_v38 = vor.u32 %v3007_v28, %v2640_v29 }
  0xb2   : > { %1730 = vmatpush.bf16.msrb.mxu0 %v2719_v36  ;;  %v2622_v36 = vld [vmem:[%s4353_s3 + $0x408] sm:$0xf] }
  0xb3   : > { %1743 = vmatpush.bf16.msrb.mxu1 %v2847_v37  ;;  %1756 = vmatpush.bf16.msrb.mxu2 %v2723_v40  ;;  %v3005_v37 = vld [vmem:[%s4353_s3 + $0x414] sm:$0xf0]  ;;  %v2750_v40 = vld [vmem:[%s4353_s3 + $0x508] sm:$0xf] }
  0xb4   : > { %1769 = vmatpush.bf16.msrb.mxu3 %v2851_v41  ;;  %v3037_v41 = vld [vmem:[%s4353_s3 + $0x514] sm:$0xf0]  ;;  %v2623_v46 = vor.u32 %v3005_v37, %v2622_v36 }
  0xb5   : > { %v2751_v47 = vor.u32 %v3037_v41, %v2750_v40 }
  0xb6   : > { %1731 = vmatpush.bf16.msrb.mxu0 %v2703_v48  ;;  %v2627_v48 = vor.u32 %v3003_v42, %v2624_v43 }
  0xb7   : > { %1744 = vmatpush.bf16.msrb.mxu1 %v2831_v49  ;;  %1757 = vmatpush.bf16.msrb.mxu2 %v2707_v52  ;;  %v2755_v49 = vor.u32 %v3035_v44, %v2752_v45 }
  0xb8   : > { %1770 = vmatpush.bf16.msrb.mxu3 %v2835_v53 }
  0xba   : > { %1732 = vmatpush.bf16.msrb.mxu0 %v2687_v60 }
  0xbb   : > { %1745 = vmatpush.bf16.msrb.mxu1 %v2815_v61  ;;  %1758 = vmatpush.bf16.msrb.mxu2 %v2691_v0 }
  0xbc   : > { %1771 = vmatpush.bf16.msrb.mxu3 %v2819_v1 }
  0xbe   : > { %1733 = vmatpush.bf16.msrb.mxu0 %v2671_v8 }
  0xbf   : > { %1746 = vmatpush.bf16.msrb.mxu1 %v2799_v21  ;;  %1759 = vmatpush.bf16.msrb.mxu2 %v2675_v11 }
  0xc0   : > { %1772 = vmatpush.bf16.msrb.mxu3 %v2803_v12 }
  0xc2   : > { %1734 = vmatpush.bf16.msrb.mxu0 %v2655_v18 }
  0xc3   : > { %1747 = vmatpush.bf16.msrb.mxu1 %v2783_v19  ;;  %1760 = vmatpush.bf16.msrb.mxu2 %v2659_v23 }
  0xc4   : > { %1773 = vmatpush.bf16.msrb.mxu3 %v2787_v24 }
  0xc6   : > { %1735 = vmatpush.bf16.msrb.mxu0 %v2639_v34 }
  0xc7   : > { %1748 = vmatpush.bf16.msrb.mxu1 %v2767_v35  ;;  %1761 = vmatpush.bf16.msrb.mxu2 %v2643_v38 }
  0xc8   : > { %1774 = vmatpush.bf16.msrb.mxu3 %v2771_v39 }
  0xca   : > { %1736 = vmatpush.bf16.msrb.mxu0 %v2623_v46  ;;  %v767_v50 = vpop.f32.mrf.mxu0 }
  0xcb   : > { %1749 = vmatpush.bf16.msrb.mxu1 %v2751_v47  ;;  %1762 = vmatpush.bf16.msrb.mxu2 %v2627_v48  ;;  %v780_v51 = vpop.f32.mrf.mxu1 }
  0xcc   : > { %1775 = vmatpush.bf16.msrb.mxu3 %v2755_v49  ;;  %v781_v52 = vadd.f32 %v780_v51, %v767_v50 }
  0xcd   : > { %1737 = vmatmul.bf16.vlgmr.msrb.gmra.mxu0 %v4166_v32 }
  0xce   : > { %1750 = vmatmul.bf16.vlgmr.msrb.gmra.mxu1 %v4168_v33  ;;  %1763 = vmatmul.bf16.vlgmr.msrb.gmra.mxu2 %v4166_v32 }
  0xcf   : > { %1776 = vmatmul.bf16.vlgmr.msrb.gmra.mxu3 %v4168_v33  ;;  %v793_v53 = vpop.f32.mrf.mxu2 }
  0xd0   : > { %v806_v54 = vpop.f32.mrf.mxu3 }
  0xd1   : > { %v807_v56 = vadd.f32 %v806_v54, %v793_v53 }
  0xd2   : > { %v769_v55 = vpop.f32.mrf.mxu0 }
  0xd3   : > { %v782_v57 = vpop.f32.mrf.mxu1 }
  0xd7   : > { %v795_v58 = vpop.f32.mrf.mxu2 }
  0xd8   : > { %v808_v59 = vpop.f32.mrf.mxu3 }
  0xda   : > { %v819_v60 = vpop.f32.mrf.mxu0 }
  0xdb   : > { %v832_v61 = vpop.f32.mrf.mxu1 }
  0xdc   : > { %v833_v62 = vadd.f32 %v832_v61, %v819_v60 }
  0xdf   : > { %v845_v63 = vpop.f32.mrf.mxu2 }
  0xe0   : > { %v858_v1 = vpop.f32.mrf.mxu3 }
  0xe1   : > { %v4328_v2 = vadd.f32 %v858_v1, %v845_v63 }
  0xe2   : > { %v821_v0 = vpop.f32.mrf.mxu0 }
  0xe3   : > { %v834_v32 = vpop.f32.mrf.mxu1 }
  0xe7   : > { %v847_v33 = vpop.f32.mrf.mxu2 }
  0xe8   : > { %v860_v3 = vpop.f32.mrf.mxu3 }
  0xea   : > { %v1191_v4 = vpop.f32.mrf.mxu0 }
  0xeb   : > { %v1192_v5 = vadd.f32 %v1191_v4, %v781_v52 }
  0xed   : > { %v1204_v6 = vpop.f32.mrf.mxu1 }
  0xee   : > { %v1205_v7 = vadd.f32 %v1204_v6, %v1192_v5 }
  0xf1   : > { %v1217_v8 = vpop.f32.mrf.mxu2 }
  0xf2   : > { %v1193_v9 = vpop.f32.mrf.mxu0  ;;  %v1218_v28 = vadd.f32 %v1217_v8, %v807_v56 }
  0xf4   : > { %v1230_v21 = vpop.f32.mrf.mxu3 }
  0xf5   : > { %v1206_v10 = vpop.f32.mrf.mxu1  ;;  %v1231_v36 = vadd.f32 %v1230_v21, %v1218_v28 }
  0xf9   : > { %v1219_v11 = vpop.f32.mrf.mxu2 }
  0xfc   : > { %v1232_v12 = vpop.f32.mrf.mxu3 }
 0x10a   : > { %v1243_v25 = vpop.f32.mrf.mxu0 }
 0x10b   : > { %v1244_v13 = vadd.f32 %v1243_v25, %v833_v62 }
 0x10d   : > { %v1256_v14 = vpop.f32.mrf.mxu1 }
 0x10e   : > { %v1257_v15 = vadd.f32 %v1256_v14, %v1244_v13 }
 0x111   : > { %v1269_v16 = vpop.f32.mrf.mxu2 }
 0x112   : > { %v1245_v18 = vpop.f32.mrf.mxu0  ;;  %v1270_v9 = vadd.f32 %v1269_v16, %v4328_v2 }
 0x114   : > { %v4330_v17 = vpop.f32.mrf.mxu3 }
 0x115   : > { %v1258_v19 = vpop.f32.mrf.mxu1  ;;  %v1283_v18 = vadd.f32 %v4330_v17, %v1270_v9 }
 0x119   : > { %v1271_v20 = vpop.f32.mrf.mxu2 }
 0x11c   : > { %v1284_v22 = vpop.f32.mrf.mxu3 }
 0x12a   : > { %v1686_v23 = vpop.f32.mrf.mxu0 }
 0x12b   : > { %v1699_v24 = vpop.f32.mrf.mxu1 }
 0x12c   : > { %v1700_v26 = vadd.f32 %v1699_v24, %v1686_v23 }
 0x12e   : > { %v1781_v27 = vadd.f32 %v1700_v26, %v1205_v7 }
 0x130   : > { %v1789_v29 = vrot.slane %v1781_v27, 4  ;;  %v1832_v30 = vmul.f32 %v1781_v27, %v1781_v27 }
 0x132   : > { %v1836_v31 = vrot.slane %v1832_v30, 4  ;;  %v1790_v37 = vadd.f32 %v1789_v29, %v1781_v27  ;;  %v1688_v39 = vpop.f32.mrf.mxu0 }
 0x133   : > { %v1712_v34 = vpop.f32.mrf.mxu2  ;;  %v1701_v40 = vpop.f32.mrf.mxu1 }
 0x134   : > { %v1725_v35 = vpop.f32.mrf.mxu3  ;;  %v1837_v41 = vadd.f32 %v1836_v31, %v1832_v30  ;;  %v1791_v43 = vrot.slane %v1790_v37, 2 }
 0x135   : > { %v1726_v38 = vadd.f32 %v1725_v35, %v1712_v34 }
 0x136   : > { %v1838_v47 = vrot.slane %v1837_v41, 2  ;;  %v1792_v52 = vadd.f32 %v1791_v43, %v1790_v37 }
 0x137   : > { %v1782_v42 = vadd.f32 %v1726_v38, %v1231_v36 }
 0x138   : > { %v1839_v55 = vadd.f32 %v1838_v47, %v1837_v41  ;;  %v1793_v58 = vrot.slane %v1792_v52, 1 }
 0x139   : > { %v1785_v44 = vpack.c.bf16 %v1782_v42, %v1781_v27  ;;  %v1795_v45 = vrot.slane %v1782_v42, 4  ;;  %v1833_v46 = vmul.f32 %v1782_v42, %v1782_v42 }
 0x13a   : > { %v1840_v61 = vrot.slane %v1839_v55, 1  ;;  %v1794_v0 = vadd.f32 %v1793_v58, %v1792_v52 }
 0x13b   : > { %1787 = vst [vmem:[%s4336_s20] sm:$0xff] %v1785_v44  ;;  %v1796_v48 = vadd.f32 %v1795_v45, %v1782_v42  ;;  %v1842_v49 = vrot.slane %v1833_v46, 4  ;;  %v1714_v50 = vpop.f32.mrf.mxu2  ;;  %v1827_v44 = vlaneseq }
 0x13c   : > { %v1727_v51 = vpop.f32.mrf.mxu3  ;;  %v1841_v33 = vadd.f32 %v1840_v61, %v1839_v55 }
 0x13d   : > { %v1797_v53 = vrot.slane %v1796_v48, 2  ;;  %v1843_v54 = vadd.f32 %v1842_v49, %v1833_v46  ;;  %vm1829_vm5 = vcmp.lt.s32.totalorder %v1827_v44, 512 }
 0x13f   : > { %v1798_v56 = vadd.f32 %v1797_v53, %v1796_v48  ;;  %v1844_v57 = vrot.slane %v1843_v54, 2 }
 0x141   : > { %v1799_v59 = vrot.slane %v1798_v56, 1  ;;  %v1845_v60 = vadd.f32 %v1844_v57, %v1843_v54 }
 0x143   : > { %v1800_v62 = vadd.f32 %v1799_v59, %v1798_v56  ;;  %v1846_v63 = vrot.slane %v1845_v60, 1 }
 0x145   : > { %v1817_v1 = vrot.slane %v1800_v62, 7  ;;  %v1847_v32 = vadd.f32 %v1846_v63, %v1845_v60 }
 0x147   : > { %v1821_v3 = vsel %vm1820_vm2, %v1794_v0, %v1817_v1  ;;  %v1864_v4 = vrot.slane %v1847_v32, 7 }
 0x149   : > { %v1867_v5 = vsel %vm1820_vm2, %v1841_v33, %v1864_v4 }
 0x14a   : > { %v1738_v6 = vpop.f32.mrf.mxu0 }
 0x14b   : > { %v1751_v7 = vpop.f32.mrf.mxu1 }
 0x14c   : > { %v1752_v8 = vadd.f32 %v1751_v7, %v1738_v6 }
 0x14e   : > { %v1783_v21 = vadd.f32 %v1752_v8, %v1257_v15 }
 0x150   : > { %v1801_v10 = vrot.slane %v1783_v21, 4  ;;  %v1834_v11 = vmul.f32 %v1783_v21, %v1783_v21 }
 0x151   : > { %v1764_v13 = vpop.f32.mrf.mxu2 }
 0x152   : > { %v1802_v12 = vadd.f32 %v1801_v10, %v1783_v21  ;;  %v1848_v25 = vrot.slane %v1834_v11, 4  ;;  %v1777_v14 = vpop.f32.mrf.mxu3  ;;  %v1740_v20 = vpop.f32.mrf.mxu0 }
 0x153   : > { %v1778_v19 = vadd.f32 %v1777_v14, %v1764_v13  ;;  %v1753_v22 = vpop.f32.mrf.mxu1 }
 0x154   : > { %v1803_v23 = vrot.slane %v1802_v12, 2  ;;  %v1849_v24 = vadd.f32 %v1848_v25, %v1834_v11 }
 0x155   : > { %v1784_v26 = vadd.f32 %v1778_v19, %v1283_v18 }
 0x156   : > { %v1850_v27 = vrot.slane %v1849_v24, 2  ;;  %v1804_v28 = vadd.f32 %v1803_v23, %v1802_v12 }
 0x157   : > { %v1786_v15 = vpack.c.bf16 %v1784_v26, %v1783_v21  ;;  %v1807_v29 = vrot.slane %v1784_v26, 4  ;;  %v1835_v2 = vmul.f32 %v1784_v26, %v1784_v26 }
 0x158   : > { %v1851_v16 = vadd.f32 %v1850_v27, %v1849_v24  ;;  %v1805_v36 = vrot.slane %v1804_v28, 1 }
 0x159   : > { %1788 = vst [vmem:[%s4336_s20 + $0x8] sm:$0xff] %v1786_v15  ;;  %v1808_v30 = vadd.f32 %v1807_v29, %v1784_v26  ;;  %v1854_v31 = vrot.slane %v1835_v2, 4  ;;  %v1766_v34 = vpop.f32.mrf.mxu2 }
 0x15a   : > { %v1779_v35 = vpop.f32.mrf.mxu3  ;;  %v1852_v38 = vrot.slane %v1851_v16, 1  ;;  %v1806_v41 = vadd.f32 %v1805_v36, %v1804_v28 }
 0x15b   : > { %v1809_v37 = vrot.slane %v1808_v30, 2  ;;  %v1855_v17 = vadd.f32 %v1854_v31, %v1835_v2 }
 0x15c   : > { %v1853_v45 = vadd.f32 %v1852_v38, %v1851_v16  ;;  %v1818_v48 = vrot.slane %v1806_v41, 6 }
 0x15d   : > { %v1810_v39 = vadd.f32 %v1809_v37, %v1808_v30  ;;  %v1856_v40 = vrot.slane %v1855_v17, 2 }
 0x15e   : > { %v1865_v51 = vrot.slane %v1853_v45, 6 }
 0x15f   : > { %v1811_v42 = vrot.slane %v1810_v39, 1  ;;  %v1857_v43 = vadd.f32 %v1856_v40, %v1855_v17 }
 0x161   : > { %v1812_v46 = vadd.f32 %v1811_v42, %v1810_v39  ;;  %v1858_v47 = vrot.slane %v1857_v43, 1 }
 0x163   : > { %v1819_v49 = vrot.slane %v1812_v46, 5  ;;  %v1859_v50 = vadd.f32 %v1858_v47, %v1857_v43 }
 0x165   : > { %v1823_v52 = vsel %vm1822_vm3, %v1818_v48, %v1819_v49  ;;  %v1866_v53 = vrot.slane %v1859_v50, 5 }
 0x166   : > { %v1825_v54 = vsel %vm1824_vm4, %v1821_v3, %v1823_v52 }
 0x167   : > { %1831 = vst.msk [vmem:[%s237_s23] ss:$2 sm:$0xf] %vm1829_vm5, %v1825_v54  ;;  %v1868_v55 = vsel %vm1822_vm3, %v1865_v51, %v1866_v53 }
 0x168   : > { %v1869_v56 = vsel %vm1824_vm4, %v1867_v5, %v1868_v55 }
 0x169   : > { %2868 = vst.msk [vmem:[%s237_s23 + $0x1] ss:$2 sm:$0xf] %vm1829_vm5, %v1869_v56 }
 0x16a PF: > { %s16_s18 = sadd.s32 1, %s3081_s18  }
 0x16b   : > { %p13_p4 = scmp.ge.s32.totalorder %s16_s18, 4  }
 0x16d   :  { %15 = sbr.rel (!%p13_p4) target bundleno = 1 (0x1), region = 81 }

// kernel: tile.88
= control target key start
LH: loop header
LB: loop body
LE: loop exit
PB: predicated region body
PF: predicated region fallthrough
CT: control target
= control target key end

     0   :  { %s64_s0 = inlined_call_operand.vmem [shape: f32[8], index: 0, kind: input, shape index: {}]   ;;  %s65_s1 = inlined_call_operand.vmem [shape: f32[64,8], index: 1, kind: output, shape index: {}]  }
   0x1   :  { %v4_v0 = vld [vmem:[%s64_s0] ss:$0 sm:$0xff] }
   0x2   :  { %5 = vst [vmem:[%s65_s1] sm:$0xff] %v4_v0 }
   0x3   :  { %20 = vst [vmem:[%s65_s1 + $0x8] sm:$0xff] %v4_v0 }
   0x4   :  { %21 = vst [vmem:[%s65_s1 + $0x10] sm:$0xff] %v4_v0 }
   0x5   :  { %22 = vst [vmem:[%s65_s1 + $0x18] sm:$0xff] %v4_v0 }
   0x6   :  { %23 = vst [vmem:[%s65_s1 + $0x20] sm:$0xff] %v4_v0 }
   0x7   :  { %24 = vst [vmem:[%s65_s1 + $0x28] sm:$0xff] %v4_v0 }
   0x8   :  { %25 = vst [vmem:[%s65_s1 + $0x30] sm:$0xff] %v4_v0 }
   0x9   :  { %26 = vst [vmem:[%s65_s1 + $0x38] sm:$0xff] %v4_v0 }

// kernel: tile.89
= control target key start
LH: loop header
LB: loop body
LE: loop exit
PB: predicated region body
PF: predicated region fallthrough
CT: control target
= control target key end

     0   :  { %vm6_vm0 = vcmask 1043458   ;;  %s11_s6 = smov 3  ;;  %s14_s7 = smov 12  ;;  %vm8_vm1 = vcmask 64512   ;;  %vm20_vm2 = vcmask 1048512   ;;  %vm32_vm3 = vcmask 982912   ;;  %s411_s0 = inlined_call_operand.vmem [shape: f32[64,8], index: 0, kind: input, shape index: {}]   ;;  %s412_s1 = inlined_call_operand.vmem [shape: f32[1,512], index: 1, kind: output, shape index: {}]  }
   0x1   :  { %v214_v0 = vld [vmem:[%s411_s0 + $0xf] ss:$16 sm:%s11_s6]   ;;  %s35_s12 = smov 3  ;;  %s38_s15 = smov 12  ;;  %vm44_vm4 = vcmask 917312   ;;  %vm56_vm5 = vcmask 851712  }
   0x2   :  { %v215_v1 = vld [vmem:[%s411_s0 + $0xf] ss:$16 sm:%s14_s7]   ;;  %v218_v3 = vld [vmem:[%s411_s0 + $0xd] ss:$16 sm:%s35_s12]   ;;  %s262_s16 = smov 120   ;;  %s23_s19 = smov 3 }
   0x3   :  { %v17_v2 = vsel %vm6_vm0, %v215_v1, %v214_v0  ;;  %v219_v4 = vld [vmem:[%s411_s0 + $0xd] ss:$16 sm:%s38_s15]   ;;  %s26_s20 = smov 12  ;;  %v216_v6 = vld [vmem:[%s411_s0 + $0xe] ss:$16 sm:%s23_s19]   ;;  %s47_s23 = smov 3 }
   0x4   :  { %18 = vrot.lane.b32.xlu0 %v17_v2, %s262_s16  ;;  %v41_v5 = vsel %vm6_vm0, %v219_v4, %v218_v3  ;;  %s263_s24 = smov 104   ;;  %v217_v7 = vld [vmem:[%s411_s0 + $0xe] ss:$16 sm:%s26_s20]   ;;  %s50_s27 = smov 12  ;;  %vm68_vm6 = vcmask 786112   ;;  %vm80_vm7 = vcmask 720512  }
   0x5   :  { %42 = vrot.lane.b32.xlu1 %v41_v5, %s263_s24  ;;  %v220_v8 = vld [vmem:[%s411_s0 + $0xc] ss:$16 sm:%s47_s23]   ;;  %v29_v10 = vsel %vm6_vm0, %v217_v7, %v216_v6  ;;  %s83_s3 = smov 3  ;;  %s86_s4 = smov 12  ;;  %vm92_vm8 = vcmask 654912   ;;  %vm104_vm9 = vcmask 589312  }
   0x6   :  { %v221_v9 = vld [vmem:[%s411_s0 + $0xc] ss:$16 sm:%s50_s27]   ;;  %s264_s5 = smov 112   ;;  %s95_s6 = smov 3  ;;  %v226_v12 = vld [vmem:[%s411_s0 + $0x9] ss:$16 sm:%s83_s3]  }
   0x7   :  { %v53_v11 = vsel %vm6_vm0, %v221_v9, %v220_v8  ;;  %s98_s7 = smov 12  ;;  %v227_v13 = vld [vmem:[%s411_s0 + $0x9] ss:$16 sm:%s86_s4]   ;;  %s59_s12 = smov 3  ;;  %v228_v16 = vld [vmem:[%s411_s0 + $0x8] ss:$16 sm:%s95_s6]  }
   0x8   :  { %s62_s13 = smov 12  ;;  %s265_s14 = smov 96   ;;  %v222_v14 = vld [vmem:[%s411_s0 + $0xb] ss:$16 sm:%s59_s12]   ;;  %v229_v17 = vld [vmem:[%s411_s0 + $0x8] ss:$16 sm:%s98_s7]   ;;  %v89_v19 = vsel %vm6_vm0, %v227_v13, %v226_v12 }
   0x9   :  { %v223_v15 = vld [vmem:[%s411_s0 + $0xb] ss:$16 sm:%s62_s13]   ;;  %s266_s23 = smov 88   ;;  %s71_s24 = smov 3  ;;  %v101_v20 = vsel %vm6_vm0, %v229_v17, %v228_v16  ;;  %vm116_vm10 = vcmask 523712   ;;  %vm128_vm11 = vcmask 458112  }
   0xa   :  { %v65_v18 = vsel %vm6_vm0, %v223_v15, %v222_v14  ;;  %s119_s25 = smov 3  ;;  %s74_s26 = smov 12  ;;  %v224_v21 = vld [vmem:[%s411_s0 + $0xa] ss:$16 sm:%s71_s24]   ;;  %vm140_vm12 = vcmask 392512   ;;  %vm152_vm13 = vcmask 326912  }
   0xb   :  { %66 = vrot.lane.b32.xlu2 %v65_v18, %s266_s23  ;;  %s122_s27 = smov 12  ;;  %v225_v22 = vld [vmem:[%s411_s0 + $0xa] ss:$16 sm:%s74_s26]   ;;  %s267_s3 = smov 72   ;;  %vm164_vm14 = vcmask 261312   ;;  %vm176_vm15 = vcmask 195712  }
   0xc   :  { %30 = vrot.lane.b32.xlu0 %v29_v10, %s264_s5  ;;  %v232_v23 = vld [vmem:[%s411_s0 + $0x6] ss:$16 sm:%s119_s25]   ;;  %s131_s6 = smov 3  ;;  %s134_s7 = smov 12  ;;  %v77_v25 = vsel %vm6_vm0, %v225_v22, %v224_v21 }
   0xd   :  { %54 = vrot.lane.b32.xlu1 %v53_v11, %s265_s14  ;;  %s268_s8 = smov 64   ;;  %v233_v24 = vld [vmem:[%s411_s0 + $0x6] ss:$16 sm:%s122_s27]   ;;  %s107_s15 = smov 3 }
   0xe   :  { %v234_v26 = vld [vmem:[%s411_s0 + $0x5] ss:$16 sm:%s131_s6]   ;;  %s110_s16 = smov 12  ;;  %v125_v28 = vsel %vm6_vm0, %v233_v24, %v232_v23  ;;  %s269_s17 = smov 80   ;;  %v230_v30 = vld [vmem:[%s411_s0 + $0x7] ss:$16 sm:%s107_s15]  }
   0xf   :  { %v235_v27 = vld [vmem:[%s411_s0 + $0x5] ss:$16 sm:%s134_s7]   ;;  %s155_s18 = smov 3  ;;  %s158_s19 = smov 12  ;;  %v231_v31 = vld [vmem:[%s411_s0 + $0x7] ss:$16 sm:%s110_s16]  }
  0x10   :  { %v137_v29 = vsel %vm6_vm0, %v235_v27, %v234_v26  ;;  %s270_s24 = smov 48   ;;  %v238_v32 = vld [vmem:[%s411_s0 + $0x3] ss:$16 sm:%s155_s18]   ;;  %s167_s27 = smov 3  ;;  %v113_v34 = vsel %vm6_vm0, %v231_v31, %v230_v30 }
  0x11   :  { %s170_s28 = smov 12  ;;  %s271_s29 = smov 40   ;;  %v239_v33 = vld [vmem:[%s411_s0 + $0x3] ss:$16 sm:%s158_s19]   ;;  %v240_v35 = vld [vmem:[%s411_s0 + $0x2] ss:$16 sm:%s167_s27]  }
  0x12   :  { %v241_v36 = vld [vmem:[%s411_s0 + $0x2] ss:$16 sm:%s170_s28]   ;;  %s143_s7 = smov 3  ;;  %v161_v37 = vsel %vm6_vm0, %v239_v33, %v238_v32  ;;  %s272_s9 = smov 56  }
  0x13   :  { %78 = vrot.lane.b32.xlu2 %v77_v25, %s269_s17  ;;  %v173_v38 = vsel %vm6_vm0, %v241_v36, %v240_v35  ;;  %v236_v39 = vld [vmem:[%s411_s0 + $0x4] ss:$16 sm:%s143_s7]   ;;  %s273_s14 = smov 24   ;;  %s274_s15 = smov 16  }
  0x14   :  { %90 = vrot.lane.b32.xlu0 %v89_v19, %s267_s3  ;;  %s179_s16 = smov 3  ;;  %s182_s17 = smov 12 }
  0x15   :  { %102 = vrot.lane.b32.xlu1 %v101_v20, %s268_s8  ;;  %s146_s8 = smov 12  ;;  %s275_s18 = smov 32   ;;  %v242_v42 = vld [vmem:[%s411_s0 + $0x1] ss:$16 sm:%s179_s16]  }
  0x16   :  { %v237_v40 = vld [vmem:[%s411_s0 + $0x4] ss:$16 sm:%s146_s8]   ;;  %v243_v43 = vld [vmem:[%s411_s0 + $0x1] ss:$16 sm:%s182_s17]   ;;  %s276_s23 = smov 8   ;;  %s4_s25 = smov 12 }
  0x17   :  { %v149_v41 = vsel %vm6_vm0, %v237_v40, %v236_v39  ;;  %v185_v44 = vsel %vm6_vm0, %v243_v43, %v242_v42  ;;  %v5_v46 = vld [vmem:[%s411_s0] ss:$16 sm:%s4_s25]  }
  0x1b   :  { %114 = vrot.lane.b32.xlu2 %v113_v34, %s272_s9 }
  0x1c   :  { %126 = vrot.lane.b32.xlu0 %v125_v28, %s270_s24  ;;  %s2_s24 = smov 3 }
  0x1d   :  { %138 = vrot.lane.b32.xlu1 %v137_v29, %s271_s29  ;;  %v3_v45 = vld [vmem:[%s411_s0] ss:$16 sm:%s2_s24]  }
  0x1e   :  { %v7_v47 = vsel %vm6_vm0, %v5_v46, %v3_v45  ;;  %vm188_vm0 = vcmask 130112  }
  0x1f   :  { %9 = vst.msk [vmem:[#allocation0] ss:$8 sm:$0xf] %vm8_vm1, %v7_v47  }
  0x23   :  { %150 = vrot.lane.b32.xlu2 %v149_v41, %s275_s18 }
  0x24   :  { %162 = vrot.lane.b32.xlu0 %v161_v37, %s273_s14 }
  0x25   :  { %174 = vrot.lane.b32.xlu1 %v173_v38, %s274_s15 }
  0x2b   :  { %186 = vrot.lane.b32.xlu2 %v185_v44, %s276_s23 }
  0x65   :  { %v67_v48 = vpop.permute.xlu2 %66  }
  0x6d   :  { %v79_v49 = vpop.permute.xlu2 %78  }
  0x75   :  { %v115_v52 = vpop.permute.xlu2 %114  }
  0x76   :  { %v19_v50 = vpop.permute.xlu0 %18  }
  0x77   :  { %21 = vst.msk [vmem:[#allocation0] ss:$8 sm:$0xf] %vm20_vm2, %v19_v50   ;;  %v43_v51 = vpop.permute.xlu1 %42  }
  0x7d   :  { %v151_v55 = vpop.permute.xlu2 %150  }
  0x7e   :  { %v31_v53 = vpop.permute.xlu0 %30  }
  0x7f   :  { %33 = vst.msk [vmem:[#allocation0] ss:$8 sm:$0xf] %vm32_vm3, %v31_v53   ;;  %v55_v54 = vpop.permute.xlu1 %54  }
  0x80   :  { %45 = vst.msk [vmem:[#allocation0] ss:$8 sm:$0xf] %vm44_vm4, %v43_v51  }
  0x81   :  { %57 = vst.msk [vmem:[#allocation0] ss:$8 sm:$0xf] %vm56_vm5, %v55_v54  }
  0x82   :  { %69 = vst.msk [vmem:[#allocation0] ss:$8 sm:$0xf] %vm68_vm6, %v67_v48  }
  0x83   :  { %81 = vst.msk [vmem:[#allocation0] ss:$8 sm:$0xf] %vm80_vm7, %v79_v49  }
  0x85   :  { %v187_v58 = vpop.permute.xlu2 %186  }
  0x86   :  { %v91_v56 = vpop.permute.xlu0 %90  }
  0x87   :  { %93 = vst.msk [vmem:[#allocation0] ss:$8 sm:$0xf] %vm92_vm8, %v91_v56   ;;  %v103_v57 = vpop.permute.xlu1 %102  }
  0x88   :  { %105 = vst.msk [vmem:[#allocation0] ss:$8 sm:$0xf] %vm104_vm9, %v103_v57  }
  0x89   :  { %117 = vst.msk [vmem:[#allocation0] ss:$8 sm:$0xf] %vm116_vm10, %v115_v52  }
  0x8e   :  { %v127_v59 = vpop.permute.xlu0 %126  }
  0x8f   :  { %129 = vst.msk [vmem:[#allocation0] ss:$8 sm:$0xf] %vm128_vm11, %v127_v59   ;;  %v139_v60 = vpop.permute.xlu1 %138  }
  0x90   :  { %141 = vst.msk [vmem:[#allocation0] ss:$8 sm:$0xf] %vm140_vm12, %v139_v60  }
  0x91   :  { %153 = vst.msk [vmem:[#allocation0] ss:$8 sm:$0xf] %vm152_vm13, %v151_v55  }
  0x96   :  { %v163_v61 = vpop.permute.xlu0 %162  }
  0x97   :  { %165 = vst.msk [vmem:[#allocation0] ss:$8 sm:$0xf] %vm164_vm14, %v163_v61   ;;  %v175_v62 = vpop.permute.xlu1 %174  }
  0x98   :  { %177 = vst.msk [vmem:[#allocation0] ss:$8 sm:$0xf] %vm176_vm15, %v175_v62  }
  0x99   :  { %189 = vst.msk [vmem:[#allocation0] ss:$8 sm:$0xf] %vm188_vm0, %v187_v58  }
  0xa0   :  { %v192_v63 = vld [vmem:[#allocation0] sm:$0x1]  ;;  %v197_v0 = vld [vmem:[#allocation0 + $0x8] sm:$0x1]  ;;  %v203_v1 = vld [vmem:[#allocation0 + $0x10] sm:$0x1] }
  0xa1   :  { %195 = vst [vmem:[%s412_s1] sm:$0x1] %v192_v63  ;;  %v209_v2 = vld [vmem:[#allocation0 + $0x18] sm:$0x1] }
  0xa2   :  { %244 = vst [vmem:[%s412_s1 + $0x1] sm:$0x1] %v197_v0 }
  0xa3   :  { %245 = vst [vmem:[%s412_s1 + $0x2] sm:$0x1] %v203_v1 }
  0xa4   :  { %246 = vst [vmem:[%s412_s1 + $0x3] sm:$0x1] %v209_v2 }

// kernel: insert_b_forward.12
= control target key start
LH: loop header
LB: loop body
LE: loop exit
PB: predicated region body
PF: predicated region fallthrough
CT: control target
= control target key end

     0   :  { %s325_s12 = smov 0   ;;  %s352_s0 = inlined_call_operand.vmem [shape: bf16[2,8,512], index: 0, kind: input, shape index: {}]   ;;  %s353_s1 = inlined_call_operand.vmem [shape: f32[1,512], index: 1, kind: input, shape index: {}]   ;;  %s354_s2 = inlined_call_operand.vmem [shape: f32[1,512], index: 2, kind: input, shape index: {}]   ;;  %s355_s3 = inlined_call_operand.vmem [shape: f32[2,8,512], index: 3, kind: output, shape index: {}]  }
   0x1 LB: > { %s276_s13 = sadd.s32 4294967295, %s303_s12   ;;  %p280_p0 = scmp.ge.s32.totalorder %s303_s12, 1  ;;  %s303_s12 = sphi %s325_s12, %s13_s12  }
   0x2   : > { %p137_p1 = scmp.lt.s32.totalorder %s303_s12, 3 }
   0x4   : > { %p138_p2 = pnand %p280_p0, %p137_p1 }
   0x5   : > { %p161_p3 = scmp.lt.s32.totalorder (!%p138_p2), %s276_s13, 1 }
   0x6   : > { %141 = sbr.rel (%p138_p2) target bundleno = 28 (0x1c), region = 32 }
   0xb   : > { %s357_s13 = smov (!%p161_p3, %s276_s13), 1  ;;  %v177_v0 = vld [vmem:[%s353_s1] sm:$0xf] }
   0xc   : > { %v191_v1 = vld [vmem:[%s354_s2] sm:$0xf]  ;;  %s287_s18 = sshll.u32 %s357_s13, 4  ;;  %v179_v2 = vperm.slane %v177_v0, 0  ;;  %v180_v3 = vperm.slane %v177_v0, 1  ;;  %v181_v4 = vperm.slane %v177_v0, 2 }
   0xd   : > { %s165_s21 = scalar_lea.vmem %s352_s0, %s287_s18  ;;  %v182_v5 = vperm.slane %v177_v0, 3  ;;  %v193_v8 = vperm.slane %v191_v1, 0  ;;  %v194_v9 = vperm.slane %v191_v1, 1  ;;  %v195_v10 = vperm.slane %v191_v1, 2  ;;  %s288_s22 = sshll.u32 %s357_s13, 5 }
   0xe   : > { %v171_v6 = vld [vmem:[%s165_s21] sm:$0xff]  ;;  %v172_v7 = vld [vmem:[%s165_s21 + $0x8] sm:$0xff]  ;;  %v196_v11 = vperm.slane %v191_v1, 3  ;;  %s170_s25 = scalar_lea.vmem %s355_s3, %s288_s22 }
   0xf   : > { %v173_v12 = vunpack.c.l.bf16 %v171_v6  ;;  %v174_v13 = vunpack.c.h.bf16 %v171_v6  ;;  %v175_v14 = vunpack.c.l.bf16 %v172_v7  ;;  %v176_v15 = vunpack.c.h.bf16 %v172_v7 }
  0x11   : > { %v187_v16 = vmul.f32 %v179_v2, %v173_v12  ;;  %v188_v17 = vmul.f32 %v180_v3, %v174_v13  ;;  %v189_v18 = vmul.f32 %v181_v4, %v175_v14  ;;  %v190_v19 = vmul.f32 %v182_v5, %v176_v15 }
  0x13   : > { %v201_v20 = vadd.f32 %v193_v8, %v187_v16  ;;  %v202_v21 = vadd.f32 %v194_v9, %v188_v17  ;;  %v203_v22 = vadd.f32 %v195_v10, %v189_v18  ;;  %v204_v23 = vadd.f32 %v196_v11, %v190_v19 }
  0x15   : > { %vm205_vm0 = vcmp.ge.f32.partialorder %v201_v20, 0.0  ;;  %v209_v24 = vmul.f32 0.01, %v201_v20  ;;  %vm206_vm1 = vcmp.ge.f32.partialorder %v202_v21, 0.0  ;;  %v210_v25 = vmul.f32 0.01, %v202_v21 }
  0x16   : > { %vm207_vm2 = vcmp.ge.f32.partialorder %v203_v22, 0.0  ;;  %v211_v26 = vmul.f32 0.01, %v203_v22  ;;  %vm208_vm3 = vcmp.ge.f32.partialorder %v204_v23, 0.0  ;;  %v212_v27 = vmul.f32 0.01, %v204_v23 }
  0x17   : > { %v213_v28 = vsel %vm205_vm0, %v201_v20, %v209_v24  ;;  %v214_v29 = vsel %vm206_vm1, %v202_v21, %v210_v25 }
  0x18   : > { %217 = vst [vmem:[%s170_s25] sm:$0xff] %v213_v28  ;;  %v215_v30 = vsel %vm207_vm2, %v203_v22, %v211_v26  ;;  %v216_v31 = vsel %vm208_vm3, %v204_v23, %v212_v27 }
  0x19   : > { %218 = vst [vmem:[%s170_s25 + $0x8] sm:$0xff] %v214_v29 }
  0x1a   : > { %219 = vst [vmem:[%s170_s25 + $0x10] sm:$0xff] %v215_v30 }
  0x1b   : > { %220 = vst [vmem:[%s170_s25 + $0x18] sm:$0xff] %v216_v31 }
  0x1c PF: > { %s13_s12 = sadd.s32 1, %s303_s12  }
  0x1d   : > { %p10_p4 = scmp.ge.s32.totalorder %s13_s12, 4  }
  0x1f   :  { %12 = sbr.rel (!%p10_p4) target bundleno = 1 (0x1), region = 62 }

// kernel: insert_b_forward.15
= control target key start
LH: loop header
LB: loop body
LE: loop exit
PB: predicated region body
PF: predicated region fallthrough
CT: control target
= control target key end

     0   :  { %s1794_s18 = smov 0   ;;  %s2414_s0 = inlined_call_operand.vmem [shape: bf16[2,8,256], index: 0, kind: input, shape index: {}]   ;;  %s2415_s1 = inlined_call_operand.vmem [shape: f32[1,256], index: 1, kind: input, shape index: {}]   ;;  %s2416_s2 = inlined_call_operand.vmem [shape: f32[1,256], index: 2, kind: input, shape index: {}]   ;;  %s2417_s3 = inlined_call_operand.vmem [shape: bf16[3,256,256], index: 3, kind: input, shape index: {}]   ;;  %s2418_s4 = inlined_call_operand.vmem [shape: bf16[2,8,256], index: 4, kind: output, shape index: {0}]   ;;  %s2419_s5 = inlined_call_operand.vmem [shape: f32[2,2,256], index: 5, kind: output, shape index: {1}]  }
   0x1 LB: > { %s1185_s19 = sadd.s32 4294967295, %s1761_s18   ;;  %p1189_p0 = scmp.ge.s32.totalorder %s1761_s18, 1  ;;  %s1761_s18 = sphi %s1794_s18, %s16_s18  }
   0x2   : > { %p190_p1 = scmp.lt.s32.totalorder %s1761_s18, 3 }
   0x4   : > { %p191_p2 = pnand %p1189_p0, %p190_p1 }
   0x5   : > { %p2050_p3 = scmp.lt.s32.totalorder (!%p191_p2), %s1185_s19, 1 }
   0x6   : > { %194 = sbr.rel (%p191_p2) target bundleno = 265 (0x109), region = 36 }
   0xb   : > { %v1286_v0 = vld [vmem:[%s2417_s3 + $0x170] sm:$0xf]  ;;  %v1697_v1 = vld [vmem:[%s2417_s3 + $0x174] sm:$0xf0]  ;;  %v1696_v5 = vld [vmem:[%s2417_s3 + $0x174] sm:$0xf] }
   0xc   : > { %v1350_v2 = vld [vmem:[%s2417_s3 + $0x1f0] sm:$0xf]  ;;  %v1287_v3 = vor.u32 %v1697_v1, %v1286_v0  ;;  %v1713_v4 = vld [vmem:[%s2417_s3 + $0x1f4] sm:$0xf0]  ;;  %v1288_v6 = vld [vmem:[%s2417_s3 + $0x178] sm:$0xf0] }
   0xd   : > { %v1351_v7 = vor.u32 %v1713_v4, %v1350_v2  ;;  %v1291_v8 = vor.u32 %v1696_v5, %v1288_v6  ;;  %v1712_v9 = vld [vmem:[%s2417_s3 + $0x1f4] sm:$0xf]  ;;  %v1352_v10 = vld [vmem:[%s2417_s3 + $0x1f8] sm:$0xf0]  ;;  %v1278_v11 = vld [vmem:[%s2417_s3 + $0x160] sm:$0xf] }
   0xe   : > { %534 = vmatpush.bf16.msra.mxu0 %v1287_v3  ;;  %v1355_v12 = vor.u32 %v1712_v9, %v1352_v10  ;;  %v1695_v13 = vld [vmem:[%s2417_s3 + $0x164] sm:$0xf0]  ;;  %v1342_v14 = vld [vmem:[%s2417_s3 + $0x1e0] sm:$0xf]  ;;  %v1694_v18 = vld [vmem:[%s2417_s3 + $0x164] sm:$0xf] }
   0xf   : > { %v1711_v15 = vld [vmem:[%s2417_s3 + $0x1e4] sm:$0xf0]  ;;  %547 = vmatpush.bf16.msra.mxu1 %v1351_v7  ;;  %560 = vmatpush.bf16.msra.mxu2 %v1291_v8  ;;  %v1279_v16 = vor.u32 %v1695_v13, %v1278_v11  ;;  %v1280_v19 = vld [vmem:[%s2417_s3 + $0x168] sm:$0xf0]  ;;  %v1710_v20 = vld [vmem:[%s2417_s3 + $0x1e4] sm:$0xf] }
  0x10   : > { %v1343_v17 = vor.u32 %v1711_v15, %v1342_v14  ;;  %573 = vmatpush.bf16.msra.mxu3 %v1355_v12  ;;  %v1283_v21 = vor.u32 %v1694_v18, %v1280_v19  ;;  %v1344_v22 = vld [vmem:[%s2417_s3 + $0x1e8] sm:$0xf0]  ;;  %v1270_v23 = vld [vmem:[%s2417_s3 + $0x150] sm:$0xf]  ;;  %v1693_v24 = vld [vmem:[%s2417_s3 + $0x154] sm:$0xf0] }
  0x11   : > { %v1347_v25 = vor.u32 %v1710_v20, %v1344_v22  ;;  %v1334_v26 = vld [vmem:[%s2417_s3 + $0x1d0] sm:$0xf]  ;;  %v1709_v27 = vld [vmem:[%s2417_s3 + $0x1d4] sm:$0xf0]  ;;  %v1692_v28 = vld [vmem:[%s2417_s3 + $0x154] sm:$0xf]  ;;  %v1271_v29 = vor.u32 %v1693_v24, %v1270_v23 }
  0x12   : > { %535 = vmatpush.bf16.msra.mxu0 %v1279_v16  ;;  %v1272_v30 = vld [vmem:[%s2417_s3 + $0x158] sm:$0xf0]  ;;  %v1708_v31 = vld [vmem:[%s2417_s3 + $0x1d4] sm:$0xf]  ;;  %v1335_v33 = vor.u32 %v1709_v27, %v1334_v26  ;;  %v1262_v35 = vld [vmem:[%s2417_s3 + $0x140] sm:$0xf] }
  0x13   : > { %v1336_v32 = vld [vmem:[%s2417_s3 + $0x1d8] sm:$0xf0]  ;;  %548 = vmatpush.bf16.msra.mxu1 %v1343_v17  ;;  %561 = vmatpush.bf16.msra.mxu2 %v1283_v21  ;;  %v1275_v34 = vor.u32 %v1692_v28, %v1272_v30  ;;  %v1691_v36 = vld [vmem:[%s2417_s3 + $0x144] sm:$0xf0]  ;;  %v1326_v37 = vld [vmem:[%s2417_s3 + $0x1c0] sm:$0xf] }
  0x14   : > { %574 = vmatpush.bf16.msra.mxu3 %v1347_v25  ;;  %v1339_v38 = vor.u32 %v1708_v31, %v1336_v32  ;;  %v1707_v39 = vld [vmem:[%s2417_s3 + $0x1c4] sm:$0xf0]  ;;  %v1690_v40 = vld [vmem:[%s2417_s3 + $0x144] sm:$0xf]  ;;  %v1264_v41 = vld [vmem:[%s2417_s3 + $0x148] sm:$0xf0]  ;;  %v1263_v44 = vor.u32 %v1691_v36, %v1262_v35 }
  0x15   : > { %v1706_v42 = vld [vmem:[%s2417_s3 + $0x1c4] sm:$0xf]  ;;  %v1328_v43 = vld [vmem:[%s2417_s3 + $0x1c8] sm:$0xf0]  ;;  %v1327_v45 = vor.u32 %v1707_v39, %v1326_v37  ;;  %v1267_v46 = vor.u32 %v1690_v40, %v1264_v41  ;;  %v1254_v47 = vld [vmem:[%s2417_s3 + $0x130] sm:$0xf] }
  0x16   : > { %536 = vmatpush.bf16.msra.mxu0 %v1271_v29  ;;  %v1689_v48 = vld [vmem:[%s2417_s3 + $0x134] sm:$0xf0]  ;;  %v1318_v49 = vld [vmem:[%s2417_s3 + $0x1b0] sm:$0xf]  ;;  %v1331_v50 = vor.u32 %v1706_v42, %v1328_v43  ;;  %v1688_v52 = vld [vmem:[%s2417_s3 + $0x134] sm:$0xf] }
  0x17   : > { %549 = vmatpush.bf16.msra.mxu1 %v1335_v33  ;;  %562 = vmatpush.bf16.msra.mxu2 %v1275_v34  ;;  %v1705_v51 = vld [vmem:[%s2417_s3 + $0x1b4] sm:$0xf0]  ;;  %v1256_v53 = vld [vmem:[%s2417_s3 + $0x138] sm:$0xf0]  ;;  %v1704_v54 = vld [vmem:[%s2417_s3 + $0x1b4] sm:$0xf]  ;;  %v1255_v56 = vor.u32 %v1689_v48, %v1254_v47 }
  0x18   : > { %575 = vmatpush.bf16.msra.mxu3 %v1339_v38  ;;  %v1320_v55 = vld [vmem:[%s2417_s3 + $0x1b8] sm:$0xf0]  ;;  %v1319_v57 = vor.u32 %v1705_v51, %v1318_v49  ;;  %v1259_v58 = vor.u32 %v1688_v52, %v1256_v53  ;;  %v1246_v59 = vld [vmem:[%s2417_s3 + $0x120] sm:$0xf]  ;;  %v1687_v60 = vld [vmem:[%s2417_s3 + $0x124] sm:$0xf0] }
  0x19   : > { %v1310_v61 = vld [vmem:[%s2417_s3 + $0x1a0] sm:$0xf]  ;;  %v1323_v62 = vor.u32 %v1704_v54, %v1320_v55  ;;  %v1703_v63 = vld [vmem:[%s2417_s3 + $0x1a4] sm:$0xf0]  ;;  %v1686_v0 = vld [vmem:[%s2417_s3 + $0x124] sm:$0xf]  ;;  %v1247_v4 = vor.u32 %v1687_v60, %v1246_v59 }
  0x1a   : > { %537 = vmatpush.bf16.msra.mxu0 %v1263_v44  ;;  %v1248_v1 = vld [vmem:[%s2417_s3 + $0x128] sm:$0xf0]  ;;  %v1702_v2 = vld [vmem:[%s2417_s3 + $0x1a4] sm:$0xf]  ;;  %v1311_v5 = vor.u32 %v1703_v63, %v1310_v61  ;;  %v1238_v7 = vld [vmem:[%s2417_s3 + $0x110] sm:$0xf] }
  0x1b   : > { %550 = vmatpush.bf16.msra.mxu1 %v1327_v45  ;;  %563 = vmatpush.bf16.msra.mxu2 %v1267_v46  ;;  %v1312_v3 = vld [vmem:[%s2417_s3 + $0x1a8] sm:$0xf0]  ;;  %v1251_v6 = vor.u32 %v1686_v0, %v1248_v1  ;;  %v1685_v8 = vld [vmem:[%s2417_s3 + $0x114] sm:$0xf0]  ;;  %v1302_v9 = vld [vmem:[%s2417_s3 + $0x190] sm:$0xf] }
  0x1c   : > { %576 = vmatpush.bf16.msra.mxu3 %v1331_v50  ;;  %v1315_v10 = vor.u32 %v1702_v2, %v1312_v3  ;;  %v1701_v11 = vld [vmem:[%s2417_s3 + $0x194] sm:$0xf0]  ;;  %v1684_v12 = vld [vmem:[%s2417_s3 + $0x114] sm:$0xf]  ;;  %v1240_v13 = vld [vmem:[%s2417_s3 + $0x118] sm:$0xf0]  ;;  %v1239_v16 = vor.u32 %v1685_v8, %v1238_v7 }
  0x1d   : > { %v1700_v14 = vld [vmem:[%s2417_s3 + $0x194] sm:$0xf]  ;;  %v1304_v15 = vld [vmem:[%s2417_s3 + $0x198] sm:$0xf0]  ;;  %v1230_v17 = vld [vmem:[%s2417_s3 + $0x100] sm:$0xf]  ;;  %v1303_v19 = vor.u32 %v1701_v11, %v1302_v9  ;;  %v1243_v20 = vor.u32 %v1684_v12, %v1240_v13 }
  0x1e   : > { %538 = vmatpush.bf16.msra.mxu0 %v1255_v56  ;;  %v1683_v18 = vld [vmem:[%s2417_s3 + $0x104] sm:$0xf0]  ;;  %v1294_v21 = vld [vmem:[%s2417_s3 + $0x180] sm:$0xf]  ;;  %v1682_v23 = vld [vmem:[%s2417_s3 + $0x104] sm:$0xf]  ;;  %v1307_v24 = vor.u32 %v1700_v14, %v1304_v15 }
  0x1f   : > { %551 = vmatpush.bf16.msra.mxu1 %v1319_v57  ;;  %564 = vmatpush.bf16.msra.mxu2 %v1259_v58  ;;  %v1699_v22 = vld [vmem:[%s2417_s3 + $0x184] sm:$0xf0]  ;;  %v1232_v25 = vld [vmem:[%s2417_s3 + $0x108] sm:$0xf0]  ;;  %v1698_v26 = vld [vmem:[%s2417_s3 + $0x184] sm:$0xf]  ;;  %v1231_v31 = vor.u32 %v1683_v18, %v1230_v17 }
  0x20   : > { %577 = vmatpush.bf16.msra.mxu3 %v1323_v62  ;;  %v1296_v27 = vld [vmem:[%s2417_s3 + $0x188] sm:$0xf0]  ;;  %v1414_v28 = vld [vmem:[%s2417_s3 + $0x70] sm:$0xf]  ;;  %v1665_v29 = vld [vmem:[%s2417_s3 + $0x74] sm:$0xf0]  ;;  %v1295_v35 = vor.u32 %v1699_v22, %v1294_v21  ;;  %v1235_v36 = vor.u32 %v1682_v23, %v1232_v25 }
  0x21   : > { %v1478_v30 = vld [vmem:[%s2417_s3 + $0xf0] sm:$0xf]  ;;  %v1681_v32 = vld [vmem:[%s2417_s3 + $0xf4] sm:$0xf0]  ;;  %v1664_v33 = vld [vmem:[%s2417_s3 + $0x74] sm:$0xf]  ;;  %v1299_v39 = vor.u32 %v1698_v26, %v1296_v27  ;;  %v1415_v40 = vor.u32 %v1665_v29, %v1414_v28 }
  0x22   : > { %539 = vmatpush.bf16.msra.mxu0 %v1247_v4  ;;  %v1416_v34 = vld [vmem:[%s2417_s3 + $0x78] sm:$0xf0]  ;;  %v1680_v37 = vld [vmem:[%s2417_s3 + $0xf4] sm:$0xf]  ;;  %v1406_v41 = vld [vmem:[%s2417_s3 + $0x60] sm:$0xf]  ;;  %v1479_v43 = vor.u32 %v1681_v32, %v1478_v30 }
  0x23   : > { %552 = vmatpush.bf16.msra.mxu1 %v1311_v5  ;;  %565 = vmatpush.bf16.msra.mxu2 %v1251_v6  ;;  %v1480_v38 = vld [vmem:[%s2417_s3 + $0xf8] sm:$0xf0]  ;;  %v1663_v42 = vld [vmem:[%s2417_s3 + $0x64] sm:$0xf0]  ;;  %v1419_v44 = vor.u32 %v1664_v33, %v1416_v34  ;;  %v1470_v45 = vld [vmem:[%s2417_s3 + $0xe0] sm:$0xf] }
  0x24   : > { %578 = vmatpush.bf16.msra.mxu3 %v1315_v10  ;;  %v1679_v46 = vld [vmem:[%s2417_s3 + $0xe4] sm:$0xf0]  ;;  %v1662_v47 = vld [vmem:[%s2417_s3 + $0x64] sm:$0xf]  ;;  %v1483_v48 = vor.u32 %v1680_v37, %v1480_v38  ;;  %v1408_v49 = vld [vmem:[%s2417_s3 + $0x68] sm:$0xf0]  ;;  %v1407_v54 = vor.u32 %v1663_v42, %v1406_v41 }
  0x25   : > { %v1678_v50 = vld [vmem:[%s2417_s3 + $0xe4] sm:$0xf]  ;;  %v1472_v51 = vld [vmem:[%s2417_s3 + $0xe8] sm:$0xf0]  ;;  %v1398_v52 = vld [vmem:[%s2417_s3 + $0x50] sm:$0xf]  ;;  %v1471_v60 = vor.u32 %v1679_v46, %v1470_v45  ;;  %v1411_v61 = vor.u32 %v1662_v47, %v1408_v49 }
  0x26   : > { %540 = vmatpush.bf16.msra.mxu0 %v1239_v16  ;;  %v1661_v53 = vld [vmem:[%s2417_s3 + $0x54] sm:$0xf0]  ;;  %v1462_v55 = vld [vmem:[%s2417_s3 + $0xd0] sm:$0xf]  ;;  %v1660_v57 = vld [vmem:[%s2417_s3 + $0x54] sm:$0xf]  ;;  %v1475_v63 = vor.u32 %v1678_v50, %v1472_v51 }
  0x27   : > { %553 = vmatpush.bf16.msra.mxu1 %v1303_v19  ;;  %566 = vmatpush.bf16.msra.mxu2 %v1243_v20  ;;  %v1677_v56 = vld [vmem:[%s2417_s3 + $0xd4] sm:$0xf0]  ;;  %v1400_v58 = vld [vmem:[%s2417_s3 + $0x58] sm:$0xf0]  ;;  %v1763_v59 = vmov 0.0   ;;  %s2422_s19 = smov (!%p2050_p3, %s1185_s19), 1  ;;  %v1399_v3 = vor.u32 %v1661_v53, %v1398_v52 }
  0x28   : > { %579 = vmatpush.bf16.msra.mxu3 %v1307_v24  ;;  %263 = vst [vmem:[#allocation2 + $0x10] sm:$0xff] %v1763_v59  ;;  %v241_v62 = vld [vmem:[%s2415_s1] sm:$0x3]  ;;  %v1676_v0 = vld [vmem:[%s2417_s3 + $0xd4] sm:$0xf]  ;;  %s1647_s13 = sshll.u32 %s2422_s19, 3  ;;  %v1463_v8 = vor.u32 %v1677_v56, %v1462_v55  ;;  %v1403_v9 = vor.u32 %v1660_v57, %v1400_v58 }
  0x29   : > { %265 = vst [vmem:[#allocation2 + $0x18] sm:$0x3] %v1763_v59  ;;  %v1464_v1 = vld [vmem:[%s2417_s3 + $0xd8] sm:$0xf0]  ;;  %v249_v2 = vld [vmem:[%s2416_s2] sm:$0x3]  ;;  %s227_s24 = scalar_lea.vmem %s2414_s0, %s1647_s13  ;;  %s232_s8 = scalar_lea.vmem %s2418_s4, %s1647_s13 }
  0x2a   : > { %541 = vmatpush.bf16.msra.mxu0 %v1231_v31  ;;  %264 = vst [vmem:[#allocation2] sm:$0xff] %v1763_v59  ;;  %v1390_v4 = vld [vmem:[%s2417_s3 + $0x40] sm:$0xf]  ;;  %v1659_v5 = vld [vmem:[%s2417_s3 + $0x44] sm:$0xf0]  ;;  %v243_v6 = vperm.slane %v241_v62, 0  ;;  %v1467_v10 = vor.u32 %v1676_v0, %v1464_v1 }
  0x2b   : > { %554 = vmatpush.bf16.msra.mxu1 %v1295_v35  ;;  %567 = vmatpush.bf16.msra.mxu2 %v1235_v36  ;;  %266 = vst [vmem:[#allocation2 + $0x8] sm:$0x3] %v1763_v59  ;;  %v244_v7 = vperm.slane %v241_v62, 1  ;;  %v1454_v11 = vld [vmem:[%s2417_s3 + $0xc0] sm:$0xf]  ;;  %v251_v17 = vperm.slane %v249_v2, 0  ;;  %v1391_v22 = vor.u32 %v1659_v5, %v1390_v4 }
  0x2c   : > { %580 = vmatpush.bf16.msra.mxu3 %v1299_v39  ;;  %v1675_v12 = vld [vmem:[%s2417_s3 + $0xc4] sm:$0xf0]  ;;  %v238_v13 = vld [vmem:[%s227_s24] sm:$0xff]  ;;  %v1392_v15 = vld [vmem:[%s2417_s3 + $0x48] sm:$0xf0]  ;;  %v252_v19 = vperm.slane %v249_v2, 1 }
  0x2d   : > { %v1658_v14 = vld [vmem:[%s2417_s3 + $0x44] sm:$0xf]  ;;  %v239_v16 = vunpack.c.l.bf16 %v238_v13  ;;  %v240_v18 = vunpack.c.h.bf16 %v238_v13  ;;  %v1456_v21 = vld [vmem:[%s2417_s3 + $0xc8] sm:$0xf0]  ;;  %v1382_v24 = vld [vmem:[%s2417_s3 + $0x30] sm:$0xf]  ;;  %v1455_v27 = vor.u32 %v1675_v12, %v1454_v11 }
  0x2e   : > { %746 = vmatpush.bf16.msrb.mxu0 %v1415_v40  ;;  %v1674_v20 = vld [vmem:[%s2417_s3 + $0xc4] sm:$0xf]  ;;  %v1657_v25 = vld [vmem:[%s2417_s3 + $0x34] sm:$0xf0]  ;;  %v1395_v28 = vor.u32 %v1658_v14, %v1392_v15  ;;  %v1446_v29 = vld [vmem:[%s2417_s3 + $0xb0] sm:$0xf] }
  0x2f   : > { %759 = vmatpush.bf16.msrb.mxu1 %v1479_v43  ;;  %772 = vmatpush.bf16.msrb.mxu2 %v1419_v44  ;;  %v247_v23 = vmul.f32 %v243_v6, %v239_v16  ;;  %v248_v26 = vmul.f32 %v244_v7, %v240_v18  ;;  %v1459_v30 = vor.u32 %v1674_v20, %v1456_v21  ;;  %v1673_v32 = vld [vmem:[%s2417_s3 + $0xb4] sm:$0xf0]  ;;  %v1656_v33 = vld [vmem:[%s2417_s3 + $0x34] sm:$0xf]  ;;  %v1384_v34 = vld [vmem:[%s2417_s3 + $0x38] sm:$0xf0] }
  0x30   : > { %785 = vmatpush.bf16.msrb.mxu3 %v1483_v48  ;;  %v1383_v36 = vor.u32 %v1657_v25, %v1382_v24  ;;  %v1672_v37 = vld [vmem:[%s2417_s3 + $0xb4] sm:$0xf]  ;;  %v1448_v38 = vld [vmem:[%s2417_s3 + $0xb8] sm:$0xf0]  ;;  %v1447_v41 = vor.u32 %v1673_v32, %v1446_v29  ;;  %v1387_v42 = vor.u32 %v1656_v33, %v1384_v34  ;;  %v1374_v43 = vld [vmem:[%s2417_s3 + $0x20] sm:$0xf] }
  0x31   : > { %v255_v31 = vadd.f32 %v251_v17, %v247_v23  ;;  %v256_v35 = vadd.f32 %v252_v19, %v248_v26  ;;  %v1655_v44 = vld [vmem:[%s2417_s3 + $0x24] sm:$0xf0]  ;;  %v1438_v45 = vld [vmem:[%s2417_s3 + $0xa0] sm:$0xf]  ;;  %v1451_v47 = vor.u32 %v1672_v37, %v1448_v38  ;;  %v1654_v50 = vld [vmem:[%s2417_s3 + $0x24] sm:$0xf] }
  0x32   : > { %747 = vmatpush.bf16.msrb.mxu0 %v1407_v54  ;;  %v1671_v49 = vld [vmem:[%s2417_s3 + $0xa4] sm:$0xf0]  ;;  %v1376_v51 = vld [vmem:[%s2417_s3 + $0x28] sm:$0xf0]  ;;  %v1670_v54 = vld [vmem:[%s2417_s3 + $0xa4] sm:$0xf]  ;;  %v1375_v56 = vor.u32 %v1655_v44, %v1374_v43 }
  0x33   : > { %760 = vmatpush.bf16.msrb.mxu1 %v1471_v60  ;;  %773 = vmatpush.bf16.msrb.mxu2 %v1411_v61  ;;  %vm257_vm0 = vcmp.ge.f32.partialorder %v255_v31, 0.0  ;;  %v259_v39 = vmul.f32 0.01, %v255_v31  ;;  %vm258_vm1 = vcmp.ge.f32.partialorder %v256_v35, 0.0  ;;  %v260_v40 = vmul.f32 0.01, %v256_v35 }
  0x34   : > { %786 = vmatpush.bf16.msrb.mxu3 %v1475_v63  ;;  %v1440_v55 = vld [vmem:[%s2417_s3 + $0xa8] sm:$0xf0]  ;;  %v1366_v57 = vld [vmem:[%s2417_s3 + $0x10] sm:$0xf]  ;;  %v1653_v58 = vld [vmem:[%s2417_s3 + $0x14] sm:$0xf0]  ;;  %v1439_v59 = vor.u32 %v1671_v49, %v1438_v45  ;;  %v1379_v60 = vor.u32 %v1654_v50, %v1376_v51 }
  0x35   : > { %v261_v46 = vsel %vm257_vm0, %v255_v31, %v259_v39  ;;  %v262_v48 = vsel %vm258_vm1, %v256_v35, %v260_v40  ;;  %v1430_v61 = vld [vmem:[%s2417_s3 + $0x90] sm:$0xf]  ;;  %v1669_v62 = vld [vmem:[%s2417_s3 + $0x94] sm:$0xf0]  ;;  %v1443_v63 = vor.u32 %v1670_v54, %v1440_v55  ;;  %v1652_v0 = vld [vmem:[%s2417_s3 + $0x14] sm:$0xf]  ;;  %v1367_v4 = vor.u32 %v1653_v58, %v1366_v57 }
  0x36   : > { %748 = vmatpush.bf16.msrb.mxu0 %v1399_v3  ;;  %v269_v52 = vrot.slane %v261_v46, 7  ;;  %v270_v53 = vrot.slane %v262_v48, 7  ;;  %v1368_v1 = vld [vmem:[%s2417_s3 + $0x18] sm:$0xf0]  ;;  %v1668_v2 = vld [vmem:[%s2417_s3 + $0x94] sm:$0xf]  ;;  %v1431_v5 = vor.u32 %v1669_v62, %v1430_v61 }
  0x37   : > { %761 = vmatpush.bf16.msrb.mxu1 %v1463_v8  ;;  %774 = vmatpush.bf16.msrb.mxu2 %v1403_v9  ;;  %v1432_v3 = vld [vmem:[%s2417_s3 + $0x98] sm:$0xf0]  ;;  %v1371_v6 = vor.u32 %v1652_v0, %v1368_v1  ;;  %v1358_v7 = vld [vmem:[%s2417_s3] sm:$0xf]  ;;  %v1651_v8 = vld [vmem:[%s2417_s3 + $0x4] sm:$0xf0] }
  0x38   : > { %787 = vmatpush.bf16.msrb.mxu3 %v1467_v10  ;;  %273 = vst [vmem:[#allocation2 + $0x10] sm:$0xfe] %v269_v52  ;;  %v1422_v9 = vld [vmem:[%s2417_s3 + $0x80] sm:$0xf]  ;;  %v1435_v10 = vor.u32 %v1668_v2, %v1432_v3  ;;  %v1667_v11 = vld [vmem:[%s2417_s3 + $0x84] sm:$0xf0]  ;;  %v1359_v17 = vor.u32 %v1651_v8, %v1358_v7 }
  0x39   : > { %275 = vst [vmem:[#allocation2 + $0x18] sm:$0x1] %v269_v52  ;;  %v1650_v12 = vld [vmem:[%s2417_s3 + $0x4] sm:$0xf]  ;;  %v1360_v13 = vld [vmem:[%s2417_s3 + $0x8] sm:$0xf0]  ;;  %v1423_v19 = vor.u32 %v1667_v11, %v1422_v9 }
  0x3a   : > { %749 = vmatpush.bf16.msrb.mxu0 %v1391_v22  ;;  %274 = vst [vmem:[#allocation2] sm:$0xfe] %v270_v53  ;;  %v1666_v14 = vld [vmem:[%s2417_s3 + $0x84] sm:$0xf]  ;;  %v1424_v15 = vld [vmem:[%s2417_s3 + $0x88] sm:$0xf0]  ;;  %v1363_v20 = vor.u32 %v1650_v12, %v1360_v13 }
  0x3b   : > { %762 = vmatpush.bf16.msrb.mxu1 %v1455_v27  ;;  %775 = vmatpush.bf16.msrb.mxu2 %v1395_v28  ;;  %276 = vst [vmem:[#allocation2 + $0x8] sm:$0x1] %v270_v53  ;;  %v1427_v23 = vor.u32 %v1666_v14, %v1424_v15  ;;  %v1574_v25 = vld [vmem:[%s2417_s3 + $0x270] sm:$0xf]  ;;  %v1729_v26 = vld [vmem:[%s2417_s3 + $0x274] sm:$0xf0] }
  0x3c   : > { %788 = vmatpush.bf16.msrb.mxu3 %v1459_v30  ;;  %v1728_v30 = vld [vmem:[%s2417_s3 + $0x274] sm:$0xf]  ;;  %v1576_v31 = vld [vmem:[%s2417_s3 + $0x278] sm:$0xf0]  ;;  %v1638_v32 = vld [vmem:[%s2417_s3 + $0x2f0] sm:$0xf]  ;;  %v1575_v39 = vor.u32 %v1729_v26, %v1574_v25 }
  0x3d   : > { %v1745_v33 = vld [vmem:[%s2417_s3 + $0x2f4] sm:$0xf0]  ;;  %v1744_v34 = vld [vmem:[%s2417_s3 + $0x2f4] sm:$0xf]  ;;  %v1640_v38 = vld [vmem:[%s2417_s3 + $0x2f8] sm:$0xf0]  ;;  %v1579_v40 = vor.u32 %v1728_v30, %v1576_v31 }
  0x3e   : > { %750 = vmatpush.bf16.msrb.mxu0 %v1383_v36  ;;  %v1726_v45 = vld [vmem:[%s2417_s3 + $0x264] sm:$0xf]  ;;  %v1568_v46 = vld [vmem:[%s2417_s3 + $0x268] sm:$0xf0]  ;;  %v1643_v48 = vor.u32 %v1744_v34, %v1640_v38  ;;  %v1630_v49 = vld [vmem:[%s2417_s3 + $0x2e0] sm:$0xf] }
  0x3f   : > { %763 = vmatpush.bf16.msrb.mxu1 %v1447_v41  ;;  %776 = vmatpush.bf16.msrb.mxu2 %v1387_v42  ;;  %v281_v16 = vld [vmem:[#allocation2 + $0x10] sm:$0xfe]  ;;  %v1566_v41 = vld [vmem:[%s2417_s3 + $0x260] sm:$0xf]  ;;  %v1727_v42 = vld [vmem:[%s2417_s3 + $0x264] sm:$0xf0]  ;;  %v1571_v55 = vor.u32 %v1726_v45, %v1568_v46 }
  0x40   : > { %789 = vmatpush.bf16.msrb.mxu3 %v1451_v47  ;;  %v283_v18 = vld [vmem:[#allocation2 + $0x18] sm:$0x1]  ;;  %v1639_v47 = vor.u32 %v1745_v33, %v1638_v32  ;;  %v1743_v51 = vld [vmem:[%s2417_s3 + $0x2e4] sm:$0xf0]  ;;  %v1742_v52 = vld [vmem:[%s2417_s3 + $0x2e4] sm:$0xf]  ;;  %v1567_v54 = vor.u32 %v1727_v42, %v1566_v41 }
  0x41   : > { %v285_v21 = vpack.c.bf16 %v283_v18, %v281_v16  ;;  %v282_v22 = vld [vmem:[#allocation2] sm:$0xfe]  ;;  %v1632_v53 = vld [vmem:[%s2417_s3 + $0x2e8] sm:$0xf0]  ;;  %v1725_v57 = vld [vmem:[%s2417_s3 + $0x254] sm:$0xf0] }
  0x42   : > { %751 = vmatpush.bf16.msrb.mxu0 %v1375_v56  ;;  %v284_v24 = vld [vmem:[#allocation2 + $0x8] sm:$0x1]  ;;  %v1558_v56 = vld [vmem:[%s2417_s3 + $0x250] sm:$0xf]  ;;  %v1724_v58 = vld [vmem:[%s2417_s3 + $0x254] sm:$0xf]  ;;  %v1635_v61 = vor.u32 %v1742_v52, %v1632_v53 }
  0x43   : > { %764 = vmatpush.bf16.msrb.mxu1 %v1439_v59  ;;  %777 = vmatpush.bf16.msrb.mxu2 %v1379_v60  ;;  %v359_v27 = vshrl.u32 %v285_v21, 16  ;;  %v361_v28 = vshll.u32 %v285_v21, 16  ;;  %v286_v29 = vpack.c.bf16 %v284_v24, %v282_v22  ;;  %v1560_v59 = vld [vmem:[%s2417_s3 + $0x258] sm:$0xf0]  ;;  %v1631_v60 = vor.u32 %v1743_v51, %v1630_v49  ;;  %v1622_v62 = vld [vmem:[%s2417_s3 + $0x2d0] sm:$0xf] }
  0x44   : > { %790 = vmatpush.bf16.msrb.mxu3 %v1443_v63  ;;  %v1741_v63 = vld [vmem:[%s2417_s3 + $0x2d4] sm:$0xf0]  ;;  %v1740_v0 = vld [vmem:[%s2417_s3 + $0x2d4] sm:$0xf]  ;;  %v1624_v1 = vld [vmem:[%s2417_s3 + $0x2d8] sm:$0xf0]  ;;  %v1559_v2 = vor.u32 %v1725_v57, %v1558_v56  ;;  %v1563_v3 = vor.u32 %v1724_v58, %v1560_v59 }
  0x45   : > { %v363_v35 = vrot.slane %v361_v28, 1  ;;  %v366_v36 = vshrl.u32 %v286_v29, 16  ;;  %v368_v37 = vshll.u32 %v286_v29, 16  ;;  %v1552_v7 = vld [vmem:[%s2417_s3 + $0x248] sm:$0xf0]  ;;  %v1623_v8 = vor.u32 %v1741_v63, %v1622_v62  ;;  %v277_v14 = vld [vmem:[#allocation2 + $0x10] sm:$0xff] }
  0x46   : > { %752 = vmatpush.bf16.msrb.mxu0 %v1367_v4  ;;  %v1550_v4 = vld [vmem:[%s2417_s3 + $0x240] sm:$0xf]  ;;  %v1627_v9 = vor.u32 %v1740_v0, %v1624_v1  ;;  %v1739_v11 = vld [vmem:[%s2417_s3 + $0x2c4] sm:$0xf0]  ;;  %v1738_v12 = vld [vmem:[%s2417_s3 + $0x2c4] sm:$0xf]  ;;  %v279_v25 = vpack.c.bf16 %v277_v14, %v277_v14 }
  0x47   : > { %765 = vmatpush.bf16.msrb.mxu1 %v1431_v5  ;;  %778 = vmatpush.bf16.msrb.mxu2 %v1371_v6  ;;  %v364_v43 = vor.u32 %v363_v35, %v359_v27  ;;  %v370_v44 = vrot.slane %v368_v37, 1  ;;  %v1723_v5 = vld [vmem:[%s2417_s3 + $0x244] sm:$0xf0]  ;;  %v1722_v6 = vld [vmem:[%s2417_s3 + $0x244] sm:$0xf]  ;;  %s1649_s13 = sshll.u32 %s2422_s19, 2 }
  0x48   : > { %791 = vmatpush.bf16.msrb.mxu3 %v1435_v10  ;;  %v1614_v10 = vld [vmem:[%s2417_s3 + $0x2c0] sm:$0xf]  ;;  %v1616_v13 = vld [vmem:[%s2417_s3 + $0x2c8] sm:$0xf0]  ;;  %v1551_v15 = vor.u32 %v1723_v5, %v1550_v4  ;;  %v1555_v16 = vor.u32 %v1722_v6, %v1552_v7  ;;  %v1721_v18 = vld [vmem:[%s2417_s3 + $0x234] sm:$0xf0]  ;;  %s237_s11 = scalar_lea.vmem %s2419_s5, %s1649_s13 }
  0x49   : > { %568 = vmatmul.bf16.vlgmr.msra.gmra.mxu2 %v364_v43  ;;  %v371_v50 = vor.u32 %v370_v44, %v366_v36  ;;  %542 = vmatmul.bf16.vlgmr.msra.gmra.mxu0 %v364_v43  ;;  %v278_v21 = vld [vmem:[#allocation2] sm:$0xff]  ;;  %v1615_v22 = vor.u32 %v1739_v11, %v1614_v10  ;;  %v1606_v24 = vld [vmem:[%s2417_s3 + $0x2b0] sm:$0xf]  ;;  %v1737_v26 = vld [vmem:[%s2417_s3 + $0x2b4] sm:$0xf0]  ;;  %vm1068_vm2 = vcmask 1040384  }
  0x4a   : > { %753 = vmatpush.bf16.msrb.mxu0 %v1359_v17  ;;  %v1542_v17 = vld [vmem:[%s2417_s3 + $0x230] sm:$0xf]  ;;  %v1736_v27 = vld [vmem:[%s2417_s3 + $0x2b4] sm:$0xf]  ;;  %v1608_v28 = vld [vmem:[%s2417_s3 + $0x2b8] sm:$0xf0]  ;;  %v280_v32 = vpack.c.bf16 %v278_v21, %v278_v21  ;;  %v1607_v36 = vor.u32 %v1737_v26, %v1606_v24 }
  0x4b   : > { %766 = vmatpush.bf16.msrb.mxu1 %v1423_v19  ;;  %779 = vmatpush.bf16.msrb.mxu2 %v1363_v20  ;;  %v1720_v19 = vld [vmem:[%s2417_s3 + $0x234] sm:$0xf]  ;;  %v1544_v20 = vld [vmem:[%s2417_s3 + $0x238] sm:$0xf0]  ;;  %v1543_v29 = vor.u32 %v1721_v18, %v1542_v17  ;;  %v1534_v31 = vld [vmem:[%s2417_s3 + $0x220] sm:$0xf]  ;;  %v1611_v37 = vor.u32 %v1736_v27, %v1608_v28 }
  0x4c   : > { %792 = vmatpush.bf16.msrb.mxu3 %v1427_v23  ;;  %555 = vmatmul.bf16.vlgmr.msra.gmra.mxu1 %v371_v50  ;;  %v1619_v23 = vor.u32 %v1738_v12, %v1616_v13  ;;  %v1547_v30 = vor.u32 %v1720_v19, %v1544_v20  ;;  %v1719_v33 = vld [vmem:[%s2417_s3 + $0x224] sm:$0xf0]  ;;  %v1718_v34 = vld [vmem:[%s2417_s3 + $0x224] sm:$0xf]  ;;  %v1536_v35 = vld [vmem:[%s2417_s3 + $0x228] sm:$0xf0] }
  0x4d   : > { %581 = vmatmul.bf16.vlgmr.msra.gmra.mxu3 %v371_v50  ;;  %v1598_v38 = vld [vmem:[%s2417_s3 + $0x2a0] sm:$0xf]  ;;  %v1600_v41 = vld [vmem:[%s2417_s3 + $0x2a8] sm:$0xf0]  ;;  %v1535_v42 = vor.u32 %v1719_v33, %v1534_v31  ;;  %v1539_v43 = vor.u32 %v1718_v34, %v1536_v35  ;;  %v1526_v44 = vld [vmem:[%s2417_s3 + $0x210] sm:$0xf] }
  0x4e   : > { %997 = vmatpush.bf16.msra.mxu0 %v1575_v39  ;;  %v1735_v39 = vld [vmem:[%s2417_s3 + $0x2a4] sm:$0xf0]  ;;  %v1717_v45 = vld [vmem:[%s2417_s3 + $0x214] sm:$0xf0]  ;;  %v1716_v46 = vld [vmem:[%s2417_s3 + $0x214] sm:$0xf] }
  0x4f   : > { %1023 = vmatpush.bf16.msra.mxu2 %v1579_v40  ;;  %1010 = vmatpush.bf16.msra.mxu1 %v1639_v47  ;;  %v1734_v40 = vld [vmem:[%s2417_s3 + $0x2a4] sm:$0xf]  ;;  %v1528_v47 = vld [vmem:[%s2417_s3 + $0x218] sm:$0xf0]  ;;  %v1590_v50 = vld [vmem:[%s2417_s3 + $0x290] sm:$0xf] }
  0x50   : > { %1036 = vmatpush.bf16.msra.mxu3 %v1643_v48  ;;  %v1599_v48 = vor.u32 %v1735_v39, %v1598_v38  ;;  %v1603_v49 = vor.u32 %v1734_v40, %v1600_v41  ;;  %v1733_v51 = vld [vmem:[%s2417_s3 + $0x294] sm:$0xf0]  ;;  %v1732_v52 = vld [vmem:[%s2417_s3 + $0x294] sm:$0xf]  ;;  %v1592_v53 = vld [vmem:[%s2417_s3 + $0x298] sm:$0xf0] }
  0x51   : > { %v1518_v56 = vld [vmem:[%s2417_s3 + $0x200] sm:$0xf]  ;;  %v287_v57 = vld [vmem:[#allocation2 + $0x10] sm:$0xfc]  ;;  %v289_v58 = vld [vmem:[#allocation2 + $0x18] sm:$0x3]  ;;  %v1591_v62 = vor.u32 %v1733_v51, %v1590_v50  ;;  %v1595_v63 = vor.u32 %v1732_v52, %v1592_v53 }
  0x52   : > { %998 = vmatpush.bf16.msra.mxu0 %v1567_v54  ;;  %v1527_v54 = vor.u32 %v1717_v45, %v1526_v44  ;;  %v1715_v59 = vld [vmem:[%s2417_s3 + $0x204] sm:$0xf0]  ;;  %v1582_v0 = vld [vmem:[%s2417_s3 + $0x280] sm:$0xf]  ;;  %v1730_v4 = vld [vmem:[%s2417_s3 + $0x284] sm:$0xf]  ;;  %v291_v6 = vpack.c.bf16 %v289_v58, %v287_v57 }
  0x53   : > { %1024 = vmatpush.bf16.msra.mxu2 %v1571_v55  ;;  %1011 = vmatpush.bf16.msra.mxu1 %v1631_v60  ;;  %v1531_v55 = vor.u32 %v1716_v46, %v1528_v47  ;;  %v1714_v60 = vld [vmem:[%s2417_s3 + $0x204] sm:$0xf]  ;;  %v1584_v5 = vld [vmem:[%s2417_s3 + $0x288] sm:$0xf0]  ;;  %v1519_v7 = vor.u32 %v1715_v59, %v1518_v56 }
  0x54   : > { %1037 = vmatpush.bf16.msra.mxu3 %v1635_v61  ;;  %v1520_v61 = vld [vmem:[%s2417_s3 + $0x208] sm:$0xf0]  ;;  %v288_v1 = vld [vmem:[#allocation2] sm:$0xfc]  ;;  %v1587_v11 = vor.u32 %v1730_v4, %v1584_v5  ;;  %v833_v12 = vrot.slane %v291_v6, 1  ;;  %v1071_v4 = vlaneseq }
  0x56   : > { %999 = vmatpush.bf16.msra.mxu0 %v1559_v2  ;;  %v290_v2 = vld [vmem:[#allocation2 + $0x8] sm:$0x3]  ;;  %vm1073_vm3 = vcmp.lt.s32.totalorder %v1071_v4, 256 }
  0x57   : > { %1025 = vmatpush.bf16.msra.mxu2 %v1563_v3  ;;  %1012 = vmatpush.bf16.msra.mxu1 %v1623_v8  ;;  %v1731_v3 = vld [vmem:[%s2417_s3 + $0x284] sm:$0xf0]  ;;  %v1523_v8 = vor.u32 %v1714_v60, %v1520_v61 }
  0x58   : > { %1038 = vmatpush.bf16.msra.mxu3 %v1627_v9  ;;  %v292_v9 = vpack.c.bf16 %v290_v2, %v288_v1  ;;  %v1583_v10 = vor.u32 %v1731_v3, %v1582_v0 }
  0x59   : > { %780 = vmatmul.bf16.vlgmr.msrb.gmra.mxu2 %v279_v25  ;;  %754 = vmatmul.bf16.vlgmr.msrb.gmra.mxu0 %v279_v25 }
  0x5a   : > { %1000 = vmatpush.bf16.msra.mxu0 %v1551_v15  ;;  %v834_v13 = vrot.slane %v292_v9, 1 }
  0x5b   : > { %1026 = vmatpush.bf16.msra.mxu2 %v1555_v16  ;;  %1013 = vmatpush.bf16.msra.mxu1 %v1615_v22 }
  0x5c   : > { %1039 = vmatpush.bf16.msra.mxu3 %v1619_v23  ;;  %767 = vmatmul.bf16.vlgmr.msrb.gmra.mxu1 %v280_v32 }
  0x5d   : > { %793 = vmatmul.bf16.vlgmr.msrb.gmra.mxu3 %v280_v32 }
  0x5e   : > { %1001 = vmatpush.bf16.msra.mxu0 %v1543_v29 }
  0x5f   : > { %1027 = vmatpush.bf16.msra.mxu2 %v1547_v30  ;;  %1014 = vmatpush.bf16.msra.mxu1 %v1607_v36 }
  0x60   : > { %1040 = vmatpush.bf16.msra.mxu3 %v1611_v37 }
  0x62   : > { %1002 = vmatpush.bf16.msra.mxu0 %v1535_v42 }
  0x63   : > { %1028 = vmatpush.bf16.msra.mxu2 %v1539_v43  ;;  %1015 = vmatpush.bf16.msra.mxu1 %v1599_v48 }
  0x64   : > { %1041 = vmatpush.bf16.msra.mxu3 %v1603_v49 }
  0x66   : > { %1003 = vmatpush.bf16.msra.mxu0 %v1527_v54 }
  0x67   : > { %1029 = vmatpush.bf16.msra.mxu2 %v1531_v55  ;;  %1016 = vmatpush.bf16.msra.mxu1 %v1591_v62 }
  0x68   : > { %1042 = vmatpush.bf16.msra.mxu3 %v1595_v63 }
  0x6a   : > { %1004 = vmatpush.bf16.msra.mxu0 %v1519_v7 }
  0x6b   : > { %1030 = vmatpush.bf16.msra.mxu2 %v1523_v8  ;;  %1017 = vmatpush.bf16.msra.mxu1 %v1583_v10 }
  0x6c   : > { %1043 = vmatpush.bf16.msra.mxu3 %v1587_v11 }
  0x6d   : > { %1005 = vmatmul.bf16.vlgmr.msra.gmra.mxu0 %v833_v12 }
  0x6e   : > { %1031 = vmatmul.bf16.vlgmr.msra.gmra.mxu2 %v833_v12  ;;  %1018 = vmatmul.bf16.vlgmr.msra.gmra.mxu1 %v834_v13 }
  0x6f   : > { %1044 = vmatmul.bf16.vlgmr.msra.gmra.mxu3 %v834_v13 }
  0xc6   : > { %v543_v14 = vpop.f32.mrf.mxu0 }
  0xc9   : > { %v556_v15 = vpop.f32.mrf.mxu1 }
  0xca   : > { %v557_v28 = vadd.f32 %v556_v15, %v543_v14 }
  0xcc   : > { %v569_v16 = vpop.f32.mrf.mxu2 }
  0xce   : > { %v545_v18 = vpop.f32.mrf.mxu0 }
  0xd0   : > { %v582_v17 = vpop.f32.mrf.mxu3 }
  0xd1   : > { %v558_v19 = vpop.f32.mrf.mxu1  ;;  %v583_v33 = vadd.f32 %v582_v17, %v569_v16 }
  0xd4   : > { %v571_v20 = vpop.f32.mrf.mxu2 }
  0xd6   : > { %v755_v22 = vpop.f32.mrf.mxu0 }
  0xd7   : > { %v756_v30 = vadd.f32 %v755_v22, %v557_v28 }
  0xd8   : > { %v584_v21 = vpop.f32.mrf.mxu3 }
  0xd9   : > { %v768_v23 = vpop.f32.mrf.mxu1 }
  0xda   : > { %v769_v35 = vadd.f32 %v768_v23, %v756_v30 }
  0xdc   : > { %v781_v24 = vpop.f32.mrf.mxu2 }
  0xdd   : > { %v782_v37 = vadd.f32 %v781_v24, %v583_v33 }
  0xde   : > { %v757_v26 = vpop.f32.mrf.mxu0 }
  0xe0   : > { %v794_v25 = vpop.f32.mrf.mxu3 }
  0xe1   : > { %v770_v27 = vpop.f32.mrf.mxu1  ;;  %v795_v44 = vadd.f32 %v794_v25, %v782_v37 }
  0xe4   : > { %v783_v29 = vpop.f32.mrf.mxu2 }
  0xe8   : > { %v796_v31 = vpop.f32.mrf.mxu3 }
  0xea   : > { %v1006_v32 = vpop.f32.mrf.mxu0 }
  0xeb   : > { %v1019_v34 = vpop.f32.mrf.mxu1 }
  0xec   : > { %v1020_v36 = vadd.f32 %v1019_v34, %v1006_v32 }
  0xee   : > { %v1049_v38 = vadd.f32 %v1020_v36, %v769_v35 }
  0xf0   : > { %v1053_v40 = vrot.slane %v1049_v38, 4  ;;  %v1076_v41 = vmul.f32 %v1049_v38, %v1049_v38 }
  0xf1   : > { %v1032_v39 = vpop.f32.mrf.mxu2 }
  0xf2   : > { %v1045_v42 = vpop.f32.mrf.mxu3  ;;  %v1008_v43 = vpop.f32.mrf.mxu0  ;;  %v1054_v45 = vadd.f32 %v1053_v40, %v1049_v38  ;;  %v1078_v46 = vrot.slane %v1076_v41, 4 }
  0xf3   : > { %v1046_v47 = vadd.f32 %v1045_v42, %v1032_v39  ;;  %v1021_v48 = vpop.f32.mrf.mxu1 }
  0xf4   : > { %v1079_v50 = vadd.f32 %v1078_v46, %v1076_v41  ;;  %v1055_v51 = vrot.slane %v1054_v45, 2 }
  0xf5   : > { %v1050_v49 = vadd.f32 %v1046_v47, %v795_v44 }
  0xf6   : > { %v1080_v57 = vrot.slane %v1079_v50, 2  ;;  %v1056_v60 = vadd.f32 %v1055_v51, %v1054_v45 }
  0xf7   : > { %v1051_v52 = vpack.c.bf16 %v1050_v49, %v1049_v38  ;;  %v1059_v53 = vrot.slane %v1050_v49, 4  ;;  %v1077_v54 = vmul.f32 %v1050_v49, %v1050_v49 }
  0xf8   : > { %v1081_v0 = vadd.f32 %v1080_v57, %v1079_v50  ;;  %v1057_v2 = vrot.slane %v1056_v60, 1 }
  0xf9   : > { %v1034_v55 = vpop.f32.mrf.mxu2  ;;  %1052 = vst [vmem:[%s232_s8] sm:$0xff] %v1051_v52  ;;  %v1060_v56 = vadd.f32 %v1059_v53, %v1050_v49  ;;  %v1084_v58 = vrot.slane %v1077_v54, 4 }
  0xfa   : > { %v1047_v59 = vpop.f32.mrf.mxu3  ;;  %v1082_v7 = vrot.slane %v1081_v0, 1  ;;  %v1058_v9 = vadd.f32 %v1057_v2, %v1056_v60 }
  0xfb   : > { %v1061_v61 = vrot.slane %v1060_v56, 2  ;;  %v1085_v62 = vadd.f32 %v1084_v58, %v1077_v54 }
  0xfc   : > { %v1083_v13 = vadd.f32 %v1082_v7, %v1081_v0 }
  0xfd   : > { %v1062_v63 = vadd.f32 %v1061_v61, %v1060_v56  ;;  %v1086_v1 = vrot.slane %v1085_v62, 2 }
  0xff   : > { %v1063_v3 = vrot.slane %v1062_v63, 1  ;;  %v1087_v5 = vadd.f32 %v1086_v1, %v1085_v62 }
 0x101   : > { %v1064_v6 = vadd.f32 %v1063_v3, %v1062_v63  ;;  %v1088_v8 = vrot.slane %v1087_v5, 1 }
 0x103   : > { %v1067_v10 = vrot.slane %v1064_v6, 7  ;;  %v1089_v11 = vadd.f32 %v1088_v8, %v1087_v5 }
 0x105   : > { %v1069_v12 = vsel %vm1068_vm2, %v1058_v9, %v1067_v10  ;;  %v1092_v14 = vrot.slane %v1089_v11, 7 }
 0x106   : > { %1075 = vst.msk [vmem:[%s237_s11] ss:$2 sm:$0x3] %vm1073_vm3, %v1069_v12 }
 0x107   : > { %v1093_v15 = vsel %vm1068_vm2, %v1083_v13, %v1092_v14 }
 0x108   : > { %1644 = vst.msk [vmem:[%s237_s11 + $0x1] ss:$2 sm:$0x3] %vm1073_vm3, %v1093_v15 }
 0x109 PF: > { %s16_s18 = sadd.s32 1, %s1761_s18  }
 0x10a   : > { %p13_p4 = scmp.ge.s32.totalorder %s16_s18, 4  }
 0x10c   :  { %15 = sbr.rel (!%p13_p4) target bundleno = 1 (0x1), region = 81 }

</bundles_post_ra>
